<compile_context>
chip_gen: v5e
topology: v5e:2x2
jax: 0.10.0
libtpu: 0.0.40
codegen_flags: <defaults>
</compile_context>

<pallas_src>
import functools

import jax
import jax.numpy as jnp
from jax.experimental import pallas as pl
from jax.experimental.pallas import tpu as pltpu


# ---------------------------------------------------------------------------
# Generic tiled matmul + bias + activation (MXU, bf16 in / f32 accumulate)
# ---------------------------------------------------------------------------

def _round_up(x, m):
    return ((x + m - 1) // m) * m


def _mm_kernel(a_ref, b_ref, bias_ref, o_ref, acc_ref, *, act):
    @pl.when(pl.program_id(2) == 0)
    def _init():
        acc_ref[...] = jnp.zeros_like(acc_ref)

    acc_ref[...] += jnp.dot(a_ref[...], b_ref[...],
                            preferred_element_type=jnp.float32)

    @pl.when(pl.program_id(2) == pl.num_programs(2) - 1)
    def _finalize():
        y = acc_ref[...] + bias_ref[...]
        if act == "relu":
            y = jnp.maximum(y, 0.0)
        elif act == "tanh":
            y = jnp.tanh(y)
        o_ref[...] = y.astype(o_ref.dtype)


def matmul_bias_act(a, b, bias, act="none"):
    """act(a @ b + bias): a (M,K), b (K,N), bias (1,N) -> f32 (M,N)."""
    M, K = a.shape
    K2, N = b.shape
    assert K == K2 and bias.shape == (1, N)

    a = a.astype(jnp.bfloat16)          # MXU inputs in bf16, accumulate in f32
    b = b.astype(jnp.bfloat16)
    bias = bias.astype(jnp.float32)

    # ---- tile selection: full-dim blocks for small dims, 128-aligned otherwise
    if M < 8:
        Mp, tm = 8, 8
    elif M <= 256:
        Mp, tm = M, M
    else:
        Mp = _round_up(M, 128)
        tm = 256 if Mp % 256 == 0 else 128
    if N < 128:
        Np, tn = N, N
    else:
        Np = _round_up(N, 128)
        tn = 512 if Np % 512 == 0 else (256 if Np % 256 == 0 else 128)
    if K < 128:
        Kp, tk = K, K
    else:
        Kp = _round_up(K, 128)          # aligned, unmasked loads on the lane axis
        tk = Kp if Kp <= 8192 else (2048 if Kp % 2048 == 0 else
                                    1024 if Kp % 1024 == 0 else
                                    512 if Kp % 512 == 0 else 128)

    # Zero-padding is numerically exact: pad BOTH operands along K.
    if Mp != M:
        a = jnp.pad(a, ((0, Mp - M), (0, 0)))
    if Kp != K:
        a = jnp.pad(a, ((0, 0), (0, Kp - K)))
        b = jnp.pad(b, ((0, Kp - K), (0, 0)))
    if Np != N:
        b = jnp.pad(b, ((0, 0), (0, Np - N)))
        bias = jnp.pad(bias, ((0, 0), (0, Np - N)))

    out = pl.pallas_call(
        functools.partial(_mm_kernel, act=act),
        out_shape=jax.ShapeDtypeStruct((Mp, Np), jnp.float32),
        grid=(Mp // tm, Np // tn, Kp // tk),
        in_specs=[pl.BlockSpec((tm, tk), lambda i, j, k: (i, k)),
                  pl.BlockSpec((tk, tn), lambda i, j, k: (k, j)),
                  pl.BlockSpec((1, tn), lambda i, j, k: (0, j))],
        out_specs=pl.BlockSpec((tm, tn), lambda i, j, k: (i, j)),
        scratch_shapes=[pltpu.VMEM((tm, tn), jnp.float32)],
        compiler_params=pltpu.CompilerParams(
            dimension_semantics=("parallel", "parallel", "arbitrary")),
    )(a, b, bias)
    if Mp != M or Np != N:
        out = out[:M, :N]
    return out


# ---------------------------------------------------------------------------
# BatchNorm2d (training-mode batch stats) + ReLU, one-pass statistics
# ---------------------------------------------------------------------------

def _bn_relu_kernel(x_ref, gamma_ref, beta_ref, o_ref, *, eps, inv_n):
    x = x_ref[...]
    s = jnp.sum(x, axis=0, keepdims=True)            # one pass: sum and sum-sq
    ss = jnp.sum(x * x, axis=0, keepdims=True)
    mean = s * inv_n
    var = ss * inv_n - mean * mean                   # biased batch variance
    scale = jax.lax.rsqrt(var + eps) * gamma_ref[...]
    o_ref[...] = jnp.maximum((x - mean) * scale + beta_ref[...], 0.0)


def batchnorm_relu(x2d, gamma, beta, eps=1e-5):
    """x2d (B*H*W, C) f32 -> BatchNorm2d(batch stats) + ReLU.

    Kept as a single block: the statistics are global over rows; tiling rows
    would require a partial-sum pass (not worth it at these sizes, C=128 is
    already lane-perfect)."""
    N, C = x2d.shape
    return pl.pallas_call(
        functools.partial(_bn_relu_kernel, eps=eps, inv_n=1.0 / N),
        out_shape=jax.ShapeDtypeStruct((N, C), jnp.float32),
        grid=(1,),
        in_specs=[pl.BlockSpec((N, C), lambda i: (0, 0)),
                  pl.BlockSpec((1, C), lambda i: (0, 0)),
                  pl.BlockSpec((1, C), lambda i: (0, 0))],
        out_specs=pl.BlockSpec((N, C), lambda i: (0, 0)),
    )(x2d, gamma, beta)


# ---------------------------------------------------------------------------
# ConvTranspose2d = zero-stuff + pad + im2col glue -> Pallas matmul
# ---------------------------------------------------------------------------

def _convT_patches_nhwc(x_nhwc, w, stride, padding):
    """Standard orientation.  x_nhwc (B,H,W,Cin), w (Cin,Cout,kH,kW) PyTorch
    layout.  Returns (patches (B*Ho*Wo, kH*kW*Cin), wmat (kH*kW*Cin, Cout),
    (Ho,Wo))."""
    B, H, W, Cin = x_nhwc.shape
    Cin_w, Cout, kH, kW = w.shape
    sH, sW = stride
    pH, pW = padding
    assert Cin_w == Cin
    # TODO(synk): equivalent padding < 0 (p > k-1) not handled; IGTD ksp is fine.
    assert kH - 1 - pH >= 0 and kW - 1 - pW >= 0
    Hu, Wu = (H - 1) * sH + 1, (W - 1) * sW + 1
    up = jnp.zeros((B, Hu, Wu, Cin), x_nhwc.dtype).at[:, ::sH, ::sW, :].set(x_nhwc)
    xp = jnp.pad(up, ((0, 0), (kH - 1 - pH,) * 2, (kW - 1 - pW,) * 2, (0, 0)))
    Ho, Wo = xp.shape[1] - kH + 1, xp.shape[2] - kW + 1
    # TODO(synk): im2col still materialises the kH*kW-inflated patches in HBM;
    # a fully fused variant would walk (kh,kw) as a Pallas grid reduction axis.
    cols = [xp[:, a:a + Ho, b:b + Wo, :] for a in range(kH) for b in range(kW)]
    patches = jnp.stack(cols, axis=3).reshape(B * Ho * Wo, kH * kW * Cin)
    wmat = w[:, :, ::-1, ::-1].transpose(2, 3, 0, 1).reshape(kH * kW * Cin, Cout)
    return patches, wmat, (Ho, Wo)


def _convT_patches_t_cfirst(x_cf, w, stride, padding):
    """Transposed im2col for the Cout==1 ConvTranspose2d (lane-dense output).
    x_cf (Cin,B,H,W).  Returns (patches^T (Cin*kH*kW, B*Ho*Wo),
    wvec (1, Cin*kH*kW), (Ho,Wo))."""
    Cin, B, H, W = x_cf.shape
    Cin_w, Cout, kH, kW = w.shape
    sH, sW = stride
    pH, pW = padding
    assert Cin_w == Cin and Cout == 1
    assert kH - 1 - pH >= 0 and kW - 1 - pW >= 0
    Hu, Wu = (H - 1) * sH + 1, (W - 1) * sW + 1
    up = jnp.zeros((Cin, B, Hu, Wu), x_cf.dtype).at[:, :, ::sH, ::sW].set(x_cf)
    xp = jnp.pad(up, ((0, 0), (0, 0), (kH - 1 - pH,) * 2, (kW - 1 - pW,) * 2))
    Ho, Wo = xp.shape[2] - kH + 1, xp.shape[3] - kW + 1
    cols = [xp[:, :, a:a + Ho, b:b + Wo] for a in range(kH) for b in range(kW)]
    patches_t = jnp.stack(cols, axis=1).reshape(Cin * kH * kW, B * Ho * Wo)
    wvec = w[:, :, ::-1, ::-1].transpose(0, 2, 3, 1).reshape(1, Cin * kH * kW)
    return patches_t, wvec, (Ho, Wo)


# ---------------------------------------------------------------------------
# Parameters (deterministic synthetic init, PyTorch-equivalent shapes/layouts)
# ---------------------------------------------------------------------------

def init_params(key, nz, n_classes, ksp_h, ksp_w):
    cm, emb_dim = 4, 50
    H0, W0 = ksp_h['input'], ksp_w['input']
    keys = jax.random.split(key, 7)

    def nrm(k, shape, scale=0.05):
        return scale * jax.random.normal(k, shape, dtype=jnp.float32)

    return dict(
        emb_table=nrm(keys[0], (n_classes, emb_dim)),                      # nn.Embedding
        le_w=nrm(keys[1], (emb_dim, H0 * W0)),                             # Linear (in,out)
        le_b=nrm(keys[2], (1, H0 * W0)),
        lin_w=nrm(keys[3], (nz, cm * 128 * H0 * W0)),                      # Linear (in,out)
        lin_b=nrm(keys[4], (1, cm * 128 * H0 * W0)),
        ct1_w=nrm(keys[5], (cm * 128 + 1, cm * 32, ksp_h['k1'], ksp_w['k1'])),
        bn_gamma=jnp.ones((1, cm * 32), jnp.float32),
        bn_beta=jnp.zeros((1, cm * 32), jnp.float32),
        ct2_w=nrm(keys[6], (cm * 32, 1, ksp_h['k2'], ksp_w['k2'])),
    )


# ---------------------------------------------------------------------------
# Forward pass (DCC_IGTD_Generator.forward)
# ---------------------------------------------------------------------------

def dcc_igtd_generator_forward(params, x, label, n_classes, ksp_h, ksp_w):
    cm = 4
    B = x.shape[0]
    H0, W0 = ksp_h['input'], ksp_w['input']
    C_lin, C1 = cm * 128, cm * 32

    # label branch: Embedding -> Linear folded into one LUT + gather
    label_lut = params['emb_table'] @ params['le_w'] + params['le_b']       # (n_classes, H0*W0)
    lab = jnp.take(label_lut, label.astype(jnp.int32), axis=0)              # (B, H0*W0)
    lab_nhwc = lab.reshape(B, H0, W0, 1)

    # lin_generator: Linear + ReLU, weight columns pre-permuted to NHWC order
    lin_w = (params['lin_w'].reshape(-1, C_lin, H0, W0)
             .transpose(0, 2, 3, 1).reshape(-1, H0 * W0 * C_lin))
    lin_b = (params['lin_b'].reshape(1, C_lin, H0, W0)
             .transpose(0, 2, 3, 1).reshape(1, H0 * W0 * C_lin))
    h = matmul_bias_act(x, lin_w, lin_b, act="relu")                        # (B, H0*W0*512)
    h_nhwc = h.reshape(B, H0, W0, C_lin)

    # channel concat in NHWC (lane dim); stays channels-last from here on
    xin = jnp.concatenate([h_nhwc, lab_nhwc], axis=-1).astype(jnp.bfloat16)  # (B,H0,W0,513)

    # ConvTranspose2d #1 -> BatchNorm2d (batch stats) -> ReLU
    patches1, wmat1, (H1, W1) = _convT_patches_nhwc(
        xin, params['ct1_w'].astype(jnp.bfloat16),
        (ksp_h['s1'], ksp_w['s1']), (ksp_h['p1'], ksp_w['p1']))
    y1 = matmul_bias_act(patches1, wmat1, jnp.zeros((1, C1), jnp.float32))   # (B*H1*W1, 128)
    y1 = batchnorm_relu(y1, params['bn_gamma'], params['bn_beta'])

    # ConvTranspose2d #2 (Cout=1) computed transposed -> lane-dense output + Tanh
    y1_cf = y1.reshape(B, H1, W1, C1).transpose(3, 0, 1, 2).astype(jnp.bfloat16)
    patches2_t, wvec2, (H2, W2) = _convT_patches_t_cfirst(
        y1_cf, params['ct2_w'].astype(jnp.bfloat16),
        (ksp_h['s2'], ksp_w['s2']), (ksp_h['p2'], ksp_w['p2']))
    out_t = matmul_bias_act(wvec2, patches2_t,
                            jnp.zeros((1, B * H2 * W2), jnp.float32), act="tanh")
    return out_t.reshape(B, 1, H2, W2)                                       # NCHW


# ---------------------------------------------------------------------------
# Pure-JAX f32 reference (for numerical validation of the Pallas path)
# ---------------------------------------------------------------------------

def reference_forward(params, x, label, n_classes, ksp_h, ksp_w):
    cm = 4
    B = x.shape[0]
    H0, W0 = ksp_h['input'], ksp_w['input']
    emb = params['emb_table'][label.astype(jnp.int32)]
    lab = emb @ params['le_w'] + params['le_b']
    lab_img = lab.reshape(B, 1, H0, W0)
    h = jnp.maximum(x @ params['lin_w'] + params['lin_b'], 0.0)
    h_img = h.reshape(B, cm * 128, H0, W0)
    xin = jnp.concatenate([h_img, lab_img], axis=1)

    def convT(x_nchw, w, stride, padding):
        kH, kW = w.shape[2], w.shape[3]
        pH, pW = padding
        k_oihw = jnp.transpose(w[:, :, ::-1, ::-1], (1, 0, 2, 3))
        return jax.lax.conv_general_dilated(
            x_nchw, k_oihw, window_strides=(1, 1),
            padding=[(kH - 1 - pH, kH - 1 - pH), (kW - 1 - pW, kW - 1 - pW)],
            lhs_dilation=stride,
            dimension_numbers=('NCHW', 'OIHW', 'NCHW'))

    y1 = convT(xin, params['ct1_w'], (ksp_h['s1'], ksp_w['s1']), (ksp_h['p1'], ksp_w['p1']))
    mean = jnp.mean(y1, axis=(0, 2, 3), keepdims=True)
    var = jnp.mean((y1 - mean) ** 2, axis=(0, 2, 3), keepdims=True)
    g = params['bn_gamma'].reshape(1, -1, 1, 1)
    b = params['bn_beta'].reshape(1, -1, 1, 1)
    y1 = jnp.maximum((y1 - mean) * jax.lax.rsqrt(var + 1e-5) * g + b, 0.0)
    y2 = convT(y1, params['ct2_w'], (ksp_h['s2'], ksp_w['s2']), (ksp_h['p2'], ksp_w['p2']))
    return jnp.tanh(y2)


# ---------------------------------------------------------------------------
# Demo
# ---------------------------------------------------------------------------

if __name__ == "__main__":
    nz, n_classes, B = 16, 4, 2
    ksp_h = dict(input=4, k1=3, s1=2, p1=1, k2=3, s2=2, p2=1)
    ksp_w = dict(input=4, k1=3, s1=2, p1=1, k2=3, s2=2, p2=1)

    key = jax.random.PRNGKey(0)
    kx, kl, kp = jax.random.split(key, 3)
    x = jax.random.normal(kx, (B, nz), dtype=jnp.float32)
    label = jax.random.randint(kl, (B,), 0, n_classes)
    params = init_params(kp, nz, n_classes, ksp_h, ksp_w)

    fwd = jax.jit(functools.partial(dcc_igtd_generator_forward,
                                    n_classes=n_classes, ksp_h=ksp_h, ksp_w=ksp_w))
    out = jax.block_until_ready(fwd(params, x, label))

    # (4-1)*2 - 2 + 3 = 7  ->  (7-1)*2 - 2 + 3 = 13
    assert out.shape == (B, 1, 13, 13), out.shape
    assert bool(jnp.all(jnp.isfinite(out)))
    assert bool(jnp.all(jnp.abs(out) <= 1.0))          # tanh output range

    ref = reference_forward(params, x, label, n_classes, ksp_h, ksp_w)
    err = float(jnp.max(jnp.abs(out - ref)))
    assert err < 0.1, f"max |pallas - reference| = {err}"   # bf16-MXU tolerance

    print("KERNEL_OK")
</pallas_src>

<mosaic_0001>
module attributes {stable_mosaic.version = 11 : i64} {
  func.func @_mm_kernel(%arg0: i32, %arg1: i32, %arg2: i32, %arg3: memref<8x16xbf16, #tpu.memory_space<vmem>>, %arg4: memref<16x512xbf16, #tpu.memory_space<vmem>>, %arg5: memref<1x512xf32, #tpu.memory_space<vmem>>, %arg6: memref<8x512xf32, #tpu.memory_space<vmem>>, %arg7: memref<8x512xf32, #tpu.memory_space<vmem>>) attributes {dimension_semantics = [#tpu.dimension_semantics<parallel>, #tpu.dimension_semantics<parallel>, #tpu.dimension_semantics<arbitrary>], iteration_bounds = array<i64: 1, 16, 1>, scalar_prefetch = 0 : i64, scratch_operands = 1 : i64, tpu.core_type = #tpu.core_type<tc>, window_params = [{transform_indices = @transform_0, window_bounds = array<i64: 8, 16>}, {transform_indices = @transform_1, window_bounds = array<i64: 16, 512>}, {transform_indices = @transform_2, window_bounds = array<i64: 1, 512>}, {transform_indices = @transform_3, window_bounds = array<i64: 8, 512>}]} {
    %c0_i32 = arith.constant 0 : i32
    %0 = arith.cmpi eq, %arg2, %c0_i32 : i32
    %1 = arith.extui %0 : i1 to i32
    %c0_i32_0 = arith.constant 0 : i32
    %2 = arith.cmpi ne, %1, %c0_i32_0 : i32
    scf.if %2 {
      %cst_10 = arith.constant 0.000000e+00 : f32
      %12 = vector.broadcast %cst_10 : f32 to vector<8x512xf32>
      %c0_11 = arith.constant 0 : index
      %c0_12 = arith.constant 0 : index
      %13 = vector.load %arg7[%c0_11, %c0_12] : memref<8x512xf32, #tpu.memory_space<vmem>>, vector<8x512xf32>
      tpu.vector_store %arg7[%c0_11, %c0_12], %12 {strides = array<i32>} : memref<8x512xf32, #tpu.memory_space<vmem>>, vector<8x512xf32>,
    } else {
    }
    %c0 = arith.constant 0 : index
    %c0_1 = arith.constant 0 : index
    %3 = vector.load %arg7[%c0, %c0_1] : memref<8x512xf32, #tpu.memory_space<vmem>>, vector<8x512xf32>
    %c0_2 = arith.constant 0 : index
    %c0_3 = arith.constant 0 : index
    %4 = vector.load %arg3[%c0_2, %c0_3] : memref<8x16xbf16, #tpu.memory_space<vmem>>, vector<8x16xbf16>
    %c0_4 = arith.constant 0 : index
    %c0_5 = arith.constant 0 : index
    %5 = vector.load %arg4[%c0_4, %c0_5] : memref<16x512xbf16, #tpu.memory_space<vmem>>, vector<16x512xbf16>
    %cst = arith.constant dense<0.000000e+00> : vector<8x512xf32>
    %6 = tpu.matmul %4, %5, %cst {dimension_numbers = #tpu.dot_dimension_numbers<[1], [0], [0], [1], [0, 0, 1, 1], [], []>} : vector<8x16xbf16>, vector<16x512xbf16>, vector<8x512xf32> -> vector<8x512xf32>
    %7 = arith.addf %3, %6 : vector<8x512xf32>
    %c0_6 = arith.constant 0 : index
    %c0_7 = arith.constant 0 : index
    %8 = vector.load %arg7[%c0_6, %c0_7] : memref<8x512xf32, #tpu.memory_space<vmem>>, vector<8x512xf32>
    tpu.vector_store %arg7[%c0_6, %c0_7], %7 {strides = array<i32>} : memref<8x512xf32, #tpu.memory_space<vmem>>, vector<8x512xf32>,
    %c0_i32_8 = arith.constant 0 : i32
    %9 = arith.cmpi eq, %arg2, %c0_i32_8 : i32
    %10 = arith.extui %9 : i1 to i32
    %c0_i32_9 = arith.constant 0 : i32
    %11 = arith.cmpi ne, %10, %c0_i32_9 : i32
    scf.if %11 {
      %c0_10 = arith.constant 0 : index
      %c0_11 = arith.constant 0 : index
      %12 = vector.load %arg7[%c0_10, %c0_11] : memref<8x512xf32, #tpu.memory_space<vmem>>, vector<8x512xf32>
      %c0_12 = arith.constant 0 : index
      %c0_13 = arith.constant 0 : index
      %13 = vector.load %arg5[%c0_12, %c0_13] : memref<1x512xf32, #tpu.memory_space<vmem>>, vector<1x512xf32>
      %14 = vector.broadcast %13 : vector<1x512xf32> to vector<8x512xf32>
      %15 = arith.addf %12, %14 : vector<8x512xf32>
      %cst_14 = arith.constant 0.000000e+00 : f32
      %16 = vector.broadcast %cst_14 : f32 to vector<8x512xf32>
      %17 = arith.maximumf %15, %16 : vector<8x512xf32>
      %c0_15 = arith.constant 0 : index
      %c0_16 = arith.constant 0 : index
      %18 = vector.load %arg6[%c0_15, %c0_16] : memref<8x512xf32, #tpu.memory_space<vmem>>, vector<8x512xf32>
      tpu.vector_store %arg6[%c0_15, %c0_16], %17 {strides = array<i32>} : memref<8x512xf32, #tpu.memory_space<vmem>>, vector<8x512xf32>,
    } else {
    }
    return
  }
  func.func @transform_0(%arg0: i32, %arg1: i32, %arg2: i32) -> (i32, i32) {
    %c0_i32 = arith.constant 0 : i32
    return %arg0, %arg2 : i32, i32
  }
  func.func @transform_1(%arg0: i32, %arg1: i32, %arg2: i32) -> (i32, i32) {
    %c0_i32 = arith.constant 0 : i32
    return %arg2, %arg1 : i32, i32
  }
  func.func @transform_2(%arg0: i32, %arg1: i32, %arg2: i32) -> (i32, i32) {
    %c0_i32 = arith.constant 0 : i32
    %c0_i32_0 = arith.constant 0 : i32
    return %c0_i32, %arg1 : i32, i32
  }
  func.func @transform_3(%arg0: i32, %arg1: i32, %arg2: i32) -> (i32, i32) {
    %c0_i32 = arith.constant 0 : i32
    return %arg0, %arg1 : i32, i32
  }
}

module attributes {stable_mosaic.version = 11 : i64} {
  func.func @_mm_kernel(%arg0: i32, %arg1: i32, %arg2: i32, %arg3: memref<98x4736xbf16, #tpu.memory_space<vmem>>, %arg4: memref<4736x128xbf16, #tpu.memory_space<vmem>>, %arg5: memref<1x128xf32, #tpu.memory_space<vmem>>, %arg6: memref<98x128xf32, #tpu.memory_space<vmem>>, %arg7: memref<98x128xf32, #tpu.memory_space<vmem>>) attributes {dimension_semantics = [#tpu.dimension_semantics<parallel>, #tpu.dimension_semantics<parallel>, #tpu.dimension_semantics<arbitrary>], iteration_bounds = array<i64: 1, 1, 1>, scalar_prefetch = 0 : i64, scratch_operands = 1 : i64, tpu.core_type = #tpu.core_type<tc>, window_params = [{transform_indices = @transform_0, window_bounds = array<i64: 98, 4736>}, {transform_indices = @transform_1, window_bounds = array<i64: 4736, 128>}, {transform_indices = @transform_2, window_bounds = array<i64: 1, 128>}, {transform_indices = @transform_3, window_bounds = array<i64: 98, 128>}]} {
    %c0_i32 = arith.constant 0 : i32
    %0 = arith.cmpi eq, %arg2, %c0_i32 : i32
    %1 = arith.extui %0 : i1 to i32
    %c0_i32_0 = arith.constant 0 : i32
    %2 = arith.cmpi ne, %1, %c0_i32_0 : i32
    scf.if %2 {
      %cst_10 = arith.constant 0.000000e+00 : f32
      %12 = vector.broadcast %cst_10 : f32 to vector<98x128xf32>
      %c0_11 = arith.constant 0 : index
      %c0_12 = arith.constant 0 : index
      %13 = vector.load %arg7[%c0_11, %c0_12] : memref<98x128xf32, #tpu.memory_space<vmem>>, vector<98x128xf32>
      tpu.vector_store %arg7[%c0_11, %c0_12], %12 {strides = array<i32>} : memref<98x128xf32, #tpu.memory_space<vmem>>, vector<98x128xf32>,
    } else {
    }
    %c0 = arith.constant 0 : index
    %c0_1 = arith.constant 0 : index
    %3 = vector.load %arg7[%c0, %c0_1] : memref<98x128xf32, #tpu.memory_space<vmem>>, vector<98x128xf32>
    %c0_2 = arith.constant 0 : index
    %c0_3 = arith.constant 0 : index
    %4 = vector.load %arg3[%c0_2, %c0_3] : memref<98x4736xbf16, #tpu.memory_space<vmem>>, vector<98x4736xbf16>
    %c0_4 = arith.constant 0 : index
    %c0_5 = arith.constant 0 : index
    %5 = vector.load %arg4[%c0_4, %c0_5] : memref<4736x128xbf16, #tpu.memory_space<vmem>>, vector<4736x128xbf16>
    %cst = arith.constant dense<0.000000e+00> : vector<98x128xf32>
    %6 = tpu.matmul %4, %5, %cst {dimension_numbers = #tpu.dot_dimension_numbers<[1], [0], [0], [1], [0, 0, 1, 1], [], []>} : vector<98x4736xbf16>, vector<4736x128xbf16>, vector<98x128xf32> -> vector<98x128xf32>
    %7 = arith.addf %3, %6 : vector<98x128xf32>
    %c0_6 = arith.constant 0 : index
    %c0_7 = arith.constant 0 : index
    %8 = vector.load %arg7[%c0_6, %c0_7] : memref<98x128xf32, #tpu.memory_space<vmem>>, vector<98x128xf32>
    tpu.vector_store %arg7[%c0_6, %c0_7], %7 {strides = array<i32>} : memref<98x128xf32, #tpu.memory_space<vmem>>, vector<98x128xf32>,
    %c0_i32_8 = arith.constant 0 : i32
    %9 = arith.cmpi eq, %arg2, %c0_i32_8 : i32
    %10 = arith.extui %9 : i1 to i32
    %c0_i32_9 = arith.constant 0 : i32
    %11 = arith.cmpi ne, %10, %c0_i32_9 : i32
    scf.if %11 {
      %c0_10 = arith.constant 0 : index
      %c0_11 = arith.constant 0 : index
      %12 = vector.load %arg7[%c0_10, %c0_11] : memref<98x128xf32, #tpu.memory_space<vmem>>, vector<98x128xf32>
      %c0_12 = arith.constant 0 : index
      %c0_13 = arith.constant 0 : index
      %13 = vector.load %arg5[%c0_12, %c0_13] : memref<1x128xf32, #tpu.memory_space<vmem>>, vector<1x128xf32>
      %14 = vector.broadcast %13 : vector<1x128xf32> to vector<98x128xf32>
      %15 = arith.addf %12, %14 : vector<98x128xf32>
      %c0_14 = arith.constant 0 : index
      %c0_15 = arith.constant 0 : index
      %16 = vector.load %arg6[%c0_14, %c0_15] : memref<98x128xf32, #tpu.memory_space<vmem>>, vector<98x128xf32>
      tpu.vector_store %arg6[%c0_14, %c0_15], %15 {strides = array<i32>} : memref<98x128xf32, #tpu.memory_space<vmem>>, vector<98x128xf32>,
    } else {
    }
    return
  }
  func.func @transform_0(%arg0: i32, %arg1: i32, %arg2: i32) -> (i32, i32) {
    %c0_i32 = arith.constant 0 : i32
    return %arg0, %arg2 : i32, i32
  }
  func.func @transform_1(%arg0: i32, %arg1: i32, %arg2: i32) -> (i32, i32) {
    %c0_i32 = arith.constant 0 : i32
    return %arg2, %arg1 : i32, i32
  }
  func.func @transform_2(%arg0: i32, %arg1: i32, %arg2: i32) -> (i32, i32) {
    %c0_i32 = arith.constant 0 : i32
    %c0_i32_0 = arith.constant 0 : i32
    return %c0_i32, %arg1 : i32, i32
  }
  func.func @transform_3(%arg0: i32, %arg1: i32, %arg2: i32) -> (i32, i32) {
    %c0_i32 = arith.constant 0 : i32
    return %arg0, %arg1 : i32, i32
  }
}

module attributes {stable_mosaic.version = 11 : i64} {
  func.func @_bn_relu_kernel(%arg0: i32, %arg1: memref<98x128xf32, #tpu.memory_space<vmem>>, %arg2: memref<1x128xf32, #tpu.memory_space<vmem>>, %arg3: memref<1x128xf32, #tpu.memory_space<vmem>>, %arg4: memref<98x128xf32, #tpu.memory_space<vmem>>) attributes {dimension_semantics = [#tpu.dimension_semantics<arbitrary>], iteration_bounds = array<i64: 1>, scalar_prefetch = 0 : i64, scratch_operands = 0 : i64, tpu.core_type = #tpu.core_type<tc>, window_params = [{pipeline_mode = #tpu.pipeline_mode<synchronous>, transform_indices = @transform_0, window_bounds = array<i64: 98, 128>}, {pipeline_mode = #tpu.pipeline_mode<synchronous>, transform_indices = @transform_1, window_bounds = array<i64: 1, 128>}, {pipeline_mode = #tpu.pipeline_mode<synchronous>, transform_indices = @transform_2, window_bounds = array<i64: 1, 128>}, {pipeline_mode = #tpu.pipeline_mode<synchronous>, transform_indices = @transform_3, window_bounds = array<i64: 98, 128>}]} {
    %c0 = arith.constant 0 : index
    %c0_0 = arith.constant 0 : index
    %0 = vector.load %arg1[%c0, %c0_0] : memref<98x128xf32, #tpu.memory_space<vmem>>, vector<98x128xf32>
    %cst = arith.constant dense<0.000000e+00> : vector<128xf32>
    %1 = vector.multi_reduction <add>, %0, %cst [0] : vector<98x128xf32> to vector<128xf32>
    %2 = vector.shape_cast %1 : vector<128xf32> to vector<1x128xf32>
    %3 = arith.mulf %0, %0 : vector<98x128xf32>
    %cst_1 = arith.constant dense<0.000000e+00> : vector<128xf32>
    %4 = vector.multi_reduction <add>, %3, %cst_1 [0] : vector<98x128xf32> to vector<128xf32>
    %5 = vector.shape_cast %4 : vector<128xf32> to vector<1x128xf32>
    %cst_2 = arith.constant 0.0102040814 : f32
    %6 = vector.broadcast %cst_2 : f32 to vector<1x128xf32>
    %7 = arith.mulf %2, %6 : vector<1x128xf32>
    %cst_3 = arith.constant 0.0102040814 : f32
    %8 = vector.broadcast %cst_3 : f32 to vector<1x128xf32>
    %9 = arith.mulf %5, %8 : vector<1x128xf32>
    %10 = arith.mulf %7, %7 : vector<1x128xf32>
    %11 = arith.subf %9, %10 : vector<1x128xf32>
    %cst_4 = arith.constant 9.99999974E-6 : f32
    %12 = vector.broadcast %cst_4 : f32 to vector<1x128xf32>
    %13 = arith.addf %11, %12 : vector<1x128xf32>
    %14 = math.rsqrt %13 : vector<1x128xf32>
    %c0_5 = arith.constant 0 : index
    %c0_6 = arith.constant 0 : index
    %15 = vector.load %arg2[%c0_5, %c0_6] : memref<1x128xf32, #tpu.memory_space<vmem>>, vector<1x128xf32>
    %16 = arith.mulf %14, %15 : vector<1x128xf32>
    %17 = vector.broadcast %7 : vector<1x128xf32> to vector<98x128xf32>
    %18 = arith.subf %0, %17 : vector<98x128xf32>
    %19 = vector.broadcast %16 : vector<1x128xf32> to vector<98x128xf32>
    %20 = arith.mulf %18, %19 : vector<98x128xf32>
    %c0_7 = arith.constant 0 : index
    %c0_8 = arith.constant 0 : index
    %21 = vector.load %arg3[%c0_7, %c0_8] : memref<1x128xf32, #tpu.memory_space<vmem>>, vector<1x128xf32>
    %22 = vector.broadcast %21 : vector<1x128xf32> to vector<98x128xf32>
    %23 = arith.addf %20, %22 : vector<98x128xf32>
    %cst_9 = arith.constant 0.000000e+00 : f32
    %24 = vector.broadcast %cst_9 : f32 to vector<98x128xf32>
    %25 = arith.maximumf %23, %24 : vector<98x128xf32>
    %c0_10 = arith.constant 0 : index
    %c0_11 = arith.constant 0 : index
    %26 = vector.load %arg4[%c0_10, %c0_11] : memref<98x128xf32, #tpu.memory_space<vmem>>, vector<98x128xf32>
    tpu.vector_store %arg4[%c0_10, %c0_11], %25 {strides = array<i32>} : memref<98x128xf32, #tpu.memory_space<vmem>>, vector<98x128xf32>,
    return
  }
  func.func @transform_0(%arg0: i32) -> (i32, i32) {
    %c0_i32 = arith.constant 0 : i32
    %c0_i32_0 = arith.constant 0 : i32
    %c0_i32_1 = arith.constant 0 : i32
    return %c0_i32, %c0_i32_0 : i32, i32
  }
  func.func @transform_1(%arg0: i32) -> (i32, i32) {
    %c0_i32 = arith.constant 0 : i32
    %c0_i32_0 = arith.constant 0 : i32
    %c0_i32_1 = arith.constant 0 : i32
    return %c0_i32, %c0_i32_0 : i32, i32
  }
  func.func @transform_2(%arg0: i32) -> (i32, i32) {
    %c0_i32 = arith.constant 0 : i32
    %c0_i32_0 = arith.constant 0 : i32
    %c0_i32_1 = arith.constant 0 : i32
    return %c0_i32, %c0_i32_0 : i32, i32
  }
  func.func @transform_3(%arg0: i32) -> (i32, i32) {
    %c0_i32 = arith.constant 0 : i32
    %c0_i32_0 = arith.constant 0 : i32
    %c0_i32_1 = arith.constant 0 : i32
    return %c0_i32, %c0_i32_0 : i32, i32
  }
}

module attributes {stable_mosaic.version = 11 : i64} {
  func.func @_mm_kernel(%arg0: i32, %arg1: i32, %arg2: i32, %arg3: memref<8x1152xbf16, #tpu.memory_space<vmem>>, %arg4: memref<1152x128xbf16, #tpu.memory_space<vmem>>, %arg5: memref<1x128xf32, #tpu.memory_space<vmem>>, %arg6: memref<8x128xf32, #tpu.memory_space<vmem>>, %arg7: memref<8x128xf32, #tpu.memory_space<vmem>>) attributes {dimension_semantics = [#tpu.dimension_semantics<parallel>, #tpu.dimension_semantics<parallel>, #tpu.dimension_semantics<arbitrary>], iteration_bounds = array<i64: 1, 3, 1>, scalar_prefetch = 0 : i64, scratch_operands = 1 : i64, tpu.core_type = #tpu.core_type<tc>, window_params = [{transform_indices = @transform_0, window_bounds = array<i64: 8, 1152>}, {transform_indices = @transform_1, window_bounds = array<i64: 1152, 128>}, {transform_indices = @transform_2, window_bounds = array<i64: 1, 128>}, {transform_indices = @transform_3, window_bounds = array<i64: 8, 128>}]} {
    %c0_i32 = arith.constant 0 : i32
    %0 = arith.cmpi eq, %arg2, %c0_i32 : i32
    %1 = arith.extui %0 : i1 to i32
    %c0_i32_0 = arith.constant 0 : i32
    %2 = arith.cmpi ne, %1, %c0_i32_0 : i32
    scf.if %2 {
      %cst_10 = arith.constant 0.000000e+00 : f32
      %12 = vector.broadcast %cst_10 : f32 to vector<8x128xf32>
      %c0_11 = arith.constant 0 : index
      %c0_12 = arith.constant 0 : index
      %13 = vector.load %arg7[%c0_11, %c0_12] : memref<8x128xf32, #tpu.memory_space<vmem>>, vector<8x128xf32>
      tpu.vector_store %arg7[%c0_11, %c0_12], %12 {strides = array<i32>} : memref<8x128xf32, #tpu.memory_space<vmem>>, vector<8x128xf32>,
    } else {
    }
    %c0 = arith.constant 0 : index
    %c0_1 = arith.constant 0 : index
    %3 = vector.load %arg7[%c0, %c0_1] : memref<8x128xf32, #tpu.memory_space<vmem>>, vector<8x128xf32>
    %c0_2 = arith.constant 0 : index
    %c0_3 = arith.constant 0 : index
    %4 = vector.load %arg3[%c0_2, %c0_3] : memref<8x1152xbf16, #tpu.memory_space<vmem>>, vector<8x1152xbf16>
    %c0_4 = arith.constant 0 : index
    %c0_5 = arith.constant 0 : index
    %5 = vector.load %arg4[%c0_4, %c0_5] : memref<1152x128xbf16, #tpu.memory_space<vmem>>, vector<1152x128xbf16>
    %cst = arith.constant dense<0.000000e+00> : vector<8x128xf32>
    %6 = tpu.matmul %4, %5, %cst {dimension_numbers = #tpu.dot_dimension_numbers<[1], [0], [0], [1], [0, 0, 1, 1], [], []>} : vector<8x1152xbf16>, vector<1152x128xbf16>, vector<8x128xf32> -> vector<8x128xf32>
    %7 = arith.addf %3, %6 : vector<8x128xf32>
    %c0_6 = arith.constant 0 : index
    %c0_7 = arith.constant 0 : index
    %8 = vector.load %arg7[%c0_6, %c0_7] : memref<8x128xf32, #tpu.memory_space<vmem>>, vector<8x128xf32>
    tpu.vector_store %arg7[%c0_6, %c0_7], %7 {strides = array<i32>} : memref<8x128xf32, #tpu.memory_space<vmem>>, vector<8x128xf32>,
    %c0_i32_8 = arith.constant 0 : i32
    %9 = arith.cmpi eq, %arg2, %c0_i32_8 : i32
    %10 = arith.extui %9 : i1 to i32
    %c0_i32_9 = arith.constant 0 : i32
    %11 = arith.cmpi ne, %10, %c0_i32_9 : i32
    scf.if %11 {
      %c0_10 = arith.constant 0 : index
      %c0_11 = arith.constant 0 : index
      %12 = vector.load %arg7[%c0_10, %c0_11] : memref<8x128xf32, #tpu.memory_space<vmem>>, vector<8x128xf32>
      %c0_12 = arith.constant 0 : index
      %c0_13 = arith.constant 0 : index
      %13 = vector.load %arg5[%c0_12, %c0_13] : memref<1x128xf32, #tpu.memory_space<vmem>>, vector<1x128xf32>
      %14 = vector.broadcast %13 : vector<1x128xf32> to vector<8x128xf32>
      %15 = arith.addf %12, %14 : vector<8x128xf32>
      %16 = math.tanh %15 : vector<8x128xf32>
      %c0_14 = arith.constant 0 : index
      %c0_15 = arith.constant 0 : index
      %17 = vector.load %arg6[%c0_14, %c0_15] : memref<8x128xf32, #tpu.memory_space<vmem>>, vector<8x128xf32>
      tpu.vector_store %arg6[%c0_14, %c0_15], %16 {strides = array<i32>} : memref<8x128xf32, #tpu.memory_space<vmem>>, vector<8x128xf32>,
    } else {
    }
    return
  }
  func.func @transform_0(%arg0: i32, %arg1: i32, %arg2: i32) -> (i32, i32) {
    %c0_i32 = arith.constant 0 : i32
    return %arg0, %arg2 : i32, i32
  }
  func.func @transform_1(%arg0: i32, %arg1: i32, %arg2: i32) -> (i32, i32) {
    %c0_i32 = arith.constant 0 : i32
    return %arg2, %arg1 : i32, i32
  }
  func.func @transform_2(%arg0: i32, %arg1: i32, %arg2: i32) -> (i32, i32) {
    %c0_i32 = arith.constant 0 : i32
    %c0_i32_0 = arith.constant 0 : i32
    return %c0_i32, %arg1 : i32, i32
  }
  func.func @transform_3(%arg0: i32, %arg1: i32, %arg2: i32) -> (i32, i32) {
    %c0_i32 = arith.constant 0 : i32
    return %arg0, %arg1 : i32, i32
  }
}

</mosaic_0001>

<bundles_post_ra>
// kernel: dcc_igtd_generator_forward.4
= control target key start
LH: loop header
LB: loop body
LE: loop exit
PB: predicated region body
PF: predicated region fallthrough
CT: control target
= control target key end

     0   :  { %s672_s12 = smov 0   ;;  %s674_s13 = smov 0   ;;  %s743_s0 = inlined_call_operand.vmem [shape: bf16[8,16], index: 0, kind: input, shape index: {}]   ;;  %s744_s1 = inlined_call_operand.vmem [shape: bf16[16,8192], index: 1, kind: input, shape index: {}]   ;;  %s745_s2 = inlined_call_operand.vmem [shape: f32[1,8192], index: 2, kind: input, shape index: {}]   ;;  %s746_s3 = inlined_call_operand.vmem [shape: f32[8,8192], index: 3, kind: output, shape index: {}]  }
   0x1   :  { %s676_s14 = smov 0   ;;  %s678_s15 = smov 0  }
   0x2   :  { %s680_s16 = smov 0  }
   0x3 LB: > { %s28_s17 = sadd.s32 1, %s646_s15  ;;  %p76_p1 = scmp.ne.s32.totalorder %s638_s13, %s634_s12  ;;  %s650_s16 = sphi %s680_s16, %s13_s16   ;;  %s646_s15 = sphi %s678_s15, %s750_s15   ;;  %s642_s14 = sphi %s676_s14, %s749_s14   ;;  %s638_s13 = sphi %s674_s13, %s748_s13   ;;  %s634_s12 = sphi %s672_s12, %s747_s12  }
   0x4   : > { %p30_p0 = scmp.ge.s32.totalorder %s28_s17, 16  ;;  %p77_p2 = scmp.eq.s32.totalorder %s650_s16, 0 }
   0x5   : > { %s69_s19 = sadd.s32 1, %s638_s13  ;;  %p536_p5 = scmp.ge.s32.totalorder %s650_s16, 16 }
   0x6   : > { %s752_s17 = smov (%p30_p0, %s28_s17), 0  ;;  %p78_p3 = por %p77_p2, %p76_p1 }
   0x7   : > { %s65_s18 = ssub.s32 %s646_s15, %s752_s17  ;;  %166 = sbr.rel (%p536_p5) target bundleno = 20 (0x14), region = 20 }
   0x8   : > { %p67_p4 = scmp.eq.s32.totalorder %s65_s18, 0 }
   0xa   : > { %s707_s20 = scalar_select %p67_p4, %s638_s13, %s69_s19  }
   0xc   : > { %169 = sbr.rel (!%p78_p3) target bundleno = 20 (0x14), region = 24  ;;  %s171_s21 = sand.u32 (%p78_p3), 1, %s638_s13  }
   0xd   : > { %s567_s22 = sshll.u32 (%p78_p3), %s646_s15, 4  ;;  %s537_s23 = sshll.u32 (%p78_p3), %s171_s21, 5 }
   0xe   : > { %s179_s26 = scalar_lea.vmem (%p78_p3), %s744_s1, %s567_s22  ;;  %s173_s27 = scalar_lea.vmem (%p78_p3), [#allocation3], %s537_s23 }
   0xf   : > { %v192_v0 = vld [vmem:[%s179_s26] sm:$0xff] (%p78_p3)  ;;  %v194_v1 = vld [vmem:[%s179_s26 + $0x8] sm:$0xff] (%p78_p3) }
  0x10   : > { %v196_v2 = vld [vmem:[%s179_s26 + $0x100] sm:$0xff] (%p78_p3)  ;;  %193 = vst [vmem:[%s173_s27] sm:$0xff] (%p78_p3), %v192_v0  ;;  %v198_v3 = vld [vmem:[%s179_s26 + $0x108] sm:$0xff] (%p78_p3) }
  0x11   : > { %195 = vst [vmem:[%s173_s27 + $0x8] sm:$0xff] %v194_v1 }
  0x12   : > { %197 = vst [vmem:[%s173_s27 + $0x10] sm:$0xff] %v196_v2 }
  0x13   : > { %199 = vst [vmem:[%s173_s27 + $0x18] sm:$0xff] %v198_v3 }
  0x14 PF: > { %p540_p6 = scmp.ge.s32.totalorder %s650_s16, 1  ;;  %p212_p7 = scmp.lt.s32.totalorder %s650_s16, 17 }
  0x16   : > { %p213_p8 = pnand %p540_p6, %p212_p7 }
  0x17   : > { %s219_s28 = sand.u32 (!%p213_p8), 1, %s634_s12   ;;  %s542_s6 = sshll.u32 (!%p213_p8), %s642_s14, 2 }
  0x18   : > { %216 = sbr.rel (%p213_p8) target bundleno = 177 (0xb1), region = 51  ;;  %s541_s29 = sshll.u32 (!%p213_p8), %s219_s28, 5 }
  0x19   : > { %s221_s30 = scalar_lea.vmem (!%p213_p8), [#allocation3], %s541_s29  ;;  %p267_p9 = scmp.lt.s32.totalorder (!%p213_p8), %s542_s6, 63 }
  0x1d   : > { %v547_v4 = vld [vmem:[%s221_s30] sm:$0xf]  ;;  %v570_v5 = vld [vmem:[%s221_s30 + $0xc] sm:$0xf0]  ;;  %v568_v6 = vld [vmem:[%s221_s30 + $0x4] sm:$0xf] }
  0x1e   : > { %v548_v7 = vor.u32 %v570_v5, %v547_v4  ;;  %v549_v8 = vld [vmem:[%s221_s30 + $0x10] sm:$0xf0]  ;;  %v555_v9 = vld [vmem:[%s221_s30 + $0x8] sm:$0xf]  ;;  %v571_v10 = vld [vmem:[%s221_s30 + $0x14] sm:$0xf0] }
  0x1f   : > { %v552_v11 = vor.u32 %v568_v6, %v549_v8  ;;  %v556_v12 = vor.u32 %v571_v10, %v555_v9  ;;  %v569_v13 = vld [vmem:[%s221_s30 + $0xc] sm:$0xf]  ;;  %v557_v14 = vld [vmem:[%s221_s30 + $0x18] sm:$0xf0]  ;;  %v294_v16 = vld [vmem:[%s743_s0] sm:$0xf] }
  0x20   : > { %330 = vmatpush.bf16.msra.mxu0 %v548_v7  ;;  %v560_v15 = vor.u32 %v569_v13, %v557_v14  ;;  %vm319_vm0 = vcmask 130048   ;;  %s754_s6 = smov (!%p267_p9, %s542_s6), 63 }
  0x21   : > { %343 = vmatpush.bf16.msra.mxu1 %v552_v11  ;;  %356 = vmatpush.bf16.msra.mxu2 %v556_v12  ;;  %s269_s9 = scalar_lea.vmem %s745_s2, %s754_s6  ;;  %s544_s10 = sshll.u32 %s754_s6, 3 }
  0x22   : > { %369 = vmatpush.bf16.msra.mxu3 %v560_v15  ;;  %v390_v17 = vld [vmem:[%s269_s9] sm:$0xf]  ;;  %s279_s18 = scalar_lea.vmem %s746_s3, %s544_s10 }
  0x23   : > { %561 = vmatmul.msk.bf16.vlgmr.msra.gmra.mxu0 %vm319_vm0, %v294_v16  ;;  %v392_v18 = vperm.slane %v390_v17, 0  ;;  %v393_v19 = vperm.slane %v390_v17, 1  ;;  %v394_v26 = vperm.slane %v390_v17, 2  ;;  %v395_v27 = vperm.slane %v390_v17, 3 }
  0x24   : > { %562 = vmatmul.msk.bf16.vlgmr.msra.gmra.mxu1 %vm319_vm0, %v294_v16  ;;  %563 = vmatmul.msk.bf16.vlgmr.msra.gmra.mxu2 %vm319_vm0, %v294_v16 }
  0x25   : > { %564 = vmatmul.msk.bf16.vlgmr.msra.gmra.mxu3 %vm319_vm0, %v294_v16 }
  0xa0   : > { %v332_v20 = vpop.f32.mrf.mxu0 }
  0xa1   : > { %v400_v21 = vadd.f32 %v392_v18, %v332_v20  ;;  %v345_v22 = vpop.f32.mrf.mxu1 }
  0xa2   : > { %v401_v23 = vadd.f32 %v393_v19, %v345_v22 }
  0xa3   : > { %v404_v24 = vmax.f32 %v400_v21, 0.0 }
  0xa4   : > { %v405_v25 = vmax.f32 %v401_v23, 0.0 }
  0xa5   : > { %408 = vst [vmem:[%s279_s18] sm:$0xff] %v404_v24 }
  0xa6   : > { %409 = vst [vmem:[%s279_s18 + $0x8] sm:$0xff] %v405_v25 }
  0xa7   : > { %v358_v28 = vpop.f32.mrf.mxu2 }
  0xa8   : > { %v402_v29 = vadd.f32 %v394_v26, %v358_v28  ;;  %v371_v30 = vpop.f32.mrf.mxu3  ;;  %v334_v31 = vpop.f32.mrf.mxu0 }
  0xa9   : > { %v403_v32 = vadd.f32 %v395_v27, %v371_v30  ;;  %v347_v33 = vpop.f32.mrf.mxu1 }
  0xaa   : > { %v406_v34 = vmax.f32 %v402_v29, 0.0 }
  0xab   : > { %v407_v35 = vmax.f32 %v403_v32, 0.0 }
  0xac   : > { %410 = vst [vmem:[%s279_s18 + $0x10] sm:$0xff] %v406_v34 }
  0xad   : > { %411 = vst [vmem:[%s279_s18 + $0x18] sm:$0xff] %v407_v35 }
  0xaf   : > { %v360_v36 = vpop.f32.mrf.mxu2 }
  0xb0   : > { %v373_v37 = vpop.f32.mrf.mxu3 }
  0xb1 PF: > { %s13_s16 = sadd.s32 1, %s650_s16   ;;  %s747_s12 = smov %s638_s13 }
  0xb2   : > { %p10_p10 = scmp.ge.s32.totalorder %s13_s16, 18   ;;  %s748_s13 = smov %s707_s20 }
  0xb3   : > { %s749_s14 = smov %s646_s15  ;;  %s750_s15 = smov %s752_s17 }
  0xb4   :  { %12 = sbr.rel (!%p10_p10) target bundleno = 3 (0x3), region = 104 }

// kernel: dcc_igtd_generator_forward.6
= control target key start
LH: loop header
LB: loop body
LE: loop exit
PB: predicated region body
PF: predicated region fallthrough
CT: control target
= control target key end

     0   :  { %vm38_vm0 = vcmask 1041408   ;;  %s372_s0 = inlined_call_operand.vmem [shape: f32[98,128], index: 0, kind: input, shape index: {}]   ;;  %s373_s2 = inlined_call_operand.vmem [shape: f32[1,128], index: 2, kind: input, shape index: {}]   ;;  %s374_s1 = inlined_call_operand.vmem [shape: f32[1,128], index: 1, kind: input, shape index: {}]   ;;  %s375_s3 = inlined_call_operand.vmem [shape: f32[98,128], index: 3, kind: output, shape index: {}]  }
   0x1   :  { %v196_v0 = vld [vmem:[%s372_s0] sm:$0xff]  ;;  %v201_v1 = vld [vmem:[%s372_s0 + $0x8] sm:$0xff]  ;;  %v206_v2 = vld [vmem:[%s372_s0 + $0x10] sm:$0xff] }
   0x2   :  { %v211_v3 = vld [vmem:[%s372_s0 + $0x18] sm:$0xff]  ;;  %v27_v4 = vadd.f32 %v201_v1, %v196_v0  ;;  %v47_v5 = vmul.f32 %v196_v0, %v196_v0  ;;  %v48_v6 = vmul.f32 %v201_v1, %v201_v1  ;;  %v49_v7 = vmul.f32 %v206_v2, %v206_v2  ;;  %v224_v8 = vld [vmem:[%s372_s0 + $0x20] sm:$0xff]  ;;  %v232_v12 = vld [vmem:[%s372_s0 + $0x28] sm:$0xff] }
   0x3   :  { %v50_v10 = vmul.f32 %v211_v3, %v211_v3  ;;  %v51_v14 = vmul.f32 %v224_v8, %v224_v8  ;;  %v240_v16 = vld [vmem:[%s372_s0 + $0x30] sm:$0xff]  ;;  %v52_v18 = vmul.f32 %v232_v12, %v232_v12  ;;  %v248_v20 = vld [vmem:[%s372_s0 + $0x38] sm:$0xff]  ;;  %v256_v24 = vld [vmem:[%s372_s0 + $0x40] sm:$0xff] }
   0x4   :  { %v28_v9 = vadd.f32 %v27_v4, %v206_v2  ;;  %v60_v11 = vadd.f32 %v48_v6, %v47_v5  ;;  %v53_v22 = vmul.f32 %v240_v16, %v240_v16  ;;  %v54_v26 = vmul.f32 %v248_v20, %v248_v20  ;;  %v264_v28 = vld [vmem:[%s372_s0 + $0x48] sm:$0xff]  ;;  %v272_v32 = vld [vmem:[%s372_s0 + $0x50] sm:$0xff]  ;;  %v278_v34 = vld [vmem:[%s372_s0 + $0x60] sm:$0x3] }
   0x5   :  { %v55_v30 = vmul.f32 %v256_v24, %v256_v24  ;;  %v56_v35 = vmul.f32 %v264_v28, %v264_v28  ;;  %v285_v37 = vld [vmem:[%s372_s0 + $0x58] sm:$0xff]  ;;  %v57_v39 = vmul.f32 %v272_v32, %v272_v32  ;;  %v59_v42 = vmul.f32 %v278_v34, %v278_v34 }
   0x6   :  { %v29_v13 = vadd.f32 %v28_v9, %v211_v3  ;;  %v61_v15 = vadd.f32 %v60_v11, %v49_v7  ;;  %v39_v43 = vsel %vm38_vm0, %v278_v34, 0.0  ;;  %v58_v44 = vmul.f32 %v285_v37, %v285_v37 }
   0x7   :  { %v71_v49 = vsel %vm38_vm0, %v59_v42, 0.0 }
   0x8   :  { %v30_v17 = vadd.f32 %v29_v13, %v224_v8  ;;  %v62_v19 = vadd.f32 %v61_v15, %v50_v10 }
   0xa   :  { %v31_v21 = vadd.f32 %v30_v17, %v232_v12  ;;  %v63_v23 = vadd.f32 %v62_v19, %v51_v14 }
   0xc   :  { %v32_v25 = vadd.f32 %v31_v21, %v240_v16  ;;  %v64_v27 = vadd.f32 %v63_v23, %v52_v18  ;;  %v94_v18 = vld [vmem:[%s374_s1] sm:$0x1] }
   0xe   :  { %v33_v29 = vadd.f32 %v32_v25, %v248_v20  ;;  %v65_v31 = vadd.f32 %v64_v27, %v53_v22 }
  0x10   :  { %v34_v33 = vadd.f32 %v33_v29, %v256_v24  ;;  %v66_v36 = vadd.f32 %v65_v31, %v54_v26 }
  0x12   :  { %v35_v38 = vadd.f32 %v34_v33, %v264_v28  ;;  %v67_v40 = vadd.f32 %v66_v36, %v55_v30 }
  0x14   :  { %v36_v41 = vadd.f32 %v35_v38, %v272_v32  ;;  %v68_v45 = vadd.f32 %v67_v40, %v56_v35 }
  0x16   :  { %v37_v46 = vadd.f32 %v36_v41, %v285_v37  ;;  %v69_v47 = vadd.f32 %v68_v45, %v57_v39 }
  0x18   :  { %v40_v48 = vadd.f32 %v39_v43, %v37_v46  ;;  %v70_v50 = vadd.f32 %v69_v47, %v58_v44 }
  0x1a   :  { %v41_v51 = vrot.slane %v40_v48, 4  ;;  %v72_v52 = vadd.f32 %v71_v49, %v70_v50 }
  0x1c   :  { %v42_v53 = vadd.f32 %v41_v51, %v40_v48  ;;  %v73_v54 = vrot.slane %v72_v52, 4 }
  0x1e   :  { %v43_v55 = vrot.slane %v42_v53, 2  ;;  %v74_v56 = vadd.f32 %v73_v54, %v72_v52 }
  0x20   :  { %v44_v57 = vadd.f32 %v43_v55, %v42_v53  ;;  %v75_v58 = vrot.slane %v74_v56, 2 }
  0x22   :  { %v45_v59 = vrot.slane %v44_v57, 1  ;;  %v76_v60 = vadd.f32 %v75_v58, %v74_v56 }
  0x24   :  { %v46_v61 = vadd.f32 %v45_v59, %v44_v57  ;;  %v77_v62 = vrot.slane %v76_v60, 1 }
  0x26   :  { %v297_v63 = vmul.f32 0.010204081, %v46_v61  ;;  %v78_v4 = vadd.f32 %v77_v62, %v76_v60 }
  0x28   :  { %v81_v5 = vmul.f32 %v297_v63, %v297_v63  ;;  %v80_v6 = vmul.f32 0.010204081, %v78_v4  ;;  %v96_v21 = vsub.f32 %v196_v0, %v297_v63  ;;  %v97_v23 = vsub.f32 %v201_v1, %v297_v63  ;;  %v170_v1 = vld [vmem:[%s373_s2] ss:$0 sm:$0xff] }
  0x29   :  { %v98_v25 = vsub.f32 %v206_v2, %v297_v63  ;;  %v99_v26 = vsub.f32 %v211_v3, %v297_v63  ;;  %v100_v27 = vsub.f32 %v224_v8, %v297_v63  ;;  %v101_v29 = vsub.f32 %v232_v12, %v297_v63 }
  0x2a   :  { %v82_v7 = vsub.f32 %v80_v6, %v81_v5  ;;  %v102_v30 = vsub.f32 %v240_v16, %v297_v63  ;;  %v103_v0 = vsub.f32 %v248_v20, %v297_v63  ;;  %v104_v2 = vsub.f32 %v256_v24, %v297_v63 }
  0x2b   :  { %v105_v3 = vsub.f32 %v264_v28, %v297_v63  ;;  %v106_v8 = vsub.f32 %v272_v32, %v297_v63  ;;  %v107_v12 = vsub.f32 %v285_v37, %v297_v63  ;;  %v108_v32 = vsub.f32 %v278_v34, %v297_v63 }
  0x2c   :  { %v83_v9 = vadd.f32 1e-05, %v82_v7 }
  0x2e   :  { %171 = vrsqrt.f32 %v83_v9  ;;  %vm90_vm1 = vweird.f32 %v83_v9 }
  0x34   :  { %v172_v10 = vpop.eup %171 }
  0x35   :  { %v85_v11 = vmul.f32 %v172_v10, %v83_v9  ;;  %vm91_vm2 = vweird.f32 %v172_v10 }
  0x36   :  { %vm92_vm3 = vmor %vm90_vm1, %vm91_vm2 }
  0x37   :  { %v86_v13 = vmul.f32 %v172_v10, %v85_v11 }
  0x39   :  { %v87_v14 = vmul.f32 0.5, %v86_v13 }
  0x3b   :  { %v88_v15 = vsub.f32 1.5, %v87_v14 }
  0x3d   :  { %v89_v17 = vmul.f32 %v172_v10, %v88_v15 }
  0x3f   :  { %v93_v19 = vsel %vm92_vm3, %v172_v10, %v89_v17 }
  0x40   :  { %v95_v22 = vmul.f32 %v94_v18, %v93_v19 }
  0x42   :  { %v109_v31 = vperm.slane %v95_v22, 0 }
  0x44   :  { %v110_v16 = vmul.f32 %v109_v31, %v96_v21  ;;  %v111_v33 = vmul.f32 %v109_v31, %v97_v23  ;;  %v112_v20 = vmul.f32 %v109_v31, %v98_v25  ;;  %v113_v35 = vmul.f32 %v109_v31, %v99_v26 }
  0x45   :  { %v114_v36 = vmul.f32 %v109_v31, %v100_v27  ;;  %v115_v38 = vmul.f32 %v109_v31, %v101_v29  ;;  %v116_v39 = vmul.f32 %v109_v31, %v102_v30  ;;  %v117_v40 = vmul.f32 %v109_v31, %v103_v0 }
  0x46   :  { %v127_v41 = vadd.f32 %v170_v1, %v110_v16  ;;  %v128_v42 = vadd.f32 %v170_v1, %v111_v33  ;;  %v129_v24 = vadd.f32 %v170_v1, %v112_v20  ;;  %v130_v43 = vadd.f32 %v170_v1, %v113_v35 }
  0x47   :  { %v131_v44 = vadd.f32 %v170_v1, %v114_v36  ;;  %v132_v28 = vadd.f32 %v170_v1, %v115_v38  ;;  %v133_v47 = vadd.f32 %v170_v1, %v116_v39  ;;  %v134_v50 = vadd.f32 %v170_v1, %v117_v40 }
  0x48   :  { %v140_v45 = vmax.f32 %v127_v41, 0.0  ;;  %v141_v46 = vmax.f32 %v128_v42, 0.0  ;;  %v142_v37 = vmax.f32 %v129_v24, 0.0  ;;  %v143_v48 = vmax.f32 %v130_v43, 0.0 }
  0x49   :  { %v144_v49 = vmax.f32 %v131_v44, 0.0  ;;  %v118_v51 = vmul.f32 %v109_v31, %v104_v2  ;;  %v119_v52 = vmul.f32 %v109_v31, %v105_v3  ;;  %v120_v53 = vmul.f32 %v109_v31, %v106_v8 }
  0x4a   :  { %153 = vst [vmem:[%s375_s3] sm:$0xff] %v140_v45  ;;  %v121_v54 = vmul.f32 %v109_v31, %v107_v12  ;;  %v145_v34 = vmax.f32 %v132_v28, 0.0  ;;  %v122_v55 = vmul.f32 %v109_v31, %v108_v32  ;;  %v146_v56 = vmax.f32 %v133_v47, 0.0 }
  0x4b   :  { %154 = vst [vmem:[%s375_s3 + $0x8] sm:$0xff] %v141_v46  ;;  %v135_v57 = vadd.f32 %v170_v1, %v118_v51  ;;  %v136_v58 = vadd.f32 %v170_v1, %v119_v52  ;;  %v137_v59 = vadd.f32 %v170_v1, %v120_v53  ;;  %v147_v60 = vmax.f32 %v134_v50, 0.0 }
  0x4c   :  { %155 = vst [vmem:[%s375_s3 + $0x10] sm:$0xff] %v142_v37  ;;  %v138_v61 = vadd.f32 %v170_v1, %v121_v54  ;;  %v139_v63 = vadd.f32 %v170_v1, %v122_v55 }
  0x4d   :  { %156 = vst [vmem:[%s375_s3 + $0x18] sm:$0xff] %v143_v48  ;;  %v148_v62 = vmax.f32 %v135_v57, 0.0  ;;  %v149_v4 = vmax.f32 %v136_v58, 0.0  ;;  %v150_v5 = vmax.f32 %v137_v59, 0.0 }
  0x4e   :  { %157 = vst [vmem:[%s375_s3 + $0x20] sm:$0xff] %v144_v49  ;;  %v151_v6 = vmax.f32 %v138_v61, 0.0  ;;  %v152_v7 = vmax.f32 %v139_v63, 0.0 }
  0x4f   :  { %158 = vst [vmem:[%s375_s3 + $0x28] sm:$0xff] %v145_v34 }
  0x50   :  { %159 = vst [vmem:[%s375_s3 + $0x30] sm:$0xff] %v146_v56 }
  0x51   :  { %160 = vst [vmem:[%s375_s3 + $0x38] sm:$0xff] %v147_v60 }
  0x52   :  { %161 = vst [vmem:[%s375_s3 + $0x40] sm:$0xff] %v148_v62 }
  0x53   :  { %162 = vst [vmem:[%s375_s3 + $0x48] sm:$0xff] %v149_v4 }
  0x54   :  { %163 = vst [vmem:[%s375_s3 + $0x50] sm:$0xff] %v150_v5 }
  0x55   :  { %164 = vst [vmem:[%s375_s3 + $0x58] sm:$0xff] %v151_v6 }
  0x56   :  { %165 = vst [vmem:[%s375_s3 + $0x60] sm:$0x3] %v152_v7 }

// kernel: dcc_igtd_generator_forward.5
= control target key start
LH: loop header
LB: loop body
LE: loop exit
PB: predicated region body
PF: predicated region fallthrough
CT: control target
= control target key end

     0   :  { %s10930_s1 = inlined_call_operand.vmem [shape: bf16[4736,128], index: 1, kind: input, shape index: {}]   ;;  %s10931_s0 = inlined_call_operand.vmem [shape: bf16[98,4736], index: 0, kind: input, shape index: {}]   ;;  %s10932_s2 = inlined_call_operand.vmem [shape: f32[1,128], index: 2, kind: input, shape index: {}]   ;;  %s10933_s3 = inlined_call_operand.vmem [shape: f32[98,128], index: 3, kind: output, shape index: {}]  }
   0x1   :  { %v7873_v0 = vld [vmem:[%s10930_s1 + $0x38] sm:$0xff]  ;;  %v7872_v1 = vld [vmem:[%s10930_s1 + $0x30] sm:$0xff]  ;;  %v7871_v2 = vld [vmem:[%s10930_s1 + $0x28] sm:$0xff] }
   0x2   :  { %8162 = vmatpush.bf16.msra.mxu1 %v7873_v0  ;;  %8163 = vmatpush.bf16.msra.mxu2 %v7873_v0  ;;  %v7870_v3 = vld [vmem:[%s10930_s1 + $0x20] sm:$0xff]  ;;  %v7869_v4 = vld [vmem:[%s10930_s1 + $0x18] sm:$0xff]  ;;  %v7868_v5 = vld [vmem:[%s10930_s1 + $0x10] sm:$0xff] }
   0x3   :  { %8164 = vmatpush.bf16.msra.mxu3 %v7873_v0  ;;  %3905 = vmatpush.bf16.msra.mxu0 %v7873_v0  ;;  %v7867_v6 = vld [vmem:[%s10930_s1 + $0x8] sm:$0xff]  ;;  %v8233_v7 = vld [vmem:[%s10931_s0 + $0x6f0] sm:$0x11]  ;;  %v7866_v8 = vld [vmem:[%s10930_s1] sm:$0xff] }
   0x4   :  { %v5870_v9 = vld [vmem:[%s10931_s0 + $0x250] sm:$0xf]  ;;  %v7736_v10 = vld [vmem:[%s10931_s0 + $0x2e0] sm:$0xf0]  ;;  %v6166_v11 = vld [vmem:[%s10931_s0 + $0x4a0] sm:$0xf]  ;;  %v1574_v15 = vunpack.c.l.b16 %v8233_v7 }
   0x5   :  { %v7810_v12 = vld [vmem:[%s10931_s0 + $0x530] sm:$0xf0]  ;;  %v5574_v13 = vld [vmem:[%s10931_s0] sm:$0xf]  ;;  %v7897_v16 = vld [vmem:[%s10930_s1 + $0xf8] sm:$0xff]  ;;  %v5871_v18 = vor.u32 %v7736_v10, %v5870_v9 }
   0x6   :  { %8165 = vmatpush.bf16.msra.mxu1 %v7872_v1  ;;  %8166 = vmatpush.bf16.msra.mxu2 %v7872_v1  ;;  %v7662_v14 = vld [vmem:[%s10931_s0 + $0x90] sm:$0xf0]  ;;  %v7889_v17 = vld [vmem:[%s10930_s1 + $0xb8] sm:$0xff]  ;;  %v6167_v19 = vor.u32 %v7810_v12, %v6166_v11  ;;  %v1833_v23 = vpack.c.b16 %v1574_v15, %v1574_v15  ;;  %v7895_v28 = vld [vmem:[%s10930_s1 + $0xe8] sm:$0xff] }
   0x7   :  { %8167 = vmatpush.bf16.msra.mxu3 %v7872_v1  ;;  %3906 = vmatpush.bf16.msra.mxu0 %v7872_v1  ;;  %v7881_v20 = vld [vmem:[%s10930_s1 + $0x78] sm:$0xff]  ;;  %v5575_v21 = vor.u32 %v7662_v14, %v5574_v13  ;;  %v7896_v24 = vld [vmem:[%s10930_s1 + $0xf0] sm:$0xff]  ;;  %v7887_v29 = vld [vmem:[%s10930_s1 + $0xa8] sm:$0xff] }
   0x8   :  { %v7905_v22 = vld [vmem:[%s10930_s1 + $0x138] sm:$0xff]  ;;  %v7888_v25 = vld [vmem:[%s10930_s1 + $0xb0] sm:$0xff]  ;;  %v7879_v30 = vld [vmem:[%s10930_s1 + $0x68] sm:$0xff] }
   0x9   :  { %v7880_v26 = vld [vmem:[%s10930_s1 + $0x70] sm:$0xff]  ;;  %v7903_v31 = vld [vmem:[%s10930_s1 + $0x128] sm:$0xff]  ;;  %v7894_v32 = vld [vmem:[%s10930_s1 + $0xe0] sm:$0xff] }
   0xa   :  { %8168 = vmatpush.bf16.msra.mxu1 %v7871_v2  ;;  %8169 = vmatpush.bf16.msra.mxu2 %v7871_v2  ;;  %v7904_v27 = vld [vmem:[%s10930_s1 + $0x130] sm:$0xff]  ;;  %v7886_v33 = vld [vmem:[%s10930_s1 + $0xa0] sm:$0xff]  ;;  %v6018_v35 = vld [vmem:[%s10931_s0 + $0x378] sm:$0xf] }
   0xb   :  { %8170 = vmatpush.bf16.msra.mxu3 %v7871_v2  ;;  %3907 = vmatpush.bf16.msra.mxu0 %v7871_v2  ;;  %v7878_v34 = vld [vmem:[%s10930_s1 + $0x60] sm:$0xff]  ;;  %v7773_v36 = vld [vmem:[%s10931_s0 + $0x408] sm:$0xf0]  ;;  %v6314_v37 = vld [vmem:[%s10931_s0 + $0x5c8] sm:$0xf] }
   0xc   :  { %v7847_v38 = vld [vmem:[%s10931_s0 + $0x658] sm:$0xf0]  ;;  %v7902_v39 = vld [vmem:[%s10930_s1 + $0x120] sm:$0xff]  ;;  %v5722_v40 = vld [vmem:[%s10931_s0 + $0x128] sm:$0xf]  ;;  %v6019_v44 = vor.u32 %v7773_v36, %v6018_v35 }
   0xd   :  { %v7699_v41 = vld [vmem:[%s10931_s0 + $0x1b8] sm:$0xf0]  ;;  %v6315_v45 = vor.u32 %v7847_v38, %v6314_v37  ;;  %v7892_v49 = vld [vmem:[%s10930_s1 + $0xd0] sm:$0xff]  ;;  %v7891_v53 = vld [vmem:[%s10930_s1 + $0xc8] sm:$0xff] }
   0xe   :  { %8171 = vmatpush.bf16.msra.mxu1 %v7870_v3  ;;  %8172 = vmatpush.bf16.msra.mxu2 %v7870_v3  ;;  %v7893_v42 = vld [vmem:[%s10930_s1 + $0xd8] sm:$0xff]  ;;  %v5723_v47 = vor.u32 %v7699_v41, %v5722_v40  ;;  %v7884_v50 = vld [vmem:[%s10930_s1 + $0x90] sm:$0xff]  ;;  %v7883_v54 = vld [vmem:[%s10930_s1 + $0x88] sm:$0xff] }
   0xf   :  { %8173 = vmatpush.bf16.msra.mxu3 %v7870_v3  ;;  %3908 = vmatpush.bf16.msra.mxu0 %v7870_v3  ;;  %v7885_v43 = vld [vmem:[%s10930_s1 + $0x98] sm:$0xff]  ;;  %v7876_v51 = vld [vmem:[%s10930_s1 + $0x50] sm:$0xff]  ;;  %v7875_v55 = vld [vmem:[%s10930_s1 + $0x48] sm:$0xff] }
  0x10   :  { %v7877_v46 = vld [vmem:[%s10930_s1 + $0x58] sm:$0xff]  ;;  %v7900_v52 = vld [vmem:[%s10930_s1 + $0x110] sm:$0xff]  ;;  %v7890_v56 = vld [vmem:[%s10930_s1 + $0xc0] sm:$0xff] }
  0x11   :  { %v7901_v48 = vld [vmem:[%s10930_s1 + $0x118] sm:$0xff]  ;;  %v7899_v57 = vld [vmem:[%s10930_s1 + $0x108] sm:$0xff]  ;;  %v7882_v58 = vld [vmem:[%s10930_s1 + $0x80] sm:$0xff] }
  0x12   :  { %8174 = vmatpush.bf16.msra.mxu1 %v7869_v4  ;;  %8175 = vmatpush.bf16.msra.mxu2 %v7869_v4  ;;  %v7874_v59 = vld [vmem:[%s10930_s1 + $0x40] sm:$0xff]  ;;  %v7645_v60 = vld [vmem:[%s10931_s0 + $0xc] sm:$0xf]  ;;  %v7921_v63 = vld [vmem:[%s10930_s1 + $0x1b8] sm:$0xff] }
  0x13   :  { %8176 = vmatpush.bf16.msra.mxu3 %v7869_v4  ;;  %3909 = vmatpush.bf16.msra.mxu0 %v7869_v4  ;;  %v5584_v61 = vld [vmem:[%s10931_s0 + $0x9c] sm:$0xf0]  ;;  %v7644_v62 = vld [vmem:[%s10931_s0 + $0x4] sm:$0xf]  ;;  %v7929_v0 = vld [vmem:[%s10930_s1 + $0x1f8] sm:$0xff] }
  0x14   :  { %v5576_v1 = vld [vmem:[%s10931_s0 + $0x94] sm:$0xf0]  ;;  %v5582_v2 = vld [vmem:[%s10931_s0 + $0x8] sm:$0xf]  ;;  %v7663_v3 = vld [vmem:[%s10931_s0 + $0x98] sm:$0xf0]  ;;  %v5587_v4 = vor.u32 %v7645_v60, %v5584_v61 }
  0x15   :  { %v7913_v9 = vld [vmem:[%s10930_s1 + $0x178] sm:$0xff]  ;;  %v5579_v11 = vor.u32 %v7644_v62, %v5576_v1  ;;  %v5583_v12 = vor.u32 %v7663_v3, %v5582_v2  ;;  %v7920_v14 = vld [vmem:[%s10930_s1 + $0x1b0] sm:$0xff]  ;;  %v7910_v36 = vld [vmem:[%s10930_s1 + $0x160] sm:$0xff] }
  0x16   :  { %8177 = vmatpush.bf16.msra.mxu1 %v7868_v5  ;;  %8178 = vmatpush.bf16.msra.mxu2 %v7868_v5  ;;  %v7937_v10 = vld [vmem:[%s10930_s1 + $0x238] sm:$0xff]  ;;  %v7928_v15 = vld [vmem:[%s10930_s1 + $0x1f0] sm:$0xff]  ;;  %v7934_v37 = vld [vmem:[%s10930_s1 + $0x220] sm:$0xff] }
  0x17   :  { %8179 = vmatpush.bf16.msra.mxu3 %v7868_v5  ;;  %3910 = vmatpush.bf16.msra.mxu0 %v7868_v5  ;;  %v7898_v5 = vld [vmem:[%s10930_s1 + $0x100] sm:$0xff]  ;;  %v7917_v38 = vld [vmem:[%s10930_s1 + $0x198] sm:$0xff]  ;;  %v6020_v60 = vld [vmem:[%s10931_s0 + $0x40c] sm:$0xf0] }
  0x18   :  { %v7909_v40 = vld [vmem:[%s10930_s1 + $0x158] sm:$0xff]  ;;  %v6026_v61 = vld [vmem:[%s10931_s0 + $0x380] sm:$0xf]  ;;  %v7774_v62 = vld [vmem:[%s10931_s0 + $0x410] sm:$0xf0] }
  0x19   :  { %v7719_v41 = vld [vmem:[%s10931_s0 + $0x25c] sm:$0xf]  ;;  %v6027_v3 = vor.u32 %v7774_v62, %v6026_v61  ;;  %v5600_v62 = vld [vmem:[%s10931_s0 + $0xac] sm:$0xf0] }
  0x1a   :  { %8180 = vmatpush.bf16.msra.mxu1 %v7867_v6  ;;  %8181 = vmatpush.bf16.msra.mxu2 %v7867_v6  ;;  %v7775_v1 = vld [vmem:[%s10931_s0 + $0x418] sm:$0xf0] }
  0x1b   :  { %8182 = vmatpush.bf16.msra.mxu3 %v7867_v6  ;;  %3911 = vmatpush.bf16.msra.mxu0 %v7867_v6  ;;  %v5590_v6 = vld [vmem:[%s10931_s0 + $0x10] sm:$0xf]  ;;  %v7647_v61 = vld [vmem:[%s10931_s0 + $0x1c] sm:$0xf] }
  0x1e   :  { %8183 = vmatpush.bf16.msra.mxu1 %v7866_v8  ;;  %8184 = vmatpush.bf16.msra.mxu2 %v7866_v8 }
  0x1f   :  { %8185 = vmatpush.bf16.msra.mxu3 %v7866_v8  ;;  %3912 = vmatpush.bf16.msra.mxu0 %v7866_v8  ;;  %v7664_v8 = vld [vmem:[%s10931_s0 + $0xa0] sm:$0xf0] }
  0x20   :  { %v5591_v13 = vor.u32 %v7664_v8, %v5590_v6  ;;  %v7915_v6 = vld [vmem:[%s10930_s1 + $0x188] sm:$0xff] }
  0x21   :  { %3923 = vmatmul.bf16.vlgmr.msra.gmra.mxu1 %v5871_v18  ;;  %3933 = vmatmul.bf16.vlgmr.msra.gmra.mxu2 %v6167_v19  ;;  %v7919_v18 = vld [vmem:[%s10930_s1 + $0x1a8] sm:$0xff] }
  0x22   :  { %3991 = vmatpush.bf16.msrb.mxu2 %v7889_v17  ;;  %3948 = vmatpush.bf16.msrb.mxu1 %v7881_v20  ;;  %v7936_v17 = vld [vmem:[%s10930_s1 + $0x230] sm:$0xff]  ;;  %v7927_v19 = vld [vmem:[%s10930_s1 + $0x1e8] sm:$0xff] }
  0x23   :  { %4034 = vmatpush.bf16.msrb.mxu3 %v7897_v16  ;;  %3913 = vmatmul.bf16.vlgmr.msra.gmra.mxu0 %v5575_v21  ;;  %v7912_v16 = vld [vmem:[%s10930_s1 + $0x170] sm:$0xff]  ;;  %v7911_v20 = vld [vmem:[%s10930_s1 + $0x168] sm:$0xff] }
  0x24   :  { %4077 = vmatpush.bf16.msrb.mxu0 %v7905_v22  ;;  %3943 = vmatmul.bf16.vlgmr.msra.gmra.mxu3 %v1833_v23  ;;  %v7935_v21 = vld [vmem:[%s10930_s1 + $0x228] sm:$0xff]  ;;  %v7918_v22 = vld [vmem:[%s10930_s1 + $0x1a0] sm:$0xff] }
  0x25   :  { %v7926_v23 = vld [vmem:[%s10930_s1 + $0x1e0] sm:$0xff]  ;;  %v7923_v8 = vld [vmem:[%s10930_s1 + $0x1c8] sm:$0xff] }
  0x26   :  { %3992 = vmatpush.bf16.msrb.mxu2 %v7888_v25  ;;  %3949 = vmatpush.bf16.msrb.mxu1 %v7880_v26  ;;  %v5732_v25 = vld [vmem:[%s10931_s0 + $0x1c4] sm:$0xf0]  ;;  %v7681_v26 = vld [vmem:[%s10931_s0 + $0x12c] sm:$0xf] }
  0x27   :  { %4035 = vmatpush.bf16.msrb.mxu3 %v7896_v24  ;;  %v7682_v24 = vld [vmem:[%s10931_s0 + $0x134] sm:$0xf] }
  0x28   :  { %4078 = vmatpush.bf16.msrb.mxu0 %v7904_v27  ;;  %v5724_v27 = vld [vmem:[%s10931_s0 + $0x1bc] sm:$0xf0] }
  0x2a   :  { %3993 = vmatpush.bf16.msrb.mxu2 %v7887_v29  ;;  %3950 = vmatpush.bf16.msrb.mxu1 %v7879_v30  ;;  %v7700_v29 = vld [vmem:[%s10931_s0 + $0x1c0] sm:$0xf0]  ;;  %v5735_v30 = vor.u32 %v7682_v24, %v5732_v25 }
  0x2b   :  { %4036 = vmatpush.bf16.msrb.mxu3 %v7895_v28  ;;  %v5730_v28 = vld [vmem:[%s10931_s0 + $0x130] sm:$0xf]  ;;  %v7922_v24 = vld [vmem:[%s10930_s1 + $0x1c0] sm:$0xff] }
  0x2c   :  { %4079 = vmatpush.bf16.msrb.mxu0 %v7903_v31  ;;  %v5738_v31 = vld [vmem:[%s10931_s0 + $0x138] sm:$0xf]  ;;  %v7906_v25 = vld [vmem:[%s10930_s1 + $0x140] sm:$0xff] }
  0x2e   :  { %3994 = vmatpush.bf16.msrb.mxu2 %v7886_v33  ;;  %3951 = vmatpush.bf16.msrb.mxu1 %v7878_v34  ;;  %v5727_v33 = vor.u32 %v7681_v26, %v5724_v27  ;;  %v5731_v34 = vor.u32 %v7700_v29, %v5730_v28  ;;  %v7830_v26 = vld [vmem:[%s10931_s0 + $0x5d4] sm:$0xf]  ;;  %v6324_v27 = vld [vmem:[%s10931_s0 + $0x664] sm:$0xf0]  ;;  %v7829_v28 = vld [vmem:[%s10931_s0 + $0x5cc] sm:$0xf] }
  0x2f   :  { %4037 = vmatpush.bf16.msrb.mxu3 %v7894_v32  ;;  %v7701_v32 = vld [vmem:[%s10931_s0 + $0x1c8] sm:$0xf0]  ;;  %v6316_v29 = vld [vmem:[%s10931_s0 + $0x65c] sm:$0xf0] }
  0x30   :  { %4080 = vmatpush.bf16.msrb.mxu0 %v7902_v39  ;;  %v5739_v35 = vor.u32 %v7701_v32, %v5738_v31  ;;  %v7925_v39 = vld [vmem:[%s10930_s1 + $0x1d8] sm:$0xff]  ;;  %v7848_v31 = vld [vmem:[%s10931_s0 + $0x660] sm:$0xf0]  ;;  %v6327_v32 = vor.u32 %v7830_v26, %v6324_v27  ;;  %v5746_v26 = vld [vmem:[%s10931_s0 + $0x140] sm:$0xf] }
  0x31   :  { %3928 = vmatmul.bf16.gmra.mxu1 %v6019_v44  ;;  %3938 = vmatmul.bf16.gmra.mxu2 %v6315_v45  ;;  %v5872_v44 = vld [vmem:[%s10931_s0 + $0x2e4] sm:$0xf0]  ;;  %v5878_v45 = vld [vmem:[%s10931_s0 + $0x258] sm:$0xf]  ;;  %v7702_v27 = vld [vmem:[%s10931_s0 + $0x1d0] sm:$0xf0] }
  0x32   :  { %3995 = vmatpush.bf16.msrb.mxu2 %v7885_v43  ;;  %3952 = vmatpush.bf16.msrb.mxu1 %v7877_v46  ;;  %v7718_v43 = vld [vmem:[%s10931_s0 + $0x254] sm:$0xf]  ;;  %v7737_v46 = vld [vmem:[%s10931_s0 + $0x2e8] sm:$0xf0] }
  0x33   :  { %4038 = vmatpush.bf16.msrb.mxu3 %v7893_v42  ;;  %3918 = vmatmul.bf16.gmra.mxu0 %v5723_v47  ;;  %v5880_v42 = vld [vmem:[%s10931_s0 + $0x2ec] sm:$0xf0] }
  0x34   :  { %4081 = vmatpush.bf16.msrb.mxu0 %v7901_v48  ;;  %v5883_v47 = vor.u32 %v7719_v41, %v5880_v42  ;;  %v5886_v48 = vld [vmem:[%s10931_s0 + $0x260] sm:$0xf]  ;;  %v273_v41 = vld [vmem:[%s10931_s0 + $0x6f8] sm:$0x11] }
  0x35   :  { %v7945_v42 = vld [vmem:[%s10930_s1 + $0x278] sm:$0xff] }
  0x36   :  { %3996 = vmatpush.bf16.msrb.mxu2 %v7884_v50  ;;  %3953 = vmatpush.bf16.msrb.mxu1 %v7876_v51  ;;  %v5875_v50 = vor.u32 %v7718_v43, %v5872_v44  ;;  %v5879_v51 = vor.u32 %v7737_v46, %v5878_v45  ;;  %v1577_v43 = vunpack.c.h.b16 %v273_v41  ;;  %v8626_v44 = vld [vmem:[%s10931_s0 + $0x700] sm:$0x11]  ;;  %v7969_v45 = vld [vmem:[%s10930_s1 + $0x338] sm:$0xff]  ;;  %v1575_v46 = vunpack.c.h.b16 %v8233_v7  ;;  %v7960_v7 = vld [vmem:[%s10930_s1 + $0x2f0] sm:$0xff] }
  0x37   :  { %4039 = vmatpush.bf16.msrb.mxu3 %v7892_v49  ;;  %v7738_v49 = vld [vmem:[%s10931_s0 + $0x2f0] sm:$0xf0] }
  0x38   :  { %4082 = vmatpush.bf16.msrb.mxu0 %v7900_v52  ;;  %v5887_v52 = vor.u32 %v7738_v49, %v5886_v48  ;;  %v1578_v48 = vunpack.c.l.b16 %v8626_v44  ;;  %v1836_v49 = vpack.c.b16 %v1577_v43, %v1577_v43 }
  0x3a   :  { %3997 = vmatpush.bf16.msrb.mxu2 %v7883_v54  ;;  %3954 = vmatpush.bf16.msrb.mxu1 %v7875_v55  ;;  %v7916_v54 = vld [vmem:[%s10930_s1 + $0x190] sm:$0xff] }
  0x3b   :  { %4040 = vmatpush.bf16.msrb.mxu3 %v7891_v53  ;;  %v7933_v53 = vld [vmem:[%s10930_s1 + $0x218] sm:$0xff]  ;;  %v7924_v55 = vld [vmem:[%s10930_s1 + $0x1d0] sm:$0xff] }
  0x3c   :  { %4083 = vmatpush.bf16.msrb.mxu0 %v7899_v57  ;;  %v7756_v57 = vld [vmem:[%s10931_s0 + $0x384] sm:$0xf] }
  0x3e   :  { %3998 = vmatpush.bf16.msrb.mxu2 %v7882_v58  ;;  %3955 = vmatpush.bf16.msrb.mxu1 %v7874_v59  ;;  %v6028_v58 = vld [vmem:[%s10931_s0 + $0x414] sm:$0xf0]  ;;  %v7755_v59 = vld [vmem:[%s10931_s0 + $0x37c] sm:$0xf] }
  0x3f   :  { %4041 = vmatpush.bf16.msrb.mxu3 %v7890_v56  ;;  %v7908_v56 = vld [vmem:[%s10930_s1 + $0x150] sm:$0xff]  ;;  %v6023_v2 = vor.u32 %v7755_v59, %v6020_v60 }
  0x40   :  { %4084 = vmatpush.bf16.msrb.mxu0 %v7898_v5  ;;  %v7932_v5 = vld [vmem:[%s10930_s1 + $0x210] sm:$0xff] }
  0x41   :  { %3956 = vmatmul.bf16.vlgmr.msrb.gmra.mxu1 %v5579_v11  ;;  %3999 = vmatmul.bf16.vlgmr.msrb.gmra.mxu2 %v5583_v12  ;;  %v6176_v11 = vld [vmem:[%s10931_s0 + $0x53c] sm:$0xf0]  ;;  %v7792_v12 = vld [vmem:[%s10931_s0 + $0x4a4] sm:$0xf] }
  0x42   :  { %4163 = vmatpush.bf16.msra.mxu2 %v7921_v63  ;;  %4042 = vmatmul.bf16.vlgmr.msrb.gmra.mxu3 %v5587_v4  ;;  %v6031_v63 = vor.u32 %v7756_v57, %v6028_v58 }
  0x43   :  { %4206 = vmatpush.bf16.msra.mxu3 %v7929_v0  ;;  %4120 = vmatpush.bf16.msra.mxu1 %v7913_v9  ;;  %v6034_v0 = vld [vmem:[%s10931_s0 + $0x388] sm:$0xf] }
  0x44   :  { %4249 = vmatpush.bf16.msra.mxu0 %v7937_v10  ;;  %v6035_v4 = vor.u32 %v7775_v1, %v6034_v0  ;;  %v7907_v9 = vld [vmem:[%s10930_s1 + $0x148] sm:$0xff]  ;;  %v5598_v1 = vld [vmem:[%s10931_s0 + $0x18] sm:$0xf] }
  0x45   :  { %4085 = vmatmul.bf16.vlgmr.msrb.gmra.mxu0 %v5591_v13  ;;  %v7793_v10 = vld [vmem:[%s10931_s0 + $0x4ac] sm:$0xf]  ;;  %v6168_v13 = vld [vmem:[%s10931_s0 + $0x534] sm:$0xf0]  ;;  %v5592_v0 = vld [vmem:[%s10931_s0 + $0xa4] sm:$0xf0] }
  0x46   :  { %4164 = vmatpush.bf16.msra.mxu2 %v7920_v14  ;;  %v6174_v14 = vld [vmem:[%s10931_s0 + $0x4a8] sm:$0xf] }
  0x47   :  { %4207 = vmatpush.bf16.msra.mxu3 %v7928_v15  ;;  %4121 = vmatpush.bf16.msra.mxu1 %v7912_v16  ;;  %v7811_v15 = vld [vmem:[%s10931_s0 + $0x538] sm:$0xf0]  ;;  %v6179_v16 = vor.u32 %v7793_v10, %v6176_v11 }
  0x48   :  { %4250 = vmatpush.bf16.msra.mxu0 %v7936_v17  ;;  %v6182_v17 = vld [vmem:[%s10931_s0 + $0x4b0] sm:$0xf] }
  0x4a   :  { %4165 = vmatpush.bf16.msra.mxu2 %v7919_v18  ;;  %v7812_v18 = vld [vmem:[%s10931_s0 + $0x540] sm:$0xf0] }
  0x4b   :  { %4208 = vmatpush.bf16.msra.mxu3 %v7927_v19  ;;  %4122 = vmatpush.bf16.msra.mxu1 %v7911_v20  ;;  %v6171_v19 = vor.u32 %v7792_v12, %v6168_v13  ;;  %v6175_v20 = vor.u32 %v7811_v15, %v6174_v14  ;;  %v7951_v15 = vld [vmem:[%s10930_s1 + $0x2a8] sm:$0xff] }
  0x4c   :  { %4251 = vmatpush.bf16.msra.mxu0 %v7935_v21  ;;  %v6183_v21 = vor.u32 %v7812_v18, %v6182_v17  ;;  %v7943_v17 = vld [vmem:[%s10930_s1 + $0x268] sm:$0xff] }
  0x4e   :  { %4166 = vmatpush.bf16.msra.mxu2 %v7918_v22  ;;  %v7931_v22 = vld [vmem:[%s10930_s1 + $0x208] sm:$0xff] }
  0x4f   :  { %4209 = vmatpush.bf16.msra.mxu3 %v7926_v23  ;;  %4123 = vmatpush.bf16.msra.mxu1 %v7910_v36  ;;  %v7914_v23 = vld [vmem:[%s10930_s1 + $0x180] sm:$0xff]  ;;  %v6319_v36 = vor.u32 %v7829_v28, %v6316_v29 }
  0x50   :  { %4252 = vmatpush.bf16.msra.mxu0 %v7934_v37  ;;  %v7950_v28 = vld [vmem:[%s10930_s1 + $0x2a0] sm:$0xff] }
  0x51   :  { %3961 = vmatmul.bf16.gmra.mxu1 %v5727_v33  ;;  %4004 = vmatmul.bf16.gmra.mxu2 %v5731_v34  ;;  %v6330_v33 = vld [vmem:[%s10931_s0 + $0x5d8] sm:$0xf]  ;;  %v7849_v34 = vld [vmem:[%s10931_s0 + $0x668] sm:$0xf0] }
  0x52   :  { %4047 = vmatmul.bf16.gmra.mxu3 %v5735_v30  ;;  %4167 = vmatpush.bf16.msra.mxu2 %v7917_v38  ;;  %v6322_v30 = vld [vmem:[%s10931_s0 + $0x5d0] sm:$0xf]  ;;  %v6331_v38 = vor.u32 %v7849_v34, %v6330_v33  ;;  %v5747_v34 = vor.u32 %v7702_v27, %v5746_v26 }
  0x53   :  { %4210 = vmatpush.bf16.msra.mxu3 %v7925_v39  ;;  %4124 = vmatpush.bf16.msra.mxu1 %v7909_v40  ;;  %v6323_v37 = vor.u32 %v7848_v31, %v6322_v30  ;;  %v7953_v39 = vld [vmem:[%s10930_s1 + $0x2b8] sm:$0xff]  ;;  %v5754_v30 = vld [vmem:[%s10931_s0 + $0x148] sm:$0xf]  ;;  %v7948_v27 = vld [vmem:[%s10930_s1 + $0x290] sm:$0xff] }
  0x54   :  { %4253 = vmatpush.bf16.msra.mxu0 %v7933_v53  ;;  %v7961_v40 = vld [vmem:[%s10930_s1 + $0x2f8] sm:$0xff]  ;;  %v1837_v53 = vpack.c.b16 %v1578_v48, %v1578_v48 }
  0x55   :  { %4090 = vmatmul.bf16.gmra.mxu0 %v5739_v35  ;;  %v7930_v35 = vld [vmem:[%s10930_s1 + $0x200] sm:$0xff]  ;;  %v7703_v31 = vld [vmem:[%s10931_s0 + $0x1d8] sm:$0xf0] }
  0x56   :  { %4168 = vmatpush.bf16.msra.mxu2 %v7916_v54 }
  0x57   :  { %4211 = vmatpush.bf16.msra.mxu3 %v7924_v55  ;;  %4125 = vmatpush.bf16.msra.mxu1 %v7908_v56  ;;  %v7952_v55 = vld [vmem:[%s10930_s1 + $0x2b0] sm:$0xff] }
  0x58   :  { %4254 = vmatpush.bf16.msra.mxu0 %v7932_v5  ;;  %v7944_v56 = vld [vmem:[%s10930_s1 + $0x270] sm:$0xff]  ;;  %v5606_v5 = vld [vmem:[%s10931_s0 + $0x20] sm:$0xf] }
  0x5a   :  { %4169 = vmatpush.bf16.msra.mxu2 %v7915_v6  ;;  %v7666_v6 = vld [vmem:[%s10931_s0 + $0xb0] sm:$0xf0] }
  0x5b   :  { %4212 = vmatpush.bf16.msra.mxu3 %v7923_v8  ;;  %4126 = vmatpush.bf16.msra.mxu1 %v7907_v9  ;;  %v5607_v12 = vor.u32 %v7666_v6, %v5606_v5 }
  0x5c   :  { %4255 = vmatpush.bf16.msra.mxu0 %v7931_v22  ;;  %v7684_v22 = vld [vmem:[%s10931_s0 + $0x144] sm:$0xf] }
  0x5e   :  { %4170 = vmatpush.bf16.msra.mxu2 %v7914_v23  ;;  %v5748_v23 = vld [vmem:[%s10931_s0 + $0x1d4] sm:$0xf0] }
  0x5f   :  { %4213 = vmatpush.bf16.msra.mxu3 %v7922_v24  ;;  %4127 = vmatpush.bf16.msra.mxu1 %v7906_v25  ;;  %v7683_v24 = vld [vmem:[%s10931_s0 + $0x13c] sm:$0xf]  ;;  %v5740_v25 = vld [vmem:[%s10931_s0 + $0x1cc] sm:$0xf0]  ;;  %v5751_v29 = vor.u32 %v7684_v22, %v5748_v23 }
  0x60   :  { %4256 = vmatpush.bf16.msra.mxu0 %v7930_v35  ;;  %v5743_v33 = vor.u32 %v7683_v24, %v5740_v25 }
  0x61   :  { %3966 = vmatmul.bf16.gmra.mxu1 %v5875_v50  ;;  %4009 = vmatmul.bf16.gmra.mxu2 %v5879_v51  ;;  %v1834_v50 = vpack.c.b16 %v1575_v46, %v1575_v46 }
  0x62   :  { %4052 = vmatmul.bf16.gmra.mxu3 %v5883_v47  ;;  %4335 = vmatpush.bf16.msrb.mxu2 %v7953_v39  ;;  %v1576_v47 = vunpack.c.l.b16 %v273_v41  ;;  %v7958_v39 = vld [vmem:[%s10930_s1 + $0x2e0] sm:$0xff] }
  0x63   :  { %4378 = vmatpush.bf16.msrb.mxu3 %v7961_v40  ;;  %4292 = vmatpush.bf16.msrb.mxu1 %v7945_v42  ;;  %v7942_v40 = vld [vmem:[%s10930_s1 + $0x260] sm:$0xff] }
  0x64   :  { %4421 = vmatpush.bf16.msrb.mxu0 %v7969_v45  ;;  %v1835_v51 = vpack.c.b16 %v1576_v47, %v1576_v47 }
  0x65   :  { %4095 = vmatmul.bf16.gmra.mxu0 %v5887_v52 }
  0x66   :  { %4336 = vmatpush.bf16.msrb.mxu2 %v7952_v55  ;;  %v5894_v55 = vld [vmem:[%s10931_s0 + $0x268] sm:$0xf] }
  0x67   :  { %4379 = vmatpush.bf16.msrb.mxu3 %v7960_v7  ;;  %4293 = vmatpush.bf16.msrb.mxu1 %v7944_v56 }
  0x6a   :  { %4337 = vmatpush.bf16.msrb.mxu2 %v7951_v15  ;;  %v7941_v15 = vld [vmem:[%s10930_s1 + $0x258] sm:$0xff] }
  0x6b   :  { %4294 = vmatpush.bf16.msrb.mxu1 %v7943_v17 }
  0x6e   :  { %4338 = vmatpush.bf16.msrb.mxu2 %v7950_v28  ;;  %v7758_v28 = vld [vmem:[%s10931_s0 + $0x394] sm:$0xf] }
  0x6f   :  { %4295 = vmatpush.bf16.msrb.mxu1 %v7942_v40  ;;  %v7777_v40 = vld [vmem:[%s10931_s0 + $0x428] sm:$0xf0] }
  0x71   :  { %3971 = vmatmul.bf16.gmra.mxu1 %v6023_v2  ;;  %4014 = vmatmul.bf16.gmra.mxu2 %v6027_v3  ;;  %v7665_v2 = vld [vmem:[%s10931_s0 + $0xa8] sm:$0xf0]  ;;  %v7968_v3 = vld [vmem:[%s10930_s1 + $0x330] sm:$0xff] }
  0x72   :  { %4057 = vmatmul.bf16.gmra.mxu3 %v6031_v63  ;;  %v7646_v63 = vld [vmem:[%s10931_s0 + $0x14] sm:$0xf]  ;;  %4422 = vmatpush.bf16.msrb.mxu0 %v7968_v3  ;;  %v5599_v10 = vor.u32 %v7665_v2, %v5598_v1  ;;  %v7740_v1 = vld [vmem:[%s10931_s0 + $0x300] sm:$0xf0] }
  0x73   :  { %v5595_v9 = vor.u32 %v7646_v63, %v5592_v0  ;;  %v5902_v0 = vld [vmem:[%s10931_s0 + $0x270] sm:$0xf]  ;;  %4296 = vmatpush.bf16.msrb.mxu1 %v7941_v15  ;;  %v7814_v15 = vld [vmem:[%s10931_s0 + $0x550] sm:$0xf0] }
  0x75   :  { %4100 = vmatmul.bf16.gmra.mxu0 %v6035_v4  ;;  %v5603_v4 = vor.u32 %v7647_v61, %v5600_v62  ;;  %v7949_v61 = vld [vmem:[%s10930_s1 + $0x298] sm:$0xff] }
  0x76   :  { %v7957_v62 = vld [vmem:[%s10930_s1 + $0x2d8] sm:$0xff]  ;;  %4339 = vmatpush.bf16.msrb.mxu2 %v7949_v61 }
  0x7a   :  { %4340 = vmatpush.bf16.msrb.mxu2 %v7948_v27 }
  0x81   :  { %3976 = vmatmul.bf16.gmra.mxu1 %v6171_v19  ;;  %4019 = vmatmul.bf16.gmra.mxu2 %v6175_v20 }
  0x82   :  { %4062 = vmatmul.bf16.gmra.mxu3 %v6179_v16  ;;  %v7959_v16 = vld [vmem:[%s10930_s1 + $0x2e8] sm:$0xff] }
  0x83   :  { %4380 = vmatpush.bf16.msrb.mxu3 %v7959_v16 }
  0x85   :  { %4105 = vmatmul.bf16.gmra.mxu0 %v6183_v21  ;;  %v7967_v21 = vld [vmem:[%s10930_s1 + $0x328] sm:$0xff] }
  0x86   :  { %4423 = vmatpush.bf16.msrb.mxu0 %v7967_v21  ;;  %v7965_v21 = vld [vmem:[%s10930_s1 + $0x318] sm:$0xff] }
  0x87   :  { %4381 = vmatpush.bf16.msrb.mxu3 %v7958_v39  ;;  %v6050_v39 = vld [vmem:[%s10931_s0 + $0x398] sm:$0xf] }
  0x8b   :  { %4382 = vmatpush.bf16.msrb.mxu3 %v7957_v62 }
  0x91   :  { %3981 = vmatmul.bf16.gmra.mxu1 %v6319_v36  ;;  %4024 = vmatmul.bf16.gmra.mxu2 %v6323_v37  ;;  %v5755_v36 = vor.u32 %v7703_v31, %v5754_v30  ;;  %v7757_v30 = vld [vmem:[%s10931_s0 + $0x38c] sm:$0xf]  ;;  %v6042_v31 = vld [vmem:[%s10931_s0 + $0x390] sm:$0xf] }
  0x92   :  { %4067 = vmatmul.bf16.gmra.mxu3 %v6327_v32 }
  0x95   :  { %4110 = vmatmul.bf16.gmra.mxu0 %v6331_v38 }
  0x9e   :  { %v8633_v52 = vpop.f32.mrf.mxu1 }
  0xa0   :  { %v8635_v54 = vpop.f32.mrf.mxu0 }
  0xa1   :  { %3986 = vmatmul.bf16.gmra.mxu1 %v1834_v50  ;;  %4029 = vmatmul.bf16.gmra.mxu2 %v1835_v51  ;;  %v7721_v50 = vld [vmem:[%s10931_s0 + $0x26c] sm:$0xf]  ;;  %v5896_v51 = vld [vmem:[%s10931_s0 + $0x2fc] sm:$0xf0] }
  0xa2   :  { %4072 = vmatmul.bf16.gmra.mxu3 %v1836_v49  ;;  %v7966_v49 = vld [vmem:[%s10930_s1 + $0x320] sm:$0xff]  ;;  %v5899_v63 = vor.u32 %v7721_v50, %v5896_v51 }
  0xa3   :  { %4424 = vmatpush.bf16.msrb.mxu0 %v7966_v49 }
  0xa4   :  { %v8646_v57 = vpop.f32.mrf.mxu2 }
  0xa5   :  { %4115 = vmatmul.bf16.gmra.mxu0 %v1837_v53  ;;  %v7720_v53 = vld [vmem:[%s10931_s0 + $0x264] sm:$0xf] }
  0xa6   :  { %v8648_v58 = vpop.f32.mrf.mxu1 }
  0xa7   :  { %v8650_v59 = vpop.f32.mrf.mxu3  ;;  %4425 = vmatpush.bf16.msrb.mxu0 %v7965_v21 }
  0xa8   :  { %v8652_v60 = vpop.f32.mrf.mxu0 }
  0xac   :  { %v8681_v8 = vpop.f32.mrf.mxu2 }
  0xae   :  { %v8683_v11 = vpop.f32.mrf.mxu1 }
  0xaf   :  { %v3946_v13 = vpop.f32.mrf.mxu3 }
  0xb0   :  { %v8685_v14 = vpop.f32.mrf.mxu0 }
  0xb1   :  { %4128 = vmatmul.bf16.vlgmr.msra.gmra.mxu1 %v5595_v9  ;;  %4171 = vmatmul.bf16.vlgmr.msra.gmra.mxu2 %v5599_v10  ;;  %v5903_v9 = vor.u32 %v7740_v1, %v5902_v0  ;;  %v7955_v0 = vld [vmem:[%s10930_s1 + $0x2c8] sm:$0xff]  ;;  %v7795_v1 = vld [vmem:[%s10931_s0 + $0x4bc] sm:$0xf] }
  0xb2   :  { %4214 = vmatmul.bf16.vlgmr.msra.gmra.mxu3 %v5603_v4 }
  0xb4   :  { %v8696_v18 = vpop.f32.mrf.mxu2 }
  0xb5   :  { %4257 = vmatmul.bf16.vlgmr.msra.gmra.mxu0 %v5607_v12 }
  0xb6   :  { %v8698_v19 = vpop.f32.mrf.mxu1 }
  0xb8   :  { %v8700_v20 = vpop.f32.mrf.mxu0 }
  0xbc   :  { %v8732_v32 = vpop.f32.mrf.mxu2 }
  0xbe   :  { %v3957_v35 = vpop.f32.mrf.mxu1 }
  0xbf   :  { %v3958_v37 = vadd.f32 %v3957_v35, %v8635_v54  ;;  %v5888_v54 = vld [vmem:[%s10931_s0 + $0x2f4] sm:$0xf0]  ;;  %v7776_v35 = vld [vmem:[%s10931_s0 + $0x420] sm:$0xf0] }
  0xc0   :  { %v5891_v4 = vor.u32 %v7720_v53, %v5888_v54  ;;  %v7964_v54 = vld [vmem:[%s10930_s1 + $0x310] sm:$0xff] }
  0xc1   :  { %4133 = vmatmul.bf16.gmra.mxu1 %v5743_v33  ;;  %4176 = vmatmul.bf16.gmra.mxu2 %v5747_v34 }
  0xc2   :  { %4219 = vmatmul.bf16.gmra.mxu3 %v5751_v29  ;;  %v4086_v38 = vpop.f32.mrf.mxu0  ;;  %v6044_v29 = vld [vmem:[%s10931_s0 + $0x424] sm:$0xf0]  ;;  %4426 = vmatpush.bf16.msrb.mxu0 %v7964_v54 }
  0xc4   :  { %v4000_v42 = vpop.f32.mrf.mxu2 }
  0xc5   :  { %v4043_v41 = vpop.f32.mrf.mxu3  ;;  %4262 = vmatmul.bf16.gmra.mxu0 %v5755_v36  ;;  %v4001_v43 = vadd.f32 %v4000_v42, %v3958_v37  ;;  %v7956_v36 = vld [vmem:[%s10930_s1 + $0x2d0] sm:$0xff] }
  0xc6   :  { %v3959_v45 = vpop.f32.mrf.mxu1  ;;  %v7940_v37 = vld [vmem:[%s10930_s1 + $0x250] sm:$0xff]  ;;  %4383 = vmatpush.bf16.msrb.mxu3 %v7956_v36 }
  0xc7   :  { %v4044_v46 = vadd.f32 %v4043_v41, %v4001_v43  ;;  %v3960_v47 = vadd.f32 %v3959_v45, %v8652_v60  ;;  %v7739_v60 = vld [vmem:[%s10931_s0 + $0x2f8] sm:$0xf0]  ;;  %4297 = vmatpush.bf16.msrb.mxu1 %v7940_v37  ;;  %v6043_v45 = vor.u32 %v7776_v35, %v6042_v31 }
  0xc8   :  { %v5895_v5 = vor.u32 %v7739_v60, %v5894_v55 }
  0xc9   :  { %v8760_v7 = vadd.f32 %v4086_v38, %v4044_v46  ;;  %v6047_v38 = vor.u32 %v7758_v28, %v6044_v29  ;;  %v7963_v28 = vld [vmem:[%s10930_s1 + $0x308] sm:$0xff] }
  0xca   :  { %v4088_v48 = vpop.f32.mrf.mxu0  ;;  %4384 = vmatpush.bf16.msrb.mxu3 %v7955_v0  ;;  %4427 = vmatpush.bf16.msrb.mxu0 %v7963_v28 }
  0xcc   :  { %v4002_v2 = vpop.f32.mrf.mxu2 }
  0xcd   :  { %v4045_v56 = vpop.f32.mrf.mxu3  ;;  %v4003_v3 = vadd.f32 %v4002_v2, %v3960_v47  ;;  %v6051_v47 = vor.u32 %v7777_v40, %v6050_v39  ;;  %v6192_v2 = vld [vmem:[%s10931_s0 + $0x54c] sm:$0xf0]  ;;  %v7938_v39 = vld [vmem:[%s10930_s1 + $0x240] sm:$0xff] }
  0xce   :  { %v3962_v6 = vpop.f32.mrf.mxu1  ;;  %v7832_v40 = vld [vmem:[%s10931_s0 + $0x5e4] sm:$0xf] }
  0xcf   :  { %v4046_v10 = vadd.f32 %v4045_v56, %v4003_v3  ;;  %v3963_v12 = vadd.f32 %v3962_v6, %v8685_v14  ;;  %v6184_v3 = vld [vmem:[%s10931_s0 + $0x544] sm:$0xf0]  ;;  %v6190_v6 = vld [vmem:[%s10931_s0 + $0x4b8] sm:$0xf] }
  0xd1   :  { %4138 = vmatmul.bf16.gmra.mxu1 %v5891_v4  ;;  %4181 = vmatmul.bf16.gmra.mxu2 %v5895_v5  ;;  %v8781_v16 = vadd.f32 %v4088_v48, %v4046_v10  ;;  %v7939_v10 = vld [vmem:[%s10930_s1 + $0x248] sm:$0xff] }
  0xd2   :  { %4224 = vmatmul.bf16.gmra.mxu3 %v5899_v63  ;;  %v4091_v13 = vpop.f32.mrf.mxu0  ;;  %v7947_v63 = vld [vmem:[%s10930_s1 + $0x288] sm:$0xff]  ;;  %4298 = vmatpush.bf16.msrb.mxu1 %v7939_v10 }
  0xd3   :  { %4341 = vmatpush.bf16.msrb.mxu2 %v7947_v63  ;;  %v7962_v63 = vld [vmem:[%s10930_s1 + $0x300] sm:$0xff] }
  0xd4   :  { %v4005_v22 = vpop.f32.mrf.mxu2  ;;  %4428 = vmatpush.bf16.msrb.mxu0 %v7962_v63 }
  0xd5   :  { %v4048_v17 = vpop.f32.mrf.mxu3  ;;  %4267 = vmatmul.bf16.gmra.mxu0 %v5903_v9  ;;  %v4006_v14 = vadd.f32 %v4005_v22, %v3963_v12  ;;  %v7813_v9 = vld [vmem:[%s10931_s0 + $0x548] sm:$0xf0]  ;;  %v6195_v12 = vor.u32 %v7795_v1, %v6192_v2  ;;  %v7985_v2 = vld [vmem:[%s10930_s1 + $0x3b8] sm:$0xff] }
  0xd6   :  { %v3964_v23 = vpop.f32.mrf.mxu1  ;;  %4299 = vmatpush.bf16.msrb.mxu1 %v7938_v39  ;;  %v7976_v39 = vld [vmem:[%s10930_s1 + $0x370] sm:$0xff] }
  0xd7   :  { %v4049_v24 = vadd.f32 %v4048_v17, %v4006_v14  ;;  %v3965_v25 = vadd.f32 %v3964_v23, %v8700_v20  ;;  %v6036_v20 = vld [vmem:[%s10931_s0 + $0x41c] sm:$0xf0]  ;;  %v6191_v14 = vor.u32 %v7813_v9, %v6190_v6  ;;  %v275_v6 = vld [vmem:[%s10931_s0 + $0x708] sm:$0x11] }
  0xd8   :  { %v6039_v43 = vor.u32 %v7757_v30, %v6036_v20  ;;  %v7946_v20 = vld [vmem:[%s10930_s1 + $0x280] sm:$0xff] }
  0xd9   :  { %v8805_v33 = vadd.f32 %v4091_v13, %v4049_v24  ;;  %v6198_v13 = vld [vmem:[%s10931_s0 + $0x4c0] sm:$0xf]  ;;  %4342 = vmatpush.bf16.msrb.mxu2 %v7946_v20 }
  0xda   :  { %v4093_v26 = vpop.f32.mrf.mxu0  ;;  %v6199_v24 = vor.u32 %v7814_v15, %v6198_v13  ;;  %v1581_v15 = vunpack.c.h.b16 %v275_v6 }
  0xdc   :  { %v4007_v41 = vpop.f32.mrf.mxu2 }
  0xdd   :  { %v4050_v34 = vpop.f32.mrf.mxu3  ;;  %v4008_v42 = vadd.f32 %v4007_v41, %v3965_v25  ;;  %v6340_v41 = vld [vmem:[%s10931_s0 + $0x674] sm:$0xf0]  ;;  %4507 = vmatpush.bf16.msra.mxu2 %v7985_v2 }
  0xde   :  { %v3967_v46 = vpop.f32.mrf.mxu1 }
  0xdf   :  { %v4051_v48 = vadd.f32 %v4050_v34, %v4008_v42  ;;  %v3968_v49 = vadd.f32 %v3967_v46, %v8633_v52  ;;  %v6338_v46 = vld [vmem:[%s10931_s0 + $0x5e0] sm:$0xf] }
  0xe1   :  { %4143 = vmatmul.bf16.gmra.mxu1 %v6039_v43  ;;  %4186 = vmatmul.bf16.gmra.mxu2 %v6043_v45  ;;  %v8823_v51 = vadd.f32 %v4093_v26, %v4051_v48  ;;  %v6332_v45 = vld [vmem:[%s10931_s0 + $0x66c] sm:$0xf0]  ;;  %v6343_v48 = vor.u32 %v7832_v40, %v6340_v41 }
  0xe2   :  { %4229 = vmatmul.bf16.gmra.mxu3 %v6047_v38  ;;  %v4096_v50 = vpop.f32.mrf.mxu0  ;;  %v7954_v38 = vld [vmem:[%s10930_s1 + $0x2c0] sm:$0xff] }
  0xe3   :  { %4385 = vmatpush.bf16.msrb.mxu3 %v7954_v38  ;;  %v7992_v38 = vld [vmem:[%s10930_s1 + $0x3f0] sm:$0xff] }
  0xe4   :  { %v4010_v55 = vpop.f32.mrf.mxu2 }
  0xe5   :  { %v4053_v53 = vpop.f32.mrf.mxu3  ;;  %4272 = vmatmul.bf16.gmra.mxu0 %v6051_v47  ;;  %v4011_v56 = vadd.f32 %v4010_v55, %v3968_v49  ;;  %v7850_v47 = vld [vmem:[%s10931_s0 + $0x670] sm:$0xf0]  ;;  %v6346_v49 = vld [vmem:[%s10931_s0 + $0x5e8] sm:$0xf] }
  0xe6   :  { %v3969_v60 = vpop.f32.mrf.mxu1 }
  0xe7   :  { %v4054_v61 = vadd.f32 %v4053_v53, %v4011_v56  ;;  %v3970_v62 = vadd.f32 %v3969_v60, %v8648_v58  ;;  %v7794_v58 = vld [vmem:[%s10931_s0 + $0x4b4] sm:$0xf]  ;;  %v6339_v56 = vor.u32 %v7850_v47, %v6338_v46  ;;  %v7649_v47 = vld [vmem:[%s10931_s0 + $0x2c] sm:$0xf] }
  0xe8   :  { %v6187_v22 = vor.u32 %v7794_v58, %v6184_v3  ;;  %v7993_v58 = vld [vmem:[%s10930_s1 + $0x3f8] sm:$0xff] }
  0xe9   :  { %v8847_v4 = vadd.f32 %v4096_v50, %v4054_v61  ;;  %v7851_v50 = vld [vmem:[%s10931_s0 + $0x678] sm:$0xf0]  ;;  %4550 = vmatpush.bf16.msra.mxu3 %v7993_v58 }
  0xea   :  { %v4098_v52 = vpop.f32.mrf.mxu0  ;;  %v6347_v61 = vor.u32 %v7851_v50, %v6346_v49  ;;  %v7648_v49 = vld [vmem:[%s10931_s0 + $0x24] sm:$0xf] }
  0xec   :  { %v4012_v17 = vpop.f32.mrf.mxu2 }
  0xed   :  { %v4055_v5 = vpop.f32.mrf.mxu3  ;;  %v4013_v21 = vadd.f32 %v4012_v17, %v3970_v62  ;;  %v8924_v17 = vld [vmem:[%s10931_s0 + $0x710] sm:$0x11]  ;;  %4551 = vmatpush.bf16.msra.mxu3 %v7992_v38 }
  0xee   :  { %v3972_v23 = vpop.f32.mrf.mxu1 }
  0xef   :  { %v4056_v25 = vadd.f32 %v4055_v5, %v4013_v21  ;;  %v3973_v26 = vadd.f32 %v3972_v23, %v8683_v11  ;;  %v1579_v21 = vunpack.c.h.b16 %v8626_v44 }
  0xf1   :  { %4148 = vmatmul.bf16.gmra.mxu1 %v6187_v22  ;;  %4191 = vmatmul.bf16.gmra.mxu2 %v6191_v14  ;;  %v8868_v29 = vadd.f32 %v4098_v52, %v4056_v25  ;;  %v1580_v22 = vunpack.c.l.b16 %v275_v6  ;;  %v8001_v25 = vld [vmem:[%s10930_s1 + $0x438] sm:$0xff]  ;;  %v1838_v20 = vpack.c.b16 %v1579_v21, %v1579_v21 }
  0xf2   :  { %4234 = vmatmul.bf16.gmra.mxu3 %v6195_v12  ;;  %v4101_v27 = vpop.f32.mrf.mxu0  ;;  %4593 = vmatpush.bf16.msra.mxu0 %v8001_v25 }
  0xf4   :  { %v4015_v31 = vpop.f32.mrf.mxu2 }
  0xf5   :  { %v4058_v30 = vpop.f32.mrf.mxu3  ;;  %4277 = vmatmul.bf16.gmra.mxu0 %v6199_v24  ;;  %v4016_v11 = vadd.f32 %v4015_v31, %v3973_v26  ;;  %v1582_v24 = vunpack.c.l.b16 %v8924_v17  ;;  %v1839_v31 = vpack.c.b16 %v1580_v22, %v1580_v22 }
  0xf6   :  { %v3974_v34 = vpop.f32.mrf.mxu1 }
  0xf7   :  { %v4059_v35 = vadd.f32 %v4058_v30, %v4016_v11  ;;  %v3975_v36 = vadd.f32 %v3974_v34, %v8698_v19  ;;  %v7831_v19 = vld [vmem:[%s10931_s0 + $0x5dc] sm:$0xf]  ;;  %v1841_v11 = vpack.c.b16 %v1582_v24, %v1582_v24 }
  0xf8   :  { %v6335_v55 = vor.u32 %v7831_v19, %v6332_v45 }
  0xf9   :  { %v8889_v42 = vadd.f32 %v4101_v27, %v4059_v35  ;;  %v1840_v27 = vpack.c.b16 %v1581_v15, %v1581_v15  ;;  %v7975_v15 = vld [vmem:[%s10930_s1 + $0x368] sm:$0xff] }
  0xfa   :  { %v4103_v37 = vpop.f32.mrf.mxu0 }
  0xfc   :  { %v4017_v53 = vpop.f32.mrf.mxu2 }
  0xfd   :  { %v4060_v43 = vpop.f32.mrf.mxu3  ;;  %v4018_v54 = vadd.f32 %v4017_v53, %v3975_v36  ;;  %v7984_v36 = vld [vmem:[%s10930_s1 + $0x3b0] sm:$0xff] }
  0xfe   :  { %v3977_v60 = vpop.f32.mrf.mxu1  ;;  %4508 = vmatpush.bf16.msra.mxu2 %v7984_v36  ;;  %v5770_v36 = vld [vmem:[%s10931_s0 + $0x158] sm:$0xf] }
  0xff   :  { %v4061_v62 = vadd.f32 %v4060_v43, %v4018_v54  ;;  %v3978_v3 = vadd.f32 %v3977_v60, %v8646_v57  ;;  %v7977_v57 = vld [vmem:[%s10930_s1 + $0x378] sm:$0xff]  ;;  %v5614_v54 = vld [vmem:[%s10931_s0 + $0x28] sm:$0xf] }
 0x100   :  { %4464 = vmatpush.bf16.msra.mxu1 %v7977_v57 }
 0x101   :  { %4153 = vmatmul.bf16.gmra.mxu1 %v6335_v55  ;;  %4196 = vmatmul.bf16.gmra.mxu2 %v6339_v56  ;;  %v8909_v0 = vadd.f32 %v4103_v37, %v4061_v62  ;;  %v7667_v55 = vld [vmem:[%s10931_s0 + $0xb8] sm:$0xf0]  ;;  %v8000_v56 = vld [vmem:[%s10930_s1 + $0x430] sm:$0xff] }
 0x102   :  { %4239 = vmatmul.bf16.gmra.mxu3 %v6343_v48  ;;  %v4106_v52 = vpop.f32.mrf.mxu0  ;;  %v5616_v48 = vld [vmem:[%s10931_s0 + $0xbc] sm:$0xf0]  ;;  %v5622_v62 = vld [vmem:[%s10931_s0 + $0x30] sm:$0xf]  ;;  %4594 = vmatpush.bf16.msra.mxu0 %v8000_v56  ;;  %v5615_v58 = vor.u32 %v7667_v55, %v5614_v54 }
 0x103   :  { %v7998_v56 = vld [vmem:[%s10930_s1 + $0x420] sm:$0xff] }
 0x104   :  { %v4020_v5 = vpop.f32.mrf.mxu2  ;;  %4465 = vmatpush.bf16.msra.mxu1 %v7976_v39 }
 0x105   :  { %v4063_v1 = vpop.f32.mrf.mxu3  ;;  %4282 = vmatmul.bf16.gmra.mxu0 %v6347_v61  ;;  %v4021_v9 = vadd.f32 %v4020_v5, %v3978_v3  ;;  %v5619_v61 = vor.u32 %v7649_v47, %v5616_v48  ;;  %v7974_v47 = vld [vmem:[%s10930_s1 + $0x360] sm:$0xff] }
 0x106   :  { %v3979_v10 = vpop.f32.mrf.mxu1 }
 0x107   :  { %v4064_v12 = vadd.f32 %v4063_v1, %v4021_v9  ;;  %v3980_v26 = vadd.f32 %v3979_v10, %v8681_v8  ;;  %v7991_v10 = vld [vmem:[%s10930_s1 + $0x3e8] sm:$0xff] }
 0x108   :  { %4552 = vmatpush.bf16.msra.mxu3 %v7991_v10  ;;  %4466 = vmatpush.bf16.msra.mxu1 %v7975_v15 }
 0x109   :  { %v8930_v14 = vadd.f32 %v4106_v52, %v4064_v12  ;;  %v7668_v52 = vld [vmem:[%s10931_s0 + $0xc0] sm:$0xf0] }
 0x10a   :  { %v4108_v13 = vpop.f32.mrf.mxu0  ;;  %v5623_v5 = vor.u32 %v7668_v52, %v5622_v62  ;;  %v7722_v62 = vld [vmem:[%s10931_s0 + $0x274] sm:$0xf]  ;;  %v5910_v52 = vld [vmem:[%s10931_s0 + $0x278] sm:$0xf] }
 0x10c   :  { %v4022_v28 = vpop.f32.mrf.mxu2  ;;  %4467 = vmatpush.bf16.msra.mxu1 %v7974_v47  ;;  %v7779_v47 = vld [vmem:[%s10931_s0 + $0x438] sm:$0xf0] }
 0x10d   :  { %v4065_v23 = vpop.f32.mrf.mxu3  ;;  %v4023_v30 = vadd.f32 %v4022_v28, %v3980_v26  ;;  %v7999_v26 = vld [vmem:[%s10930_s1 + $0x428] sm:$0xff] }
 0x10e   :  { %v3982_v44 = vpop.f32.mrf.mxu1  ;;  %v5764_v28 = vld [vmem:[%s10931_s0 + $0x1e4] sm:$0xf0]  ;;  %4595 = vmatpush.bf16.msra.mxu0 %v7999_v26 }
 0x10f   :  { %v4066_v34 = vadd.f32 %v4065_v23, %v4023_v30  ;;  %v3983_v40 = vadd.f32 %v3982_v44, %v8696_v18  ;;  %v5608_v18 = vld [vmem:[%s10931_s0 + $0xb4] sm:$0xf0]  ;;  %v5756_v30 = vld [vmem:[%s10931_s0 + $0x1dc] sm:$0xf0]  ;;  %v5762_v44 = vld [vmem:[%s10931_s0 + $0x150] sm:$0xf] }
 0x110   :  { %v5611_v2 = vor.u32 %v7648_v49, %v5608_v18 }
 0x111   :  { %4158 = vmatmul.bf16.gmra.mxu1 %v1838_v20  ;;  %4201 = vmatmul.bf16.gmra.mxu2 %v1839_v31  ;;  %v8940_v37 = vadd.f32 %v4108_v13, %v4066_v34  ;;  %v7982_v34 = vld [vmem:[%s10930_s1 + $0x3a0] sm:$0xff] }
 0x112   :  { %4244 = vmatmul.bf16.gmra.mxu3 %v1840_v27  ;;  %v4111_v35 = vpop.f32.mrf.mxu0  ;;  %v7686_v27 = vld [vmem:[%s10931_s0 + $0x154] sm:$0xf]  ;;  %4596 = vmatpush.bf16.msra.mxu0 %v7998_v56 }
 0x114   :  { %v4025_v41 = vpop.f32.mrf.mxu2 }
 0x115   :  { %v4068_v8 = vpop.f32.mrf.mxu3  ;;  %4287 = vmatmul.bf16.gmra.mxu0 %v1841_v11  ;;  %v4026_v19 = vadd.f32 %v4025_v41, %v3983_v40  ;;  %v7704_v11 = vld [vmem:[%s10931_s0 + $0x1e0] sm:$0xf0] }
 0x116   :  { %v3984_v43 = vpop.f32.mrf.mxu1  ;;  %v5763_v40 = vor.u32 %v7704_v11, %v5762_v44 }
 0x117   :  { %v4069_v45 = vadd.f32 %v4068_v8, %v4026_v19  ;;  %v3985_v60 = vadd.f32 %v3984_v43, %v8732_v32  ;;  %v7983_v32 = vld [vmem:[%s10930_s1 + $0x3a8] sm:$0xff] }
 0x118   :  { %4509 = vmatpush.bf16.msra.mxu2 %v7983_v32  ;;  %v7705_v8 = vld [vmem:[%s10931_s0 + $0x1e8] sm:$0xf0] }
 0x119   :  { %v8961_v50 = vadd.f32 %v4111_v35, %v4069_v45  ;;  %v5767_v35 = vor.u32 %v7686_v27, %v5764_v28  ;;  %v5771_v19 = vor.u32 %v7705_v8, %v5770_v36  ;;  %v7997_v28 = vld [vmem:[%s10930_s1 + $0x418] sm:$0xff] }
 0x11a   :  { %v4113_v46 = vpop.f32.mrf.mxu0  ;;  %4597 = vmatpush.bf16.msra.mxu0 %v7997_v28  ;;  %v6060_v36 = vld [vmem:[%s10931_s0 + $0x434] sm:$0xf0]  ;;  %v7759_v8 = vld [vmem:[%s10931_s0 + $0x39c] sm:$0xf] }
 0x11c   :  { %v4027_v63 = vpop.f32.mrf.mxu2  ;;  %4510 = vmatpush.bf16.msra.mxu2 %v7982_v34  ;;  %v7980_v34 = vld [vmem:[%s10930_s1 + $0x390] sm:$0xff] }
 0x11d   :  { %v4070_v53 = vpop.f32.mrf.mxu3  ;;  %v4028_v1 = vadd.f32 %v4027_v63, %v3985_v60  ;;  %v7723_v60 = vld [vmem:[%s10931_s0 + $0x27c] sm:$0xf] }
 0x11e   :  { %v3987_v3 = vpop.f32.mrf.mxu1 }
 0x11f   :  { %v4071_v6 = vadd.f32 %v4070_v53, %v4028_v1  ;;  %v3988_v57 = vadd.f32 %v3987_v3, %v8650_v59  ;;  %v7685_v59 = vld [vmem:[%s10931_s0 + $0x14c] sm:$0xf]  ;;  %v7989_v3 = vld [vmem:[%s10930_s1 + $0x3d8] sm:$0xff] }
 0x120   :  { %v5759_v39 = vor.u32 %v7685_v59, %v5756_v30 }
 0x121   :  { %4300 = vmatmul.bf16.vlgmr.msrb.gmra.mxu1 %v5611_v2  ;;  %4343 = vmatmul.bf16.vlgmr.msrb.gmra.mxu2 %v5615_v58  ;;  %v8985_v12 = vadd.f32 %v4113_v46, %v4071_v6  ;;  %v7990_v46 = vld [vmem:[%s10930_s1 + $0x3e0] sm:$0xff]  ;;  %v7741_v2 = vld [vmem:[%s10931_s0 + $0x308] sm:$0xf0]  ;;  %v7981_v58 = vld [vmem:[%s10930_s1 + $0x398] sm:$0xff] }
 0x122   :  { %4386 = vmatmul.bf16.vlgmr.msrb.gmra.mxu3 %v5619_v61  ;;  %v4116_v9 = vpop.f32.mrf.mxu0  ;;  %v5912_v61 = vld [vmem:[%s10931_s0 + $0x30c] sm:$0xf0]  ;;  %v5918_v6 = vld [vmem:[%s10931_s0 + $0x280] sm:$0xf]  ;;  %4511 = vmatpush.bf16.msra.mxu2 %v7981_v58  ;;  %v5911_v15 = vor.u32 %v7741_v2, %v5910_v52 }
 0x123   :  { %4553 = vmatpush.bf16.msra.mxu3 %v7990_v46  ;;  %v6066_v46 = vld [vmem:[%s10931_s0 + $0x3a8] sm:$0xf] }
 0x124   :  { %v4030_v21 = vpop.f32.mrf.mxu2 }
 0x125   :  { %v4073_v13 = vpop.f32.mrf.mxu3  ;;  %4429 = vmatmul.bf16.vlgmr.msrb.gmra.mxu0 %v5623_v5  ;;  %v4031_v22 = vadd.f32 %v4030_v21, %v3988_v57  ;;  %v5915_v5 = vor.u32 %v7723_v60, %v5912_v61 }
 0x126   :  { %v3989_v23 = vpop.f32.mrf.mxu1  ;;  %4512 = vmatpush.bf16.msra.mxu2 %v7980_v34 }
 0x127   :  { %v4074_v24 = vadd.f32 %v4073_v13, %v4031_v22  ;;  %4554 = vmatpush.bf16.msra.mxu3 %v7989_v3 }
 0x129   :  { %v9006_v20 = vadd.f32 %v4116_v9, %v4074_v24  ;;  %v7742_v9 = vld [vmem:[%s10931_s0 + $0x310] sm:$0xf0] }
 0x12a   :  { %v4118_v25 = vpop.f32.mrf.mxu0  ;;  %v5919_v21 = vor.u32 %v7742_v9, %v5918_v6  ;;  %v7987_v6 = vld [vmem:[%s10930_s1 + $0x3c8] sm:$0xff] }
 0x12b   :  { %v7973_v25 = vld [vmem:[%s10930_s1 + $0x358] sm:$0xff]  ;;  %v7797_v9 = vld [vmem:[%s10931_s0 + $0x4cc] sm:$0xf] }
 0x12c   :  { %v4032_v38 = vpop.f32.mrf.mxu2  ;;  %4468 = vmatpush.bf16.msra.mxu1 %v7973_v25  ;;  %v7816_v25 = vld [vmem:[%s10931_s0 + $0x560] sm:$0xf0] }
 0x12d   :  { %v4075_v31 = vpop.f32.mrf.mxu3  ;;  %v6058_v38 = vld [vmem:[%s10931_s0 + $0x3a0] sm:$0xf] }
 0x12e   :  { %v4129_v41 = vpop.f32.mrf.mxu1 }
 0x12f   :  { %v4130_v43 = vadd.f32 %v4129_v41, %v8760_v7  ;;  %v7778_v41 = vld [vmem:[%s10931_s0 + $0x430] sm:$0xf0] }
 0x131   :  { %4305 = vmatmul.bf16.gmra.mxu1 %v5759_v39  ;;  %4348 = vmatmul.bf16.gmra.mxu2 %v5763_v40 }
 0x132   :  { %4391 = vmatmul.bf16.gmra.mxu3 %v5767_v35  ;;  %v4258_v45 = vpop.f32.mrf.mxu0  ;;  %v7760_v35 = vld [vmem:[%s10931_s0 + $0x3a4] sm:$0xf] }
 0x134   :  { %v4172_v49 = vpop.f32.mrf.mxu2 }
 0x135   :  { %v4215_v48 = vpop.f32.mrf.mxu3  ;;  %4434 = vmatmul.bf16.gmra.mxu0 %v5771_v19  ;;  %v4173_v18 = vadd.f32 %v4172_v49, %v4130_v43  ;;  %v7988_v19 = vld [vmem:[%s10930_s1 + $0x3d0] sm:$0xff] }
 0x136   :  { %v4131_v53 = vpop.f32.mrf.mxu1  ;;  %v7972_v43 = vld [vmem:[%s10930_s1 + $0x350] sm:$0xff]  ;;  %4555 = vmatpush.bf16.msra.mxu3 %v7988_v19 }
 0x137   :  { %v4216_v7 = vadd.f32 %v4215_v48, %v4173_v18  ;;  %v4132_v54 = vadd.f32 %v4131_v53, %v8781_v16  ;;  %v5904_v16 = vld [vmem:[%s10931_s0 + $0x304] sm:$0xf0]  ;;  %4469 = vmatpush.bf16.msra.mxu1 %v7972_v43  ;;  %v6059_v53 = vor.u32 %v7778_v41, %v6058_v38 }
 0x138   :  { %v5907_v13 = vor.u32 %v7722_v62, %v5904_v16  ;;  %v7996_v16 = vld [vmem:[%s10930_s1 + $0x410] sm:$0xff] }
 0x139   :  { %v9049_v63 = vadd.f32 %v4258_v45, %v4216_v7  ;;  %v6063_v45 = vor.u32 %v7760_v35, %v6060_v36  ;;  %4598 = vmatpush.bf16.msra.mxu0 %v7996_v16  ;;  %v7995_v35 = vld [vmem:[%s10930_s1 + $0x408] sm:$0xff] }
 0x13a   :  { %v4260_v55 = vpop.f32.mrf.mxu0  ;;  %4556 = vmatpush.bf16.msra.mxu3 %v7987_v6  ;;  %v7994_v6 = vld [vmem:[%s10930_s1 + $0x400] sm:$0xff] }
 0x13c   :  { %v4174_v32 = vpop.f32.mrf.mxu2 }
 0x13d   :  { %v4217_v1 = vpop.f32.mrf.mxu3  ;;  %v4175_v10 = vadd.f32 %v4174_v32, %v4132_v54  ;;  %v6067_v54 = vor.u32 %v7779_v47, %v6066_v46  ;;  %v6208_v32 = vld [vmem:[%s10931_s0 + $0x55c] sm:$0xf0]  ;;  %4599 = vmatpush.bf16.msra.mxu0 %v7995_v35  ;;  %v7834_v47 = vld [vmem:[%s10931_s0 + $0x5f4] sm:$0xf] }
 0x13e   :  { %v4134_v57 = vpop.f32.mrf.mxu1  ;;  %v7970_v46 = vld [vmem:[%s10930_s1 + $0x340] sm:$0xff] }
 0x13f   :  { %v4218_v22 = vadd.f32 %v4217_v1, %v4175_v10  ;;  %v4135_v23 = vadd.f32 %v4134_v57, %v8805_v33  ;;  %v6200_v10 = vld [vmem:[%s10931_s0 + $0x554] sm:$0xf0]  ;;  %v6206_v57 = vld [vmem:[%s10931_s0 + $0x4c8] sm:$0xf] }
 0x141   :  { %4310 = vmatmul.bf16.gmra.mxu1 %v5907_v13  ;;  %4353 = vmatmul.bf16.gmra.mxu2 %v5911_v15  ;;  %v9070_v26 = vadd.f32 %v4260_v55, %v4218_v22  ;;  %v7971_v22 = vld [vmem:[%s10930_s1 + $0x348] sm:$0xff] }
 0x142   :  { %4396 = vmatmul.bf16.gmra.mxu3 %v5915_v5  ;;  %v4263_v24 = vpop.f32.mrf.mxu0  ;;  %v7979_v5 = vld [vmem:[%s10930_s1 + $0x388] sm:$0xff]  ;;  %4470 = vmatpush.bf16.msra.mxu1 %v7971_v22 }
 0x143   :  { %4513 = vmatpush.bf16.msra.mxu2 %v7979_v5  ;;  %4600 = vmatpush.bf16.msra.mxu0 %v7994_v6 }
 0x144   :  { %v4177_v59 = vpop.f32.mrf.mxu2 }
 0x145   :  { %v4220_v27 = vpop.f32.mrf.mxu3  ;;  %4439 = vmatmul.bf16.gmra.mxu0 %v5919_v21  ;;  %v4178_v33 = vadd.f32 %v4177_v59, %v4135_v23  ;;  %v7815_v21 = vld [vmem:[%s10931_s0 + $0x558] sm:$0xf0]  ;;  %v6211_v23 = vor.u32 %v7797_v9, %v6208_v32 }
 0x146   :  { %v4136_v30 = vpop.f32.mrf.mxu1  ;;  %4471 = vmatpush.bf16.msra.mxu1 %v7970_v46  ;;  %v8024_v46 = vld [vmem:[%s10930_s1 + $0x4f0] sm:$0xff] }
 0x147   :  { %v4221_v31 = vadd.f32 %v4220_v27, %v4178_v33  ;;  %v4137_v44 = vadd.f32 %v4136_v30, %v8823_v51  ;;  %v6052_v51 = vld [vmem:[%s10931_s0 + $0x42c] sm:$0xf0]  ;;  %v6207_v33 = vor.u32 %v7815_v21, %v6206_v57 }
 0x148   :  { %v6055_v18 = vor.u32 %v7759_v8, %v6052_v51  ;;  %v7978_v51 = vld [vmem:[%s10930_s1 + $0x380] sm:$0xff] }
 0x149   :  { %v9094_v39 = vadd.f32 %v4263_v24, %v4221_v31  ;;  %v6214_v24 = vld [vmem:[%s10931_s0 + $0x4d0] sm:$0xf]  ;;  %4514 = vmatpush.bf16.msra.mxu2 %v7978_v51 }
 0x14a   :  { %v4265_v11 = vpop.f32.mrf.mxu0  ;;  %v6215_v31 = vor.u32 %v7816_v25, %v6214_v24 }
 0x14c   :  { %v4179_v48 = vpop.f32.mrf.mxu2 }
 0x14d   :  { %v4222_v40 = vpop.f32.mrf.mxu3  ;;  %v4180_v49 = vadd.f32 %v4179_v48, %v4137_v44  ;;  %v6356_v48 = vld [vmem:[%s10931_s0 + $0x684] sm:$0xf0] }
 0x14e   :  { %v4139_v7 = vpop.f32.mrf.mxu1 }
 0x14f   :  { %v4223_v55 = vadd.f32 %v4222_v40, %v4180_v49  ;;  %v4140_v56 = vadd.f32 %v4139_v7, %v8847_v4  ;;  %v6354_v7 = vld [vmem:[%s10931_s0 + $0x5f0] sm:$0xf] }
 0x151   :  { %4315 = vmatmul.bf16.gmra.mxu1 %v6055_v18  ;;  %4358 = vmatmul.bf16.gmra.mxu2 %v6059_v53  ;;  %v9112_v61 = vadd.f32 %v4265_v11, %v4223_v55  ;;  %v6348_v53 = vld [vmem:[%s10931_s0 + $0x67c] sm:$0xf0]  ;;  %v6359_v55 = vor.u32 %v7834_v47, %v6356_v48 }
 0x152   :  { %4401 = vmatmul.bf16.gmra.mxu3 %v6063_v45  ;;  %v4268_v60 = vpop.f32.mrf.mxu0  ;;  %v7986_v45 = vld [vmem:[%s10930_s1 + $0x3c0] sm:$0xff] }
 0x153   :  { %4557 = vmatpush.bf16.msra.mxu3 %v7986_v45 }
 0x154   :  { %v4182_v52 = vpop.f32.mrf.mxu2 }
 0x155   :  { %v4225_v62 = vpop.f32.mrf.mxu3  ;;  %4444 = vmatmul.bf16.gmra.mxu0 %v6067_v54  ;;  %v4183_v1 = vadd.f32 %v4182_v52, %v4140_v56  ;;  %v7852_v54 = vld [vmem:[%s10931_s0 + $0x680] sm:$0xf0]  ;;  %v6362_v56 = vld [vmem:[%s10931_s0 + $0x5f8] sm:$0xf] }
 0x156   :  { %v4141_v2 = vpop.f32.mrf.mxu1 }
 0x157   :  { %v4226_v58 = vadd.f32 %v4225_v62, %v4183_v1  ;;  %v4142_v3 = vadd.f32 %v4141_v2, %v8868_v29  ;;  %v7796_v29 = vld [vmem:[%s10931_s0 + $0x4c4] sm:$0xf]  ;;  %v6355_v1 = vor.u32 %v7852_v54, %v6354_v7  ;;  %v7651_v54 = vld [vmem:[%s10931_s0 + $0x3c] sm:$0xf] }
 0x158   :  { %v6203_v59 = vor.u32 %v7796_v29, %v6200_v10  ;;  %v8017_v29 = vld [vmem:[%s10930_s1 + $0x4b8] sm:$0xff] }
 0x159   :  { %v9136_v13 = vadd.f32 %v4268_v60, %v4226_v58  ;;  %v7853_v60 = vld [vmem:[%s10931_s0 + $0x688] sm:$0xf0]  ;;  %4679 = vmatpush.bf16.msrb.mxu2 %v8017_v29 }
 0x15a   :  { %v4270_v4 = vpop.f32.mrf.mxu0  ;;  %v6363_v58 = vor.u32 %v7853_v60, %v6362_v56  ;;  %v7650_v56 = vld [vmem:[%s10931_s0 + $0x34] sm:$0xf]  ;;  %v5624_v60 = vld [vmem:[%s10931_s0 + $0xc4] sm:$0xf0] }
 0x15b   :  { %v5627_v6 = vor.u32 %v7650_v56, %v5624_v60 }
 0x15c   :  { %v4184_v27 = vpop.f32.mrf.mxu2 }
 0x15d   :  { %v4227_v15 = vpop.f32.mrf.mxu3  ;;  %v4185_v28 = vadd.f32 %v4184_v27, %v4142_v3  ;;  %v9214_v27 = vld [vmem:[%s10931_s0 + $0x720] sm:$0x11] }
 0x15e   :  { %v4144_v30 = vpop.f32.mrf.mxu1 }
 0x15f   :  { %v4228_v44 = vadd.f32 %v4227_v15, %v4185_v28  ;;  %v4145_v11 = vadd.f32 %v4144_v30, %v8889_v42  ;;  %v277_v15 = vld [vmem:[%s10931_s0 + $0x718] sm:$0x11] }
 0x160   :  { %v1585_v25 = vunpack.c.h.b16 %v277_v15  ;;  %v8009_v28 = vld [vmem:[%s10930_s1 + $0x478] sm:$0xff] }
 0x161   :  { %4320 = vmatmul.bf16.gmra.mxu1 %v6203_v59  ;;  %4363 = vmatmul.bf16.gmra.mxu2 %v6207_v33  ;;  %v9157_v36 = vadd.f32 %v4270_v4, %v4228_v44  ;;  %v1583_v59 = vunpack.c.h.b16 %v8924_v17  ;;  %v1584_v33 = vunpack.c.l.b16 %v277_v15  ;;  %v8033_v44 = vld [vmem:[%s10930_s1 + $0x538] sm:$0xff] }
 0x162   :  { %4406 = vmatmul.bf16.gmra.mxu3 %v6211_v23  ;;  %v4273_v34 = vpop.f32.mrf.mxu0  ;;  %4636 = vmatpush.bf16.msrb.mxu1 %v8009_v28 }
 0x163   :  { %4765 = vmatpush.bf16.msrb.mxu0 %v8033_v44  ;;  %v1843_v51 = vpack.c.b16 %v1584_v33, %v1584_v33  ;;  %v7688_v44 = vld [vmem:[%s10931_s0 + $0x164] sm:$0xf] }
 0x164   :  { %v4187_v38 = vpop.f32.mrf.mxu2 }
 0x165   :  { %v4230_v8 = vpop.f32.mrf.mxu3  ;;  %4449 = vmatmul.bf16.gmra.mxu0 %v6215_v31  ;;  %v4188_v42 = vadd.f32 %v4187_v38, %v4145_v11  ;;  %v1844_v11 = vpack.c.b16 %v1585_v25, %v1585_v25 }
 0x166   :  { %v4146_v40 = vpop.f32.mrf.mxu1 }
 0x167   :  { %v4231_v41 = vadd.f32 %v4230_v8, %v4188_v42  ;;  %v4147_v19 = vadd.f32 %v4146_v40, %v8909_v0  ;;  %v7833_v0 = vld [vmem:[%s10931_s0 + $0x5ec] sm:$0xf]  ;;  %v1842_v8 = vpack.c.b16 %v1583_v59, %v1583_v59 }
 0x168   :  { %v6351_v52 = vor.u32 %v7833_v0, %v6348_v53 }
 0x169   :  { %v9178_v49 = vadd.f32 %v4273_v34, %v4231_v41 }
 0x16a   :  { %v4275_v43 = vpop.f32.mrf.mxu0 }
 0x16c   :  { %v4189_v62 = vpop.f32.mrf.mxu2 }
 0x16d   :  { %v4232_v18 = vpop.f32.mrf.mxu3  ;;  %v4190_v16 = vadd.f32 %v4189_v62, %v4147_v19  ;;  %v8016_v19 = vld [vmem:[%s10930_s1 + $0x4b0] sm:$0xff] }
 0x16e   :  { %v4149_v2 = vpop.f32.mrf.mxu1  ;;  %4680 = vmatpush.bf16.msrb.mxu2 %v8016_v19  ;;  %v7707_v19 = vld [vmem:[%s10931_s0 + $0x1f8] sm:$0xf0] }
 0x16f   :  { %v4233_v3 = vadd.f32 %v4232_v18, %v4190_v16  ;;  %v4150_v4 = vadd.f32 %v4149_v2, %v8930_v14  ;;  %v8025_v14 = vld [vmem:[%s10930_s1 + $0x4f8] sm:$0xff] }
 0x170   :  { %4722 = vmatpush.bf16.msrb.mxu3 %v8025_v14  ;;  %v5630_v16 = vld [vmem:[%s10931_s0 + $0x38] sm:$0xf] }
 0x171   :  { %4325 = vmatmul.bf16.gmra.mxu1 %v6351_v52  ;;  %4368 = vmatmul.bf16.gmra.mxu2 %v6355_v1  ;;  %v9199_v9 = vadd.f32 %v4275_v43, %v4233_v3  ;;  %v7669_v52 = vld [vmem:[%s10931_s0 + $0xc8] sm:$0xf0]  ;;  %v8032_v1 = vld [vmem:[%s10930_s1 + $0x530] sm:$0xff] }
 0x172   :  { %4411 = vmatmul.bf16.gmra.mxu3 %v6359_v55  ;;  %v4278_v5 = vpop.f32.mrf.mxu0  ;;  %v5632_v55 = vld [vmem:[%s10931_s0 + $0xcc] sm:$0xf0]  ;;  %v7670_v3 = vld [vmem:[%s10931_s0 + $0xd0] sm:$0xf0]  ;;  %4766 = vmatpush.bf16.msrb.mxu0 %v8032_v1  ;;  %v7725_v1 = vld [vmem:[%s10931_s0 + $0x28c] sm:$0xf] }
 0x173   :  { %v5635_v2 = vor.u32 %v7651_v54, %v5632_v55 }
 0x174   :  { %v4192_v10 = vpop.f32.mrf.mxu2  ;;  %4723 = vmatpush.bf16.msrb.mxu3 %v8024_v46 }
 0x175   :  { %v4235_v32 = vpop.f32.mrf.mxu3  ;;  %4454 = vmatmul.bf16.gmra.mxu0 %v6363_v58  ;;  %v4193_v57 = vadd.f32 %v4192_v10, %v4150_v4  ;;  %v5638_v58 = vld [vmem:[%s10931_s0 + $0x40] sm:$0xf] }
 0x176   :  { %v4151_v21 = vpop.f32.mrf.mxu1  ;;  %v5639_v14 = vor.u32 %v7670_v3, %v5638_v58  ;;  %v7724_v58 = vld [vmem:[%s10931_s0 + $0x284] sm:$0xf]  ;;  %v5926_v3 = vld [vmem:[%s10931_s0 + $0x288] sm:$0xf] }
 0x177   :  { %v4236_v22 = vadd.f32 %v4235_v32, %v4193_v57  ;;  %v4152_v23 = vadd.f32 %v4151_v21, %v8940_v37  ;;  %v1586_v37 = vunpack.c.l.b16 %v9214_v27  ;;  %v5631_v32 = vor.u32 %v7669_v52, %v5630_v16  ;;  %v8015_v21 = vld [vmem:[%s10930_s1 + $0x4a8] sm:$0xff]  ;;  %v8030_v52 = vld [vmem:[%s10930_s1 + $0x520] sm:$0xff] }
 0x178   :  { %4681 = vmatpush.bf16.msrb.mxu2 %v8015_v21 }
 0x179   :  { %v9220_v30 = vadd.f32 %v4278_v5, %v4236_v22  ;;  %v1845_v42 = vpack.c.b16 %v1586_v37, %v1586_v37  ;;  %v8023_v22 = vld [vmem:[%s10930_s1 + $0x4e8] sm:$0xff] }
 0x17a   :  { %v4280_v24 = vpop.f32.mrf.mxu0  ;;  %4724 = vmatpush.bf16.msrb.mxu3 %v8023_v22  ;;  %v8031_v37 = vld [vmem:[%s10930_s1 + $0x528] sm:$0xff] }
 0x17b   :  { %4767 = vmatpush.bf16.msrb.mxu0 %v8031_v37 }
 0x17c   :  { %v4194_v34 = vpop.f32.mrf.mxu2 }
 0x17d   :  { %v4237_v31 = vpop.f32.mrf.mxu3  ;;  %v4195_v35 = vadd.f32 %v4194_v34, %v4152_v23  ;;  %v7687_v34 = vld [vmem:[%s10931_s0 + $0x15c] sm:$0xf] }
 0x17e   :  { %v4154_v38 = vpop.f32.mrf.mxu1 }
 0x17f   :  { %v4238_v17 = vadd.f32 %v4237_v31, %v4195_v35  ;;  %v4155_v40 = vadd.f32 %v4154_v38, %v8961_v50  ;;  %v8008_v50 = vld [vmem:[%s10930_s1 + $0x470] sm:$0xff]  ;;  %v5778_v38 = vld [vmem:[%s10931_s0 + $0x160] sm:$0xf]  ;;  %4768 = vmatpush.bf16.msrb.mxu0 %v8030_v52 }
 0x180   :  { %4637 = vmatpush.bf16.msrb.mxu1 %v8008_v50  ;;  %v5772_v35 = vld [vmem:[%s10931_s0 + $0x1ec] sm:$0xf0] }
 0x181   :  { %4330 = vmatmul.bf16.gmra.mxu1 %v1842_v8  ;;  %4373 = vmatmul.bf16.gmra.mxu2 %v1843_v51  ;;  %v9230_v43 = vadd.f32 %v4280_v24, %v4238_v17  ;;  %v8014_v17 = vld [vmem:[%s10930_s1 + $0x4a0] sm:$0xff]  ;;  %v5775_v46 = vor.u32 %v7687_v34, %v5772_v35 }
 0x182   :  { %4416 = vmatmul.bf16.gmra.mxu3 %v1844_v11  ;;  %v4283_v41 = vpop.f32.mrf.mxu0  ;;  %v5780_v11 = vld [vmem:[%s10931_s0 + $0x1f4] sm:$0xf0]  ;;  %4682 = vmatpush.bf16.msrb.mxu2 %v8014_v17  ;;  %v8012_v17 = vld [vmem:[%s10930_s1 + $0x490] sm:$0xff] }
 0x184   :  { %v4197_v47 = vpop.f32.mrf.mxu2 }
 0x185   :  { %v4240_v45 = vpop.f32.mrf.mxu3  ;;  %4459 = vmatmul.bf16.gmra.mxu0 %v1845_v42  ;;  %v4198_v48 = vadd.f32 %v4197_v47, %v4155_v40  ;;  %v7706_v42 = vld [vmem:[%s10931_s0 + $0x1f0] sm:$0xf0]  ;;  %v5783_v40 = vor.u32 %v7688_v44, %v5780_v11  ;;  %v8029_v11 = vld [vmem:[%s10930_s1 + $0x518] sm:$0xff] }
 0x186   :  { %v4156_v0 = vpop.f32.mrf.mxu1  ;;  %v5779_v50 = vor.u32 %v7706_v42, %v5778_v38  ;;  %4769 = vmatpush.bf16.msrb.mxu0 %v8029_v11 }
 0x187   :  { %v4241_v18 = vadd.f32 %v4240_v45, %v4198_v48  ;;  %v4157_v53 = vadd.f32 %v4156_v0, %v8985_v12 }
 0x189   :  { %v9251_v62 = vadd.f32 %v4283_v41, %v4241_v18  ;;  %v5786_v41 = vld [vmem:[%s10931_s0 + $0x168] sm:$0xf] }
 0x18a   :  { %v4285_v7 = vpop.f32.mrf.mxu0  ;;  %v5787_v48 = vor.u32 %v7707_v19, %v5786_v41  ;;  %v6076_v41 = vld [vmem:[%s10931_s0 + $0x444] sm:$0xf0]  ;;  %v7761_v19 = vld [vmem:[%s10931_s0 + $0x3ac] sm:$0xf] }
 0x18c   :  { %v4199_v4 = vpop.f32.mrf.mxu2 }
 0x18d   :  { %v4242_v12 = vpop.f32.mrf.mxu3  ;;  %v4200_v5 = vadd.f32 %v4199_v4, %v4157_v53  ;;  %v8022_v53 = vld [vmem:[%s10930_s1 + $0x4e0] sm:$0xff] }
 0x18e   :  { %v4159_v29 = vpop.f32.mrf.mxu1  ;;  %4725 = vmatpush.bf16.msrb.mxu3 %v8022_v53  ;;  %v6082_v53 = vld [vmem:[%s10931_s0 + $0x3b8] sm:$0xf] }
 0x18f   :  { %v4243_v10 = vadd.f32 %v4242_v12, %v4200_v5  ;;  %v4160_v15 = vadd.f32 %v4159_v29, %v9006_v20  ;;  %v8007_v20 = vld [vmem:[%s10930_s1 + $0x468] sm:$0xff]  ;;  %v8021_v29 = vld [vmem:[%s10930_s1 + $0x4d8] sm:$0xff] }
 0x190   :  { %4638 = vmatpush.bf16.msrb.mxu1 %v8007_v20 }
 0x191   :  { %4472 = vmatmul.bf16.vlgmr.msra.gmra.mxu1 %v5627_v6  ;;  %4515 = vmatmul.bf16.vlgmr.msra.gmra.mxu2 %v5631_v32  ;;  %v9275_v23 = vadd.f32 %v4285_v7, %v4243_v10  ;;  %v8006_v7 = vld [vmem:[%s10930_s1 + $0x460] sm:$0xff]  ;;  %v7743_v6 = vld [vmem:[%s10931_s0 + $0x318] sm:$0xf0]  ;;  %v5934_v10 = vld [vmem:[%s10931_s0 + $0x290] sm:$0xf] }
 0x192   :  { %4558 = vmatmul.bf16.vlgmr.msra.gmra.mxu3 %v5635_v2  ;;  %v4288_v57 = vpop.f32.mrf.mxu0  ;;  %v5928_v2 = vld [vmem:[%s10931_s0 + $0x31c] sm:$0xf0]  ;;  %v8013_v32 = vld [vmem:[%s10930_s1 + $0x498] sm:$0xff] }
 0x193   :  { %4683 = vmatpush.bf16.msrb.mxu2 %v8013_v32  ;;  %4726 = vmatpush.bf16.msrb.mxu3 %v8021_v29 }
 0x194   :  { %v4202_v25 = vpop.f32.mrf.mxu2  ;;  %4639 = vmatpush.bf16.msrb.mxu1 %v8006_v7  ;;  %v7781_v7 = vld [vmem:[%s10931_s0 + $0x448] sm:$0xf0] }
 0x195   :  { %v4245_v24 = vpop.f32.mrf.mxu3  ;;  %4601 = vmatmul.bf16.vlgmr.msra.gmra.mxu0 %v5639_v14  ;;  %v4203_v28 = vadd.f32 %v4202_v25, %v4160_v15  ;;  %v5931_v14 = vor.u32 %v7725_v1, %v5928_v2  ;;  %v7744_v15 = vld [vmem:[%s10931_s0 + $0x320] sm:$0xf0] }
 0x196   :  { %v4161_v59 = vpop.f32.mrf.mxu1  ;;  %v5935_v25 = vor.u32 %v7744_v15, %v5934_v10  ;;  %v8019_v10 = vld [vmem:[%s10930_s1 + $0x4c8] sm:$0xff]  ;;  %v7799_v15 = vld [vmem:[%s10931_s0 + $0x4dc] sm:$0xf] }
 0x197   :  { %v4246_v33 = vadd.f32 %v4245_v24, %v4203_v28  ;;  %v5927_v24 = vor.u32 %v7743_v6, %v5926_v3  ;;  %4684 = vmatpush.bf16.msrb.mxu2 %v8012_v17 }
 0x199   :  { %v9295_v8 = vadd.f32 %v4288_v57, %v4246_v33 }
 0x19a   :  { %v4290_v31 = vpop.f32.mrf.mxu0 }
 0x19b   :  { %v8005_v31 = vld [vmem:[%s10930_s1 + $0x458] sm:$0xff] }
 0x19c   :  { %v4204_v45 = vpop.f32.mrf.mxu2  ;;  %4640 = vmatpush.bf16.msrb.mxu1 %v8005_v31  ;;  %v7818_v31 = vld [vmem:[%s10931_s0 + $0x570] sm:$0xf0] }
 0x19d   :  { %v4247_v51 = vpop.f32.mrf.mxu3  ;;  %v6074_v45 = vld [vmem:[%s10931_s0 + $0x3b0] sm:$0xf] }
 0x19e   :  { %v4301_v47 = vpop.f32.mrf.mxu1 }
 0x19f   :  { %v4302_v0 = vadd.f32 %v4301_v47, %v9049_v63  ;;  %v7780_v47 = vld [vmem:[%s10931_s0 + $0x440] sm:$0xf0] }
 0x1a1   :  { %4477 = vmatmul.bf16.gmra.mxu1 %v5775_v46  ;;  %4520 = vmatmul.bf16.gmra.mxu2 %v5779_v50 }
 0x1a2   :  { %4563 = vmatmul.bf16.gmra.mxu3 %v5783_v40  ;;  %v4430_v18 = vpop.f32.mrf.mxu0  ;;  %v7762_v40 = vld [vmem:[%s10931_s0 + $0x3b4] sm:$0xf] }
 0x1a4   :  { %v4344_v55 = vpop.f32.mrf.mxu2 }
 0x1a5   :  { %v4387_v54 = vpop.f32.mrf.mxu3  ;;  %4606 = vmatmul.bf16.gmra.mxu0 %v5787_v48  ;;  %v4345_v56 = vadd.f32 %v4344_v55, %v4302_v0  ;;  %v8020_v48 = vld [vmem:[%s10930_s1 + $0x4d0] sm:$0xff] }
 0x1a6   :  { %v4303_v60 = vpop.f32.mrf.mxu1  ;;  %v8004_v0 = vld [vmem:[%s10930_s1 + $0x450] sm:$0xff]  ;;  %4727 = vmatpush.bf16.msrb.mxu3 %v8020_v48 }
 0x1a7   :  { %v4388_v63 = vadd.f32 %v4387_v54, %v4345_v56  ;;  %v4304_v12 = vadd.f32 %v4303_v60, %v9070_v26  ;;  %v5920_v26 = vld [vmem:[%s10931_s0 + $0x314] sm:$0xf0]  ;;  %4641 = vmatpush.bf16.msrb.mxu1 %v8004_v0  ;;  %v6075_v60 = vor.u32 %v7780_v47, %v6074_v45 }
 0x1a8   :  { %v5923_v22 = vor.u32 %v7724_v58, %v5920_v26  ;;  %v8028_v26 = vld [vmem:[%s10930_s1 + $0x510] sm:$0xff] }
 0x1a9   :  { %v9338_v4 = vadd.f32 %v4430_v18, %v4388_v63  ;;  %v6079_v18 = vor.u32 %v7762_v40, %v6076_v41  ;;  %4770 = vmatpush.bf16.msrb.mxu0 %v8028_v26  ;;  %v8027_v40 = vld [vmem:[%s10930_s1 + $0x508] sm:$0xff] }
 0x1aa   :  { %v4432_v16 = vpop.f32.mrf.mxu0  ;;  %4728 = vmatpush.bf16.msrb.mxu3 %v8019_v10  ;;  %v8026_v10 = vld [vmem:[%s10930_s1 + $0x500] sm:$0xff] }
 0x1ac   :  { %v4346_v57 = vpop.f32.mrf.mxu2 }
 0x1ad   :  { %v4389_v5 = vpop.f32.mrf.mxu3  ;;  %v4347_v21 = vadd.f32 %v4346_v57, %v4304_v12  ;;  %v6083_v12 = vor.u32 %v7781_v7, %v6082_v53  ;;  %v6224_v57 = vld [vmem:[%s10931_s0 + $0x56c] sm:$0xf0]  ;;  %4771 = vmatpush.bf16.msrb.mxu0 %v8027_v40  ;;  %v8002_v53 = vld [vmem:[%s10930_s1 + $0x440] sm:$0xff] }
 0x1ae   :  { %v4306_v20 = vpop.f32.mrf.mxu1  ;;  %v7836_v7 = vld [vmem:[%s10931_s0 + $0x604] sm:$0xf] }
 0x1af   :  { %v4390_v28 = vadd.f32 %v4389_v5, %v4347_v21  ;;  %v4307_v59 = vadd.f32 %v4306_v20, %v9094_v39  ;;  %v6216_v21 = vld [vmem:[%s10931_s0 + $0x564] sm:$0xf0]  ;;  %v6222_v20 = vld [vmem:[%s10931_s0 + $0x4d8] sm:$0xf] }
 0x1b1   :  { %4482 = vmatmul.bf16.gmra.mxu1 %v5923_v22  ;;  %4525 = vmatmul.bf16.gmra.mxu2 %v5927_v24  ;;  %v9359_v37 = vadd.f32 %v4432_v16, %v4390_v28  ;;  %v8003_v28 = vld [vmem:[%s10930_s1 + $0x448] sm:$0xff] }
 0x1b2   :  { %4568 = vmatmul.bf16.gmra.mxu3 %v5931_v14  ;;  %v4435_v33 = vpop.f32.mrf.mxu0  ;;  %v8011_v14 = vld [vmem:[%s10930_s1 + $0x488] sm:$0xff]  ;;  %4642 = vmatpush.bf16.msrb.mxu1 %v8003_v28 }
 0x1b3   :  { %4685 = vmatpush.bf16.msrb.mxu2 %v8011_v14  ;;  %4772 = vmatpush.bf16.msrb.mxu0 %v8026_v10 }
 0x1b4   :  { %v4349_v34 = vpop.f32.mrf.mxu2 }
 0x1b5   :  { %v4392_v44 = vpop.f32.mrf.mxu3  ;;  %4611 = vmatmul.bf16.gmra.mxu0 %v5935_v25  ;;  %v4350_v39 = vadd.f32 %v4349_v34, %v4307_v59  ;;  %v7817_v25 = vld [vmem:[%s10931_s0 + $0x568] sm:$0xf0]  ;;  %v6227_v59 = vor.u32 %v7799_v15, %v6224_v57 }
 0x1b6   :  { %v4308_v35 = vpop.f32.mrf.mxu1  ;;  %4643 = vmatpush.bf16.msrb.mxu1 %v8002_v53  ;;  %v8056_v53 = vld [vmem:[%s10930_s1 + $0x5f0] sm:$0xff] }
 0x1b7   :  { %v4393_v51 = vadd.f32 %v4392_v44, %v4350_v39  ;;  %v4309_v38 = vadd.f32 %v4308_v35, %v9112_v61  ;;  %v6068_v61 = vld [vmem:[%s10931_s0 + $0x43c] sm:$0xf0]  ;;  %v6223_v39 = vor.u32 %v7817_v25, %v6222_v20 }
 0x1b8   :  { %v6071_v56 = vor.u32 %v7761_v19, %v6068_v61  ;;  %v8010_v61 = vld [vmem:[%s10930_s1 + $0x480] sm:$0xff] }
 0x1b9   :  { %v9383_v46 = vadd.f32 %v4435_v33, %v4393_v51  ;;  %v6230_v33 = vld [vmem:[%s10931_s0 + $0x4e0] sm:$0xf]  ;;  %4686 = vmatpush.bf16.msrb.mxu2 %v8010_v61 }
 0x1ba   :  { %v4437_v42 = vpop.f32.mrf.mxu0  ;;  %v6231_v51 = vor.u32 %v7818_v31, %v6230_v33 }
 0x1bc   :  { %v4351_v54 = vpop.f32.mrf.mxu2 }
 0x1bd   :  { %v4394_v50 = vpop.f32.mrf.mxu3  ;;  %v4352_v55 = vadd.f32 %v4351_v54, %v4309_v38  ;;  %v6372_v54 = vld [vmem:[%s10931_s0 + $0x694] sm:$0xf0] }
 0x1be   :  { %v4311_v63 = vpop.f32.mrf.mxu1 }
 0x1bf   :  { %v4395_v16 = vadd.f32 %v4394_v50, %v4352_v55  ;;  %v4312_v52 = vadd.f32 %v4311_v63, %v9136_v13  ;;  %v6370_v63 = vld [vmem:[%s10931_s0 + $0x600] sm:$0xf] }
 0x1c1   :  { %4487 = vmatmul.bf16.gmra.mxu1 %v6071_v56  ;;  %4530 = vmatmul.bf16.gmra.mxu2 %v6075_v60  ;;  %v9401_v2 = vadd.f32 %v4437_v42, %v4395_v16  ;;  %v6364_v60 = vld [vmem:[%s10931_s0 + $0x68c] sm:$0xf0]  ;;  %v6375_v16 = vor.u32 %v7836_v7, %v6372_v54 }
 0x1c2   :  { %4573 = vmatmul.bf16.gmra.mxu3 %v6079_v18  ;;  %v4440_v1 = vpop.f32.mrf.mxu0  ;;  %v8018_v18 = vld [vmem:[%s10930_s1 + $0x4c0] sm:$0xff] }
 0x1c3   :  { %4729 = vmatpush.bf16.msrb.mxu3 %v8018_v18 }
 0x1c4   :  { %v4354_v3 = vpop.f32.mrf.mxu2 }
 0x1c5   :  { %v4397_v58 = vpop.f32.mrf.mxu3  ;;  %4616 = vmatmul.bf16.gmra.mxu0 %v6083_v12  ;;  %v4355_v5 = vadd.f32 %v4354_v3, %v4312_v52  ;;  %v7854_v12 = vld [vmem:[%s10931_s0 + $0x690] sm:$0xf0]  ;;  %v6378_v52 = vld [vmem:[%s10931_s0 + $0x608] sm:$0xf] }
 0x1c6   :  { %v4313_v6 = vpop.f32.mrf.mxu1 }
 0x1c7   :  { %v4398_v32 = vadd.f32 %v4397_v58, %v4355_v5  ;;  %v4314_v29 = vadd.f32 %v4313_v6, %v9157_v36  ;;  %v7798_v36 = vld [vmem:[%s10931_s0 + $0x4d4] sm:$0xf]  ;;  %v6371_v5 = vor.u32 %v7854_v12, %v6370_v63  ;;  %v7653_v12 = vld [vmem:[%s10931_s0 + $0x4c] sm:$0xf] }
 0x1c8   :  { %v6219_v34 = vor.u32 %v7798_v36, %v6216_v21  ;;  %v8049_v36 = vld [vmem:[%s10930_s1 + $0x5b8] sm:$0xff] }
 0x1c9   :  { %v9425_v22 = vadd.f32 %v4440_v1, %v4398_v32  ;;  %v7855_v1 = vld [vmem:[%s10931_s0 + $0x698] sm:$0xf0]  ;;  %4851 = vmatpush.bf16.msra.mxu2 %v8049_v36 }
 0x1ca   :  { %v4442_v13 = vpop.f32.mrf.mxu0  ;;  %v6379_v32 = vor.u32 %v7855_v1, %v6378_v52  ;;  %v7652_v52 = vld [vmem:[%s10931_s0 + $0x44] sm:$0xf]  ;;  %v5640_v1 = vld [vmem:[%s10931_s0 + $0xd4] sm:$0xf0] }
 0x1cb   :  { %v5643_v10 = vor.u32 %v7652_v52, %v5640_v1 }
 0x1cc   :  { %v4356_v44 = vpop.f32.mrf.mxu2 }
 0x1cd   :  { %v4399_v24 = vpop.f32.mrf.mxu3  ;;  %v4357_v11 = vadd.f32 %v4356_v44, %v4314_v29  ;;  %v9503_v44 = vld [vmem:[%s10931_s0 + $0x730] sm:$0x11] }
 0x1ce   :  { %v4316_v35 = vpop.f32.mrf.mxu1 }
 0x1cf   :  { %v4400_v38 = vadd.f32 %v4399_v24, %v4357_v11  ;;  %v4317_v42 = vadd.f32 %v4316_v35, %v9178_v49  ;;  %v279_v24 = vld [vmem:[%s10931_s0 + $0x728] sm:$0x11]  ;;  %v8041_v11 = vld [vmem:[%s10930_s1 + $0x578] sm:$0xff] }
 0x1d0   :  { %v1589_v31 = vunpack.c.h.b16 %v279_v24  ;;  %4808 = vmatpush.bf16.msra.mxu1 %v8041_v11 }
 0x1d1   :  { %4492 = vmatmul.bf16.gmra.mxu1 %v6219_v34  ;;  %4535 = vmatmul.bf16.gmra.mxu2 %v6223_v39  ;;  %v9446_v41 = vadd.f32 %v4442_v13, %v4400_v38  ;;  %v1587_v34 = vunpack.c.h.b16 %v9214_v27  ;;  %v1588_v39 = vunpack.c.l.b16 %v279_v24  ;;  %v8065_v38 = vld [vmem:[%s10930_s1 + $0x638] sm:$0xff] }
 0x1d2   :  { %4578 = vmatmul.bf16.gmra.mxu3 %v6227_v59  ;;  %v4445_v17 = vpop.f32.mrf.mxu0  ;;  %4937 = vmatpush.bf16.msra.mxu0 %v8065_v38  ;;  %v7690_v38 = vld [vmem:[%s10931_s0 + $0x174] sm:$0xf] }
 0x1d3   :  { %v1847_v61 = vpack.c.b16 %v1588_v39, %v1588_v39 }
 0x1d4   :  { %v4359_v45 = vpop.f32.mrf.mxu2 }
 0x1d5   :  { %v4402_v19 = vpop.f32.mrf.mxu3  ;;  %4621 = vmatmul.bf16.gmra.mxu0 %v6231_v51  ;;  %v4360_v49 = vadd.f32 %v4359_v45, %v4317_v42  ;;  %v1848_v42 = vpack.c.b16 %v1589_v31, %v1589_v31 }
 0x1d6   :  { %v4318_v50 = vpop.f32.mrf.mxu1 }
 0x1d7   :  { %v4403_v47 = vadd.f32 %v4402_v19, %v4360_v49  ;;  %v4319_v48 = vadd.f32 %v4318_v50, %v9199_v9  ;;  %v7835_v9 = vld [vmem:[%s10931_s0 + $0x5fc] sm:$0xf]  ;;  %v1846_v19 = vpack.c.b16 %v1587_v34, %v1587_v34 }
 0x1d8   :  { %v6367_v3 = vor.u32 %v7835_v9, %v6364_v60 }
 0x1d9   :  { %v9467_v55 = vadd.f32 %v4445_v17, %v4403_v47 }
 0x1da   :  { %v4447_v0 = vpop.f32.mrf.mxu0 }
 0x1dc   :  { %v4361_v58 = vpop.f32.mrf.mxu2 }
 0x1dd   :  { %v4404_v56 = vpop.f32.mrf.mxu3  ;;  %v4362_v26 = vadd.f32 %v4361_v58, %v4319_v48  ;;  %v8048_v48 = vld [vmem:[%s10930_s1 + $0x5b0] sm:$0xff] }
 0x1de   :  { %v4321_v6 = vpop.f32.mrf.mxu1  ;;  %4852 = vmatpush.bf16.msra.mxu2 %v8048_v48  ;;  %v7709_v48 = vld [vmem:[%s10931_s0 + $0x208] sm:$0xf0] }
 0x1df   :  { %v4405_v29 = vadd.f32 %v4404_v56, %v4362_v26  ;;  %v4322_v13 = vadd.f32 %v4321_v6, %v9220_v30  ;;  %v8057_v30 = vld [vmem:[%s10930_s1 + $0x5f8] sm:$0xff]  ;;  %v5646_v26 = vld [vmem:[%s10931_s0 + $0x48] sm:$0xf] }
 0x1e0   :  { %4894 = vmatpush.bf16.msra.mxu3 %v8057_v30 }
 0x1e1   :  { %4497 = vmatmul.bf16.gmra.mxu1 %v6367_v3  ;;  %4540 = vmatmul.bf16.gmra.mxu2 %v6371_v5  ;;  %v9488_v15 = vadd.f32 %v4447_v0, %v4405_v29  ;;  %v7671_v3 = vld [vmem:[%s10931_s0 + $0xd8] sm:$0xf0]  ;;  %v8064_v5 = vld [vmem:[%s10930_s1 + $0x630] sm:$0xff]  ;;  %v7672_v29 = vld [vmem:[%s10931_s0 + $0xe0] sm:$0xf0] }
 0x1e2   :  { %4583 = vmatmul.bf16.gmra.mxu3 %v6375_v16  ;;  %v4450_v14 = vpop.f32.mrf.mxu0  ;;  %v5648_v16 = vld [vmem:[%s10931_s0 + $0xdc] sm:$0xf0]  ;;  %4938 = vmatpush.bf16.msra.mxu0 %v8064_v5  ;;  %v7727_v5 = vld [vmem:[%s10931_s0 + $0x29c] sm:$0xf] }
 0x1e3   :  { %v5651_v6 = vor.u32 %v7653_v12, %v5648_v16 }
 0x1e4   :  { %v4364_v21 = vpop.f32.mrf.mxu2  ;;  %4895 = vmatpush.bf16.msra.mxu3 %v8056_v53 }
 0x1e5   :  { %v4407_v57 = vpop.f32.mrf.mxu3  ;;  %4626 = vmatmul.bf16.gmra.mxu0 %v6379_v32  ;;  %v4365_v20 = vadd.f32 %v4364_v21, %v4322_v13  ;;  %v5654_v32 = vld [vmem:[%s10931_s0 + $0x50] sm:$0xf] }
 0x1e6   :  { %v4323_v25 = vpop.f32.mrf.mxu1  ;;  %v5655_v30 = vor.u32 %v7672_v29, %v5654_v32  ;;  %v7726_v32 = vld [vmem:[%s10931_s0 + $0x294] sm:$0xf]  ;;  %v5942_v29 = vld [vmem:[%s10931_s0 + $0x298] sm:$0xf] }
 0x1e7   :  { %v4408_v28 = vadd.f32 %v4407_v57, %v4365_v20  ;;  %v4324_v59 = vadd.f32 %v4323_v25, %v9230_v43  ;;  %v1590_v43 = vunpack.c.l.b16 %v9503_v44  ;;  %v5647_v57 = vor.u32 %v7671_v3, %v5646_v26  ;;  %v8047_v25 = vld [vmem:[%s10930_s1 + $0x5a8] sm:$0xff]  ;;  %v8062_v3 = vld [vmem:[%s10930_s1 + $0x620] sm:$0xff] }
 0x1e8   :  { %4853 = vmatpush.bf16.msra.mxu2 %v8047_v25 }
 0x1e9   :  { %v9509_v35 = vadd.f32 %v4450_v14, %v4408_v28  ;;  %v1849_v49 = vpack.c.b16 %v1590_v43, %v1590_v43  ;;  %v8055_v28 = vld [vmem:[%s10930_s1 + $0x5e8] sm:$0xff] }
 0x1ea   :  { %v4452_v33 = vpop.f32.mrf.mxu0  ;;  %4896 = vmatpush.bf16.msra.mxu3 %v8055_v28  ;;  %v8063_v43 = vld [vmem:[%s10930_s1 + $0x628] sm:$0xff] }
 0x1eb   :  { %4939 = vmatpush.bf16.msra.mxu0 %v8063_v43 }
 0x1ec   :  { %v4366_v17 = vpop.f32.mrf.mxu2 }
 0x1ed   :  { %v4409_v51 = vpop.f32.mrf.mxu3  ;;  %v4367_v40 = vadd.f32 %v4366_v17, %v4324_v59  ;;  %v7689_v17 = vld [vmem:[%s10931_s0 + $0x16c] sm:$0xf] }
 0x1ee   :  { %v4326_v45 = vpop.f32.mrf.mxu1 }
 0x1ef   :  { %v4410_v27 = vadd.f32 %v4409_v51, %v4367_v40  ;;  %v4327_v50 = vadd.f32 %v4326_v45, %v9251_v62  ;;  %v8040_v62 = vld [vmem:[%s10930_s1 + $0x570] sm:$0xff]  ;;  %v5788_v40 = vld [vmem:[%s10931_s0 + $0x1fc] sm:$0xf0]  ;;  %4940 = vmatpush.bf16.msra.mxu0 %v8062_v3 }
 0x1f0   :  { %4809 = vmatpush.bf16.msra.mxu1 %v8040_v62  ;;  %v5794_v45 = vld [vmem:[%s10931_s0 + $0x170] sm:$0xf]  ;;  %v5791_v53 = vor.u32 %v7689_v17, %v5788_v40 }
 0x1f1   :  { %4502 = vmatmul.bf16.gmra.mxu1 %v1846_v19  ;;  %4545 = vmatmul.bf16.gmra.mxu2 %v1847_v61  ;;  %v9519_v0 = vadd.f32 %v4452_v33, %v4410_v27  ;;  %v8046_v27 = vld [vmem:[%s10930_s1 + $0x5a0] sm:$0xff] }
 0x1f2   :  { %4588 = vmatmul.bf16.gmra.mxu3 %v1848_v42  ;;  %v4455_v47 = vpop.f32.mrf.mxu0  ;;  %v5796_v42 = vld [vmem:[%s10931_s0 + $0x204] sm:$0xf0]  ;;  %4854 = vmatpush.bf16.msra.mxu2 %v8046_v27  ;;  %v8044_v27 = vld [vmem:[%s10930_s1 + $0x590] sm:$0xff] }
 0x1f4   :  { %v4369_v7 = vpop.f32.mrf.mxu2 }
 0x1f5   :  { %v4412_v18 = vpop.f32.mrf.mxu3  ;;  %4631 = vmatmul.bf16.gmra.mxu0 %v1849_v49  ;;  %v4370_v54 = vadd.f32 %v4369_v7, %v4327_v50  ;;  %v7708_v49 = vld [vmem:[%s10931_s0 + $0x200] sm:$0xf0]  ;;  %v5799_v50 = vor.u32 %v7690_v38, %v5796_v42  ;;  %v8061_v42 = vld [vmem:[%s10930_s1 + $0x618] sm:$0xff] }
 0x1f6   :  { %v4328_v9 = vpop.f32.mrf.mxu1  ;;  %v5795_v62 = vor.u32 %v7708_v49, %v5794_v45  ;;  %4941 = vmatpush.bf16.msra.mxu0 %v8061_v42 }
 0x1f7   :  { %v4413_v56 = vadd.f32 %v4412_v18, %v4370_v54  ;;  %v4329_v60 = vadd.f32 %v4328_v9, %v9275_v23 }
 0x1f9   :  { %v9540_v58 = vadd.f32 %v4455_v47, %v4413_v56  ;;  %v5802_v47 = vld [vmem:[%s10931_s0 + $0x178] sm:$0xf] }
 0x1fa   :  { %v4457_v63 = vpop.f32.mrf.mxu0  ;;  %v5803_v54 = vor.u32 %v7709_v48, %v5802_v47  ;;  %v6092_v47 = vld [vmem:[%s10931_s0 + $0x454] sm:$0xf0]  ;;  %v7763_v48 = vld [vmem:[%s10931_s0 + $0x3bc] sm:$0xf] }
 0x1fc   :  { %v4371_v13 = vpop.f32.mrf.mxu2 }
 0x1fd   :  { %v4414_v23 = vpop.f32.mrf.mxu3  ;;  %v4372_v14 = vadd.f32 %v4371_v13, %v4329_v60  ;;  %v8054_v60 = vld [vmem:[%s10930_s1 + $0x5e0] sm:$0xff] }
 0x1fe   :  { %v4331_v36 = vpop.f32.mrf.mxu1  ;;  %4897 = vmatpush.bf16.msra.mxu3 %v8054_v60  ;;  %v6098_v60 = vld [vmem:[%s10931_s0 + $0x3c8] sm:$0xf] }
 0x1ff   :  { %v4415_v21 = vadd.f32 %v4414_v23, %v4372_v14  ;;  %v4332_v24 = vadd.f32 %v4331_v36, %v9295_v8  ;;  %v8039_v8 = vld [vmem:[%s10930_s1 + $0x568] sm:$0xff]  ;;  %v8053_v36 = vld [vmem:[%s10930_s1 + $0x5d8] sm:$0xff] }
 0x200   :  { %4810 = vmatpush.bf16.msra.mxu1 %v8039_v8 }
 0x201   :  { %4644 = vmatmul.bf16.vlgmr.msrb.gmra.mxu1 %v5643_v10  ;;  %4687 = vmatmul.bf16.vlgmr.msrb.gmra.mxu2 %v5647_v57  ;;  %v9564_v59 = vadd.f32 %v4457_v63, %v4415_v21  ;;  %v8038_v63 = vld [vmem:[%s10930_s1 + $0x560] sm:$0xff]  ;;  %v7745_v10 = vld [vmem:[%s10931_s0 + $0x328] sm:$0xf0]  ;;  %v8045_v57 = vld [vmem:[%s10930_s1 + $0x598] sm:$0xff] }
 0x202   :  { %4730 = vmatmul.bf16.vlgmr.msrb.gmra.mxu3 %v5651_v6  ;;  %v4460_v20 = vpop.f32.mrf.mxu0  ;;  %v5944_v6 = vld [vmem:[%s10931_s0 + $0x32c] sm:$0xf0]  ;;  %v5950_v21 = vld [vmem:[%s10931_s0 + $0x2a0] sm:$0xf]  ;;  %4855 = vmatpush.bf16.msra.mxu2 %v8045_v57 }
 0x203   :  { %4898 = vmatpush.bf16.msra.mxu3 %v8053_v36 }
 0x204   :  { %v4374_v31 = vpop.f32.mrf.mxu2  ;;  %4811 = vmatpush.bf16.msra.mxu1 %v8038_v63  ;;  %v7783_v63 = vld [vmem:[%s10931_s0 + $0x458] sm:$0xf0] }
 0x205   :  { %v4417_v33 = vpop.f32.mrf.mxu3  ;;  %4773 = vmatmul.bf16.vlgmr.msrb.gmra.mxu0 %v5655_v30  ;;  %v4375_v11 = vadd.f32 %v4374_v31, %v4332_v24  ;;  %v5947_v30 = vor.u32 %v7727_v5, %v5944_v6  ;;  %v7746_v24 = vld [vmem:[%s10931_s0 + $0x330] sm:$0xf0] }
 0x206   :  { %v4333_v34 = vpop.f32.mrf.mxu1  ;;  %v5951_v31 = vor.u32 %v7746_v24, %v5950_v21  ;;  %4856 = vmatpush.bf16.msra.mxu2 %v8044_v27  ;;  %v8051_v21 = vld [vmem:[%s10930_s1 + $0x5c8] sm:$0xff] }
 0x207   :  { %v4418_v39 = vadd.f32 %v4417_v33, %v4375_v11  ;;  %v5943_v33 = vor.u32 %v7745_v10, %v5942_v29  ;;  %v7801_v24 = vld [vmem:[%s10931_s0 + $0x4ec] sm:$0xf] }
 0x209   :  { %v9584_v19 = vadd.f32 %v4460_v20, %v4418_v39 }
 0x20a   :  { %v4462_v51 = vpop.f32.mrf.mxu0 }
 0x20b   :  { %v8037_v51 = vld [vmem:[%s10930_s1 + $0x558] sm:$0xff] }
 0x20c   :  { %v4376_v18 = vpop.f32.mrf.mxu2  ;;  %4812 = vmatpush.bf16.msra.mxu1 %v8037_v51  ;;  %v7820_v51 = vld [vmem:[%s10931_s0 + $0x580] sm:$0xf0] }
 0x20d   :  { %v4419_v61 = vpop.f32.mrf.mxu3  ;;  %v6090_v18 = vld [vmem:[%s10931_s0 + $0x3c0] sm:$0xf] }
 0x20e   :  { %v4473_v7 = vpop.f32.mrf.mxu1 }
 0x20f   :  { %v4474_v9 = vadd.f32 %v4473_v7, %v9338_v4  ;;  %v7782_v7 = vld [vmem:[%s10931_s0 + $0x450] sm:$0xf0] }
 0x211   :  { %4649 = vmatmul.bf16.gmra.mxu1 %v5791_v53  ;;  %4692 = vmatmul.bf16.gmra.mxu2 %v5795_v62 }
 0x212   :  { %4735 = vmatmul.bf16.gmra.mxu3 %v5799_v50  ;;  %v4602_v56 = vpop.f32.mrf.mxu0  ;;  %v7764_v50 = vld [vmem:[%s10931_s0 + $0x3c4] sm:$0xf] }
 0x214   :  { %v4516_v16 = vpop.f32.mrf.mxu2 }
 0x215   :  { %v4559_v12 = vpop.f32.mrf.mxu3  ;;  %4778 = vmatmul.bf16.gmra.mxu0 %v5803_v54  ;;  %v4517_v52 = vadd.f32 %v4516_v16, %v4474_v9  ;;  %v8052_v54 = vld [vmem:[%s10930_s1 + $0x5d0] sm:$0xff] }
 0x216   :  { %v4475_v1 = vpop.f32.mrf.mxu1  ;;  %v8036_v9 = vld [vmem:[%s10930_s1 + $0x550] sm:$0xff]  ;;  %4899 = vmatpush.bf16.msra.mxu3 %v8052_v54 }
 0x217   :  { %v4560_v4 = vadd.f32 %v4559_v12, %v4517_v52  ;;  %v4476_v23 = vadd.f32 %v4475_v1, %v9359_v37  ;;  %v5936_v37 = vld [vmem:[%s10931_s0 + $0x324] sm:$0xf0]  ;;  %4813 = vmatpush.bf16.msra.mxu1 %v8036_v9  ;;  %v6091_v1 = vor.u32 %v7782_v7, %v6090_v18 }
 0x218   :  { %v5939_v28 = vor.u32 %v7726_v32, %v5936_v37  ;;  %v8060_v37 = vld [vmem:[%s10930_s1 + $0x610] sm:$0xff] }
 0x219   :  { %v9627_v13 = vadd.f32 %v4602_v56, %v4560_v4  ;;  %v6095_v56 = vor.u32 %v7764_v50, %v6092_v47  ;;  %4942 = vmatpush.bf16.msra.mxu0 %v8060_v37  ;;  %v8059_v50 = vld [vmem:[%s10930_s1 + $0x608] sm:$0xff] }
 0x21a   :  { %v4604_v26 = vpop.f32.mrf.mxu0  ;;  %4900 = vmatpush.bf16.msra.mxu3 %v8051_v21  ;;  %v8058_v21 = vld [vmem:[%s10930_s1 + $0x600] sm:$0xff] }
 0x21c   :  { %v4518_v20 = vpop.f32.mrf.mxu2 }
 0x21d   :  { %v4561_v14 = vpop.f32.mrf.mxu3  ;;  %v4519_v25 = vadd.f32 %v4518_v20, %v4476_v23  ;;  %v6099_v23 = vor.u32 %v7783_v63, %v6098_v60  ;;  %v6240_v20 = vld [vmem:[%s10931_s0 + $0x57c] sm:$0xf0]  ;;  %4943 = vmatpush.bf16.msra.mxu0 %v8059_v50  ;;  %v7838_v63 = vld [vmem:[%s10931_s0 + $0x614] sm:$0xf] }
 0x21e   :  { %v4478_v8 = vpop.f32.mrf.mxu1  ;;  %v8034_v60 = vld [vmem:[%s10930_s1 + $0x540] sm:$0xff] }
 0x21f   :  { %v4562_v11 = vadd.f32 %v4561_v14, %v4519_v25  ;;  %v4479_v34 = vadd.f32 %v4478_v8, %v9383_v46  ;;  %v6232_v25 = vld [vmem:[%s10931_s0 + $0x574] sm:$0xf0]  ;;  %v6238_v8 = vld [vmem:[%s10931_s0 + $0x4e8] sm:$0xf] }
 0x221   :  { %4654 = vmatmul.bf16.gmra.mxu1 %v5939_v28  ;;  %4697 = vmatmul.bf16.gmra.mxu2 %v5943_v33  ;;  %v9648_v43 = vadd.f32 %v4604_v26, %v4562_v11  ;;  %v8035_v11 = vld [vmem:[%s10930_s1 + $0x548] sm:$0xff] }
 0x222   :  { %4740 = vmatmul.bf16.gmra.mxu3 %v5947_v30  ;;  %v4607_v39 = vpop.f32.mrf.mxu0  ;;  %v8043_v30 = vld [vmem:[%s10930_s1 + $0x588] sm:$0xff]  ;;  %4814 = vmatpush.bf16.msra.mxu1 %v8035_v11 }
 0x223   :  { %4857 = vmatpush.bf16.msra.mxu2 %v8043_v30  ;;  %4944 = vmatpush.bf16.msra.mxu0 %v8058_v21 }
 0x224   :  { %v4521_v17 = vpop.f32.mrf.mxu2 }
 0x225   :  { %v4564_v38 = vpop.f32.mrf.mxu3  ;;  %4783 = vmatmul.bf16.gmra.mxu0 %v5951_v31  ;;  %v4522_v46 = vadd.f32 %v4521_v17, %v4479_v34  ;;  %v7819_v31 = vld [vmem:[%s10931_s0 + $0x578] sm:$0xf0]  ;;  %v6243_v34 = vor.u32 %v7801_v24, %v6240_v20 }
 0x226   :  { %v4480_v40 = vpop.f32.mrf.mxu1  ;;  %4815 = vmatpush.bf16.msra.mxu1 %v8034_v60  ;;  %v8088_v60 = vld [vmem:[%s10930_s1 + $0x6f0] sm:$0xff] }
 0x227   :  { %v4565_v61 = vadd.f32 %v4564_v38, %v4522_v46  ;;  %v4481_v45 = vadd.f32 %v4480_v40, %v9401_v2  ;;  %v6084_v2 = vld [vmem:[%s10931_s0 + $0x44c] sm:$0xf0]  ;;  %v6239_v46 = vor.u32 %v7819_v31, %v6238_v8 }
 0x228   :  { %v6087_v52 = vor.u32 %v7763_v48, %v6084_v2  ;;  %v8042_v2 = vld [vmem:[%s10930_s1 + $0x580] sm:$0xff] }
 0x229   :  { %v9672_v53 = vadd.f32 %v4607_v39, %v4565_v61  ;;  %v6246_v39 = vld [vmem:[%s10931_s0 + $0x4f0] sm:$0xf]  ;;  %4858 = vmatpush.bf16.msra.mxu2 %v8042_v2 }
 0x22a   :  { %v4609_v49 = vpop.f32.mrf.mxu0  ;;  %v6247_v61 = vor.u32 %v7820_v51, %v6246_v39 }
 0x22c   :  { %v4523_v12 = vpop.f32.mrf.mxu2 }
 0x22d   :  { %v4566_v62 = vpop.f32.mrf.mxu3  ;;  %v4524_v16 = vadd.f32 %v4523_v12, %v4481_v45  ;;  %v6388_v12 = vld [vmem:[%s10931_s0 + $0x6a4] sm:$0xf0] }
 0x22e   :  { %v4483_v4 = vpop.f32.mrf.mxu1 }
 0x22f   :  { %v4567_v26 = vadd.f32 %v4566_v62, %v4524_v16  ;;  %v4484_v3 = vadd.f32 %v4483_v4, %v9425_v22  ;;  %v6386_v4 = vld [vmem:[%s10931_s0 + $0x610] sm:$0xf] }
 0x231   :  { %4659 = vmatmul.bf16.gmra.mxu1 %v6087_v52  ;;  %4702 = vmatmul.bf16.gmra.mxu2 %v6091_v1  ;;  %v9690_v6 = vadd.f32 %v4609_v49, %v4567_v26  ;;  %v6380_v1 = vld [vmem:[%s10931_s0 + $0x69c] sm:$0xf0]  ;;  %v6391_v26 = vor.u32 %v7838_v63, %v6388_v12 }
 0x232   :  { %4745 = vmatmul.bf16.gmra.mxu3 %v6095_v56  ;;  %v4612_v5 = vpop.f32.mrf.mxu0  ;;  %v8050_v56 = vld [vmem:[%s10930_s1 + $0x5c0] sm:$0xff] }
 0x233   :  { %4901 = vmatpush.bf16.msra.mxu3 %v8050_v56 }
 0x234   :  { %v4526_v29 = vpop.f32.mrf.mxu2 }
 0x235   :  { %v4569_v32 = vpop.f32.mrf.mxu3  ;;  %4788 = vmatmul.bf16.gmra.mxu0 %v6099_v23  ;;  %v4527_v14 = vadd.f32 %v4526_v29, %v4484_v3  ;;  %v7856_v23 = vld [vmem:[%s10931_s0 + $0x6a0] sm:$0xf0]  ;;  %v6394_v3 = vld [vmem:[%s10931_s0 + $0x618] sm:$0xf] }
 0x236   :  { %v4485_v10 = vpop.f32.mrf.mxu1 }
 0x237   :  { %v4570_v57 = vadd.f32 %v4569_v32, %v4527_v14  ;;  %v4486_v36 = vadd.f32 %v4485_v10, %v9446_v41  ;;  %v7800_v41 = vld [vmem:[%s10931_s0 + $0x4e4] sm:$0xf]  ;;  %v6387_v14 = vor.u32 %v7856_v23, %v6386_v4  ;;  %v7655_v23 = vld [vmem:[%s10931_s0 + $0x5c] sm:$0xf] }
 0x238   :  { %v6235_v17 = vor.u32 %v7800_v41, %v6232_v25  ;;  %v8081_v41 = vld [vmem:[%s10930_s1 + $0x6b8] sm:$0xff] }
 0x239   :  { %v9714_v28 = vadd.f32 %v4612_v5, %v4570_v57  ;;  %v7857_v5 = vld [vmem:[%s10931_s0 + $0x6a8] sm:$0xf0]  ;;  %5023 = vmatpush.bf16.msrb.mxu2 %v8081_v41 }
 0x23a   :  { %v4614_v22 = vpop.f32.mrf.mxu0  ;;  %v6395_v57 = vor.u32 %v7857_v5, %v6394_v3  ;;  %v7654_v3 = vld [vmem:[%s10931_s0 + $0x54] sm:$0xf]  ;;  %v5656_v5 = vld [vmem:[%s10931_s0 + $0xe4] sm:$0xf0] }
 0x23b   :  { %v5659_v21 = vor.u32 %v7654_v3, %v5656_v5 }
 0x23c   :  { %v4528_v38 = vpop.f32.mrf.mxu2 }
 0x23d   :  { %v4571_v33 = vpop.f32.mrf.mxu3  ;;  %v4529_v42 = vadd.f32 %v4528_v38, %v4486_v36  ;;  %v9792_v38 = vld [vmem:[%s10931_s0 + $0x740] sm:$0x11] }
 0x23e   :  { %v4488_v40 = vpop.f32.mrf.mxu1 }
 0x23f   :  { %v4572_v45 = vadd.f32 %v4571_v33, %v4529_v42  ;;  %v4489_v49 = vadd.f32 %v4488_v40, %v9467_v55  ;;  %v281_v33 = vld [vmem:[%s10931_s0 + $0x738] sm:$0x11] }
 0x240   :  { %v1593_v51 = vunpack.c.h.b16 %v281_v33  ;;  %v8073_v42 = vld [vmem:[%s10930_s1 + $0x678] sm:$0xff] }
 0x241   :  { %4664 = vmatmul.bf16.gmra.mxu1 %v6235_v17  ;;  %4707 = vmatmul.bf16.gmra.mxu2 %v6239_v46  ;;  %v9735_v47 = vadd.f32 %v4614_v22, %v4572_v45  ;;  %v1591_v17 = vunpack.c.h.b16 %v9503_v44  ;;  %v1592_v46 = vunpack.c.l.b16 %v281_v33  ;;  %v8097_v45 = vld [vmem:[%s10930_s1 + $0x738] sm:$0xff] }
 0x242   :  { %4750 = vmatmul.bf16.gmra.mxu3 %v6243_v34  ;;  %v4617_v27 = vpop.f32.mrf.mxu0  ;;  %4980 = vmatpush.bf16.msrb.mxu1 %v8073_v42 }
 0x243   :  { %5109 = vmatpush.bf16.msrb.mxu0 %v8097_v45  ;;  %v1851_v2 = vpack.c.b16 %v1592_v46, %v1592_v46  ;;  %v7692_v45 = vld [vmem:[%s10931_s0 + $0x184] sm:$0xf] }
 0x244   :  { %v4531_v18 = vpop.f32.mrf.mxu2 }
 0x245   :  { %v4574_v48 = vpop.f32.mrf.mxu3  ;;  %4793 = vmatmul.bf16.gmra.mxu0 %v6247_v61  ;;  %v4532_v55 = vadd.f32 %v4531_v18, %v4489_v49  ;;  %v1852_v49 = vpack.c.b16 %v1593_v51, %v1593_v51 }
 0x246   :  { %v4490_v62 = vpop.f32.mrf.mxu1 }
 0x247   :  { %v4575_v7 = vadd.f32 %v4574_v48, %v4532_v55  ;;  %v4491_v54 = vadd.f32 %v4490_v62, %v9488_v15  ;;  %v7837_v15 = vld [vmem:[%s10931_s0 + $0x60c] sm:$0xf]  ;;  %v1850_v48 = vpack.c.b16 %v1591_v17, %v1591_v17 }
 0x248   :  { %v6383_v29 = vor.u32 %v7837_v15, %v6380_v1 }
 0x249   :  { %v9756_v16 = vadd.f32 %v4617_v27, %v4575_v7 }
 0x24a   :  { %v4619_v9 = vpop.f32.mrf.mxu0 }
 0x24c   :  { %v4533_v32 = vpop.f32.mrf.mxu2 }
 0x24d   :  { %v4576_v52 = vpop.f32.mrf.mxu3  ;;  %v4534_v37 = vadd.f32 %v4533_v32, %v4491_v54  ;;  %v8080_v54 = vld [vmem:[%s10930_s1 + $0x6b0] sm:$0xff] }
 0x24e   :  { %v4493_v10 = vpop.f32.mrf.mxu1  ;;  %5024 = vmatpush.bf16.msrb.mxu2 %v8080_v54  ;;  %v7711_v54 = vld [vmem:[%s10931_s0 + $0x218] sm:$0xf0] }
 0x24f   :  { %v4577_v36 = vadd.f32 %v4576_v52, %v4534_v37  ;;  %v4494_v22 = vadd.f32 %v4493_v10, %v9509_v35  ;;  %v8089_v35 = vld [vmem:[%s10930_s1 + $0x6f8] sm:$0xff] }
 0x250   :  { %5066 = vmatpush.bf16.msrb.mxu3 %v8089_v35  ;;  %v5662_v37 = vld [vmem:[%s10931_s0 + $0x58] sm:$0xf] }
 0x251   :  { %4669 = vmatmul.bf16.gmra.mxu1 %v6383_v29  ;;  %4712 = vmatmul.bf16.gmra.mxu2 %v6387_v14  ;;  %v9777_v24 = vadd.f32 %v4619_v9, %v4577_v36  ;;  %v7673_v29 = vld [vmem:[%s10931_s0 + $0xe8] sm:$0xf0]  ;;  %v8096_v14 = vld [vmem:[%s10930_s1 + $0x730] sm:$0xff] }
 0x252   :  { %4755 = vmatmul.bf16.gmra.mxu3 %v6391_v26  ;;  %v4622_v30 = vpop.f32.mrf.mxu0  ;;  %v5664_v26 = vld [vmem:[%s10931_s0 + $0xec] sm:$0xf0]  ;;  %v7674_v36 = vld [vmem:[%s10931_s0 + $0xf0] sm:$0xf0]  ;;  %5110 = vmatpush.bf16.msrb.mxu0 %v8096_v14  ;;  %v7729_v14 = vld [vmem:[%s10931_s0 + $0x2ac] sm:$0xf] }
 0x253   :  { %v5667_v10 = vor.u32 %v7655_v23, %v5664_v26 }
 0x254   :  { %v4536_v25 = vpop.f32.mrf.mxu2  ;;  %5067 = vmatpush.bf16.msrb.mxu3 %v8088_v60 }
 0x255   :  { %v4579_v20 = vpop.f32.mrf.mxu3  ;;  %4798 = vmatmul.bf16.gmra.mxu0 %v6395_v57  ;;  %v4537_v8 = vadd.f32 %v4536_v25, %v4494_v22  ;;  %v5670_v57 = vld [vmem:[%s10931_s0 + $0x60] sm:$0xf] }
 0x256   :  { %v4495_v31 = vpop.f32.mrf.mxu1  ;;  %v5671_v35 = vor.u32 %v7674_v36, %v5670_v57  ;;  %v7728_v57 = vld [vmem:[%s10931_s0 + $0x2a4] sm:$0xf]  ;;  %v5958_v36 = vld [vmem:[%s10931_s0 + $0x2a8] sm:$0xf] }
 0x257   :  { %v4580_v11 = vadd.f32 %v4579_v20, %v4537_v8  ;;  %v4496_v34 = vadd.f32 %v4495_v31, %v9519_v0  ;;  %v1594_v0 = vunpack.c.l.b16 %v9792_v38  ;;  %v5663_v20 = vor.u32 %v7673_v29, %v5662_v37  ;;  %v8079_v31 = vld [vmem:[%s10930_s1 + $0x6a8] sm:$0xff]  ;;  %v8094_v29 = vld [vmem:[%s10930_s1 + $0x720] sm:$0xff] }
 0x258   :  { %5025 = vmatpush.bf16.msrb.mxu2 %v8079_v31 }
 0x259   :  { %v9798_v40 = vadd.f32 %v4622_v30, %v4580_v11  ;;  %v1853_v55 = vpack.c.b16 %v1594_v0, %v1594_v0  ;;  %v8087_v11 = vld [vmem:[%s10930_s1 + $0x6e8] sm:$0xff] }
 0x25a   :  { %v4624_v39 = vpop.f32.mrf.mxu0  ;;  %5068 = vmatpush.bf16.msrb.mxu3 %v8087_v11  ;;  %v8095_v0 = vld [vmem:[%s10930_s1 + $0x728] sm:$0xff] }
 0x25b   :  { %5111 = vmatpush.bf16.msrb.mxu0 %v8095_v0 }
 0x25c   :  { %v4538_v27 = vpop.f32.mrf.mxu2 }
 0x25d   :  { %v4581_v61 = vpop.f32.mrf.mxu3  ;;  %v4539_v50 = vadd.f32 %v4538_v27, %v4496_v34  ;;  %v7691_v27 = vld [vmem:[%s10931_s0 + $0x17c] sm:$0xf] }
 0x25e   :  { %v4498_v18 = vpop.f32.mrf.mxu1 }
 0x25f   :  { %v4582_v44 = vadd.f32 %v4581_v61, %v4539_v50  ;;  %v4499_v62 = vadd.f32 %v4498_v18, %v9540_v58  ;;  %v8072_v58 = vld [vmem:[%s10930_s1 + $0x670] sm:$0xff]  ;;  %v5810_v18 = vld [vmem:[%s10931_s0 + $0x180] sm:$0xf]  ;;  %5112 = vmatpush.bf16.msrb.mxu0 %v8094_v29 }
 0x260   :  { %4981 = vmatpush.bf16.msrb.mxu1 %v8072_v58  ;;  %v5804_v50 = vld [vmem:[%s10931_s0 + $0x20c] sm:$0xf0] }
 0x261   :  { %4674 = vmatmul.bf16.gmra.mxu1 %v1850_v48  ;;  %4717 = vmatmul.bf16.gmra.mxu2 %v1851_v2  ;;  %v9808_v9 = vadd.f32 %v4624_v39, %v4582_v44  ;;  %v8078_v44 = vld [vmem:[%s10930_s1 + $0x6a0] sm:$0xff]  ;;  %v5807_v60 = vor.u32 %v7691_v27, %v5804_v50 }
 0x262   :  { %4760 = vmatmul.bf16.gmra.mxu3 %v1852_v49  ;;  %v4627_v7 = vpop.f32.mrf.mxu0  ;;  %v5812_v49 = vld [vmem:[%s10931_s0 + $0x214] sm:$0xf0]  ;;  %5026 = vmatpush.bf16.msrb.mxu2 %v8078_v44  ;;  %v8076_v44 = vld [vmem:[%s10930_s1 + $0x690] sm:$0xff] }
 0x264   :  { %v4541_v63 = vpop.f32.mrf.mxu2 }
 0x265   :  { %v4584_v56 = vpop.f32.mrf.mxu3  ;;  %4803 = vmatmul.bf16.gmra.mxu0 %v1853_v55  ;;  %v4542_v12 = vadd.f32 %v4541_v63, %v4499_v62  ;;  %v7710_v55 = vld [vmem:[%s10931_s0 + $0x210] sm:$0xf0]  ;;  %v5815_v62 = vor.u32 %v7692_v45, %v5812_v49  ;;  %v8093_v49 = vld [vmem:[%s10930_s1 + $0x718] sm:$0xff] }
 0x266   :  { %v4500_v15 = vpop.f32.mrf.mxu1  ;;  %v5811_v58 = vor.u32 %v7710_v55, %v5810_v18  ;;  %5113 = vmatpush.bf16.msrb.mxu0 %v8093_v49 }
 0x267   :  { %v4585_v52 = vadd.f32 %v4584_v56, %v4542_v12  ;;  %v4501_v1 = vadd.f32 %v4500_v15, %v9564_v59 }
 0x269   :  { %v9829_v32 = vadd.f32 %v4627_v7, %v4585_v52  ;;  %v5818_v7 = vld [vmem:[%s10931_s0 + $0x188] sm:$0xf] }
 0x26a   :  { %v4629_v4 = vpop.f32.mrf.mxu0  ;;  %v5819_v12 = vor.u32 %v7711_v54, %v5818_v7  ;;  %v6108_v7 = vld [vmem:[%s10931_s0 + $0x464] sm:$0xf0]  ;;  %v7765_v54 = vld [vmem:[%s10931_s0 + $0x3cc] sm:$0xf] }
 0x26c   :  { %v4543_v22 = vpop.f32.mrf.mxu2 }
 0x26d   :  { %v4586_v59 = vpop.f32.mrf.mxu3  ;;  %v4544_v30 = vadd.f32 %v4543_v22, %v4501_v1  ;;  %v8086_v1 = vld [vmem:[%s10930_s1 + $0x6e0] sm:$0xff] }
 0x26e   :  { %v4503_v41 = vpop.f32.mrf.mxu1  ;;  %5069 = vmatpush.bf16.msrb.mxu3 %v8086_v1  ;;  %v6114_v1 = vld [vmem:[%s10931_s0 + $0x3d8] sm:$0xf] }
 0x26f   :  { %v4587_v25 = vadd.f32 %v4586_v59, %v4544_v30  ;;  %v4504_v33 = vadd.f32 %v4503_v41, %v9584_v19  ;;  %v8071_v19 = vld [vmem:[%s10930_s1 + $0x668] sm:$0xff]  ;;  %v8085_v41 = vld [vmem:[%s10930_s1 + $0x6d8] sm:$0xff] }
 0x270   :  { %4982 = vmatpush.bf16.msrb.mxu1 %v8071_v19 }
 0x271   :  { %4816 = vmatmul.bf16.vlgmr.msra.gmra.mxu1 %v5659_v21  ;;  %4859 = vmatmul.bf16.vlgmr.msra.gmra.mxu2 %v5663_v20  ;;  %v9853_v34 = vadd.f32 %v4629_v4, %v4587_v25  ;;  %v8070_v4 = vld [vmem:[%s10930_s1 + $0x660] sm:$0xff]  ;;  %v7747_v21 = vld [vmem:[%s10931_s0 + $0x338] sm:$0xf0]  ;;  %v5966_v25 = vld [vmem:[%s10931_s0 + $0x2b0] sm:$0xf] }
 0x272   :  { %4902 = vmatmul.bf16.vlgmr.msra.gmra.mxu3 %v5667_v10  ;;  %v4632_v8 = vpop.f32.mrf.mxu0  ;;  %v5960_v10 = vld [vmem:[%s10931_s0 + $0x33c] sm:$0xf0]  ;;  %v8077_v20 = vld [vmem:[%s10930_s1 + $0x698] sm:$0xff] }
 0x273   :  { %5027 = vmatpush.bf16.msrb.mxu2 %v8077_v20  ;;  %5070 = vmatpush.bf16.msrb.mxu3 %v8085_v41 }
 0x274   :  { %v4546_v51 = vpop.f32.mrf.mxu2  ;;  %4983 = vmatpush.bf16.msrb.mxu1 %v8070_v4  ;;  %v7785_v4 = vld [vmem:[%s10931_s0 + $0x468] sm:$0xf0] }
 0x275   :  { %v4589_v39 = vpop.f32.mrf.mxu3  ;;  %4945 = vmatmul.bf16.vlgmr.msra.gmra.mxu0 %v5671_v35  ;;  %v4547_v42 = vadd.f32 %v4546_v51, %v4504_v33  ;;  %v5963_v35 = vor.u32 %v7729_v14, %v5960_v10  ;;  %v7748_v33 = vld [vmem:[%s10931_s0 + $0x340] sm:$0xf0] }
 0x276   :  { %v4505_v17 = vpop.f32.mrf.mxu1  ;;  %v5967_v51 = vor.u32 %v7748_v33, %v5966_v25  ;;  %v8083_v25 = vld [vmem:[%s10930_s1 + $0x6c8] sm:$0xff]  ;;  %v7803_v33 = vld [vmem:[%s10931_s0 + $0x4fc] sm:$0xf] }
 0x277   :  { %v4590_v46 = vadd.f32 %v4589_v39, %v4547_v42  ;;  %v5959_v39 = vor.u32 %v7747_v21, %v5958_v36  ;;  %5028 = vmatpush.bf16.msrb.mxu2 %v8076_v44 }
 0x279   :  { %v9873_v48 = vadd.f32 %v4632_v8, %v4590_v46 }
 0x27a   :  { %v4634_v61 = vpop.f32.mrf.mxu0 }
 0x27b   :  { %v8069_v61 = vld [vmem:[%s10930_s1 + $0x658] sm:$0xff] }
 0x27c   :  { %v4548_v56 = vpop.f32.mrf.mxu2  ;;  %4984 = vmatpush.bf16.msrb.mxu1 %v8069_v61  ;;  %v7822_v61 = vld [vmem:[%s10931_s0 + $0x590] sm:$0xf0] }
 0x27d   :  { %v4591_v2 = vpop.f32.mrf.mxu3  ;;  %v6106_v56 = vld [vmem:[%s10931_s0 + $0x3d0] sm:$0xf] }
 0x27e   :  { %v4645_v63 = vpop.f32.mrf.mxu1 }
 0x27f   :  { %v4646_v15 = vadd.f32 %v4645_v63, %v9627_v13  ;;  %v7784_v63 = vld [vmem:[%s10931_s0 + $0x460] sm:$0xf0] }
 0x281   :  { %4821 = vmatmul.bf16.gmra.mxu1 %v5807_v60  ;;  %4864 = vmatmul.bf16.gmra.mxu2 %v5811_v58 }
 0x282   :  { %4907 = vmatmul.bf16.gmra.mxu3 %v5815_v62  ;;  %v4774_v52 = vpop.f32.mrf.mxu0  ;;  %v7766_v62 = vld [vmem:[%s10931_s0 + $0x3d4] sm:$0xf] }
 0x284   :  { %v4688_v26 = vpop.f32.mrf.mxu2 }
 0x285   :  { %v4731_v23 = vpop.f32.mrf.mxu3  ;;  %4950 = vmatmul.bf16.gmra.mxu0 %v5819_v12  ;;  %v4689_v3 = vadd.f32 %v4688_v26, %v4646_v15  ;;  %v8084_v12 = vld [vmem:[%s10930_s1 + $0x6d0] sm:$0xff] }
 0x286   :  { %v4647_v5 = vpop.f32.mrf.mxu1  ;;  %v8068_v15 = vld [vmem:[%s10930_s1 + $0x650] sm:$0xff]  ;;  %5071 = vmatpush.bf16.msrb.mxu3 %v8084_v12 }
 0x287   :  { %v4732_v13 = vadd.f32 %v4731_v23, %v4689_v3  ;;  %v4648_v59 = vadd.f32 %v4647_v5, %v9648_v43  ;;  %v5952_v43 = vld [vmem:[%s10931_s0 + $0x334] sm:$0xf0]  ;;  %4985 = vmatpush.bf16.msrb.mxu1 %v8068_v15  ;;  %v6107_v5 = vor.u32 %v7784_v63, %v6106_v56 }
 0x288   :  { %v5955_v11 = vor.u32 %v7728_v57, %v5952_v43  ;;  %v8092_v43 = vld [vmem:[%s10930_s1 + $0x710] sm:$0xff] }
 0x289   :  { %v9916_v22 = vadd.f32 %v4774_v52, %v4732_v13  ;;  %v6111_v52 = vor.u32 %v7766_v62, %v6108_v7  ;;  %5114 = vmatpush.bf16.msrb.mxu0 %v8092_v43  ;;  %v8091_v62 = vld [vmem:[%s10930_s1 + $0x708] sm:$0xff] }
 0x28a   :  { %v4776_v37 = vpop.f32.mrf.mxu0  ;;  %5072 = vmatpush.bf16.msrb.mxu3 %v8083_v25  ;;  %v8090_v25 = vld [vmem:[%s10930_s1 + $0x700] sm:$0xff] }
 0x28c   :  { %v4690_v8 = vpop.f32.mrf.mxu2 }
 0x28d   :  { %v4733_v30 = vpop.f32.mrf.mxu3  ;;  %v4691_v31 = vadd.f32 %v4690_v8, %v4648_v59  ;;  %v6115_v59 = vor.u32 %v7785_v4, %v6114_v1  ;;  %v6256_v8 = vld [vmem:[%s10931_s0 + $0x58c] sm:$0xf0]  ;;  %5115 = vmatpush.bf16.msrb.mxu0 %v8091_v62  ;;  %v8066_v1 = vld [vmem:[%s10930_s1 + $0x640] sm:$0xff] }
 0x28e   :  { %v4650_v19 = vpop.f32.mrf.mxu1  ;;  %v7840_v4 = vld [vmem:[%s10931_s0 + $0x624] sm:$0xf] }
 0x28f   :  { %v4734_v42 = vadd.f32 %v4733_v30, %v4691_v31  ;;  %v4651_v17 = vadd.f32 %v4650_v19, %v9672_v53  ;;  %v6248_v31 = vld [vmem:[%s10931_s0 + $0x584] sm:$0xf0]  ;;  %v6254_v19 = vld [vmem:[%s10931_s0 + $0x4f8] sm:$0xf] }
 0x291   :  { %4826 = vmatmul.bf16.gmra.mxu1 %v5955_v11  ;;  %4869 = vmatmul.bf16.gmra.mxu2 %v5959_v39  ;;  %v9937_v0 = vadd.f32 %v4776_v37, %v4734_v42  ;;  %v8067_v42 = vld [vmem:[%s10930_s1 + $0x648] sm:$0xff] }
 0x292   :  { %4912 = vmatmul.bf16.gmra.mxu3 %v5963_v35  ;;  %v4779_v46 = vpop.f32.mrf.mxu0  ;;  %v8075_v35 = vld [vmem:[%s10930_s1 + $0x688] sm:$0xff]  ;;  %4986 = vmatpush.bf16.msrb.mxu1 %v8067_v42 }
 0x293   :  { %5029 = vmatpush.bf16.msrb.mxu2 %v8075_v35  ;;  %5116 = vmatpush.bf16.msrb.mxu0 %v8090_v25 }
 0x294   :  { %v4693_v27 = vpop.f32.mrf.mxu2 }
 0x295   :  { %v4736_v45 = vpop.f32.mrf.mxu3  ;;  %4955 = vmatmul.bf16.gmra.mxu0 %v5967_v51  ;;  %v4694_v53 = vadd.f32 %v4693_v27, %v4651_v17  ;;  %v7821_v51 = vld [vmem:[%s10931_s0 + $0x588] sm:$0xf0]  ;;  %v6259_v17 = vor.u32 %v7803_v33, %v6256_v8 }
 0x296   :  { %v4652_v50 = vpop.f32.mrf.mxu1  ;;  %4987 = vmatpush.bf16.msrb.mxu1 %v8066_v1  ;;  %v8120_v1 = vld [vmem:[%s10930_s1 + $0x7f0] sm:$0xff] }
 0x297   :  { %v4737_v2 = vadd.f32 %v4736_v45, %v4694_v53  ;;  %v4653_v18 = vadd.f32 %v4652_v50, %v9690_v6  ;;  %v6100_v6 = vld [vmem:[%s10931_s0 + $0x45c] sm:$0xf0]  ;;  %v6255_v53 = vor.u32 %v7821_v51, %v6254_v19 }
 0x298   :  { %v6103_v3 = vor.u32 %v7765_v54, %v6100_v6  ;;  %v8074_v6 = vld [vmem:[%s10930_s1 + $0x680] sm:$0xff] }
 0x299   :  { %v9961_v60 = vadd.f32 %v4779_v46, %v4737_v2  ;;  %v6262_v46 = vld [vmem:[%s10931_s0 + $0x500] sm:$0xf]  ;;  %5030 = vmatpush.bf16.msrb.mxu2 %v8074_v6 }
 0x29a   :  { %v4781_v55 = vpop.f32.mrf.mxu0  ;;  %v6263_v2 = vor.u32 %v7822_v61, %v6262_v46 }
 0x29c   :  { %v4695_v23 = vpop.f32.mrf.mxu2 }
 0x29d   :  { %v4738_v58 = vpop.f32.mrf.mxu3  ;;  %v4696_v26 = vadd.f32 %v4695_v23, %v4653_v18  ;;  %v6404_v23 = vld [vmem:[%s10931_s0 + $0x6b4] sm:$0xf0] }
 0x29e   :  { %v4655_v13 = vpop.f32.mrf.mxu1 }
 0x29f   :  { %v4739_v37 = vadd.f32 %v4738_v58, %v4696_v26  ;;  %v4656_v29 = vadd.f32 %v4655_v13, %v9714_v28  ;;  %v6402_v13 = vld [vmem:[%s10931_s0 + $0x620] sm:$0xf] }
 0x2a1   :  { %4831 = vmatmul.bf16.gmra.mxu1 %v6103_v3  ;;  %4874 = vmatmul.bf16.gmra.mxu2 %v6107_v5  ;;  %v9979_v10 = vadd.f32 %v4781_v55, %v4739_v37  ;;  %v6396_v5 = vld [vmem:[%s10931_s0 + $0x6ac] sm:$0xf0]  ;;  %v6407_v37 = vor.u32 %v7840_v4, %v6404_v23 }
 0x2a2   :  { %4917 = vmatmul.bf16.gmra.mxu3 %v6111_v52  ;;  %v4784_v14 = vpop.f32.mrf.mxu0  ;;  %v8082_v52 = vld [vmem:[%s10930_s1 + $0x6c0] sm:$0xff] }
 0x2a3   :  { %5073 = vmatpush.bf16.msrb.mxu3 %v8082_v52 }
 0x2a4   :  { %v4698_v36 = vpop.f32.mrf.mxu2 }
 0x2a5   :  { %v4741_v57 = vpop.f32.mrf.mxu3  ;;  %4960 = vmatmul.bf16.gmra.mxu0 %v6115_v59  ;;  %v4699_v30 = vadd.f32 %v4698_v36, %v4656_v29  ;;  %v7858_v59 = vld [vmem:[%s10931_s0 + $0x6b0] sm:$0xf0]  ;;  %v6410_v29 = vld [vmem:[%s10931_s0 + $0x628] sm:$0xf] }
 0x2a6   :  { %v4657_v21 = vpop.f32.mrf.mxu1 }
 0x2a7   :  { %v4742_v20 = vadd.f32 %v4741_v57, %v4699_v30  ;;  %v4658_v41 = vadd.f32 %v4657_v21, %v9735_v47  ;;  %v7802_v47 = vld [vmem:[%s10931_s0 + $0x4f4] sm:$0xf]  ;;  %v6403_v30 = vor.u32 %v7858_v59, %v6402_v13  ;;  %v7657_v59 = vld [vmem:[%s10931_s0 + $0x6c] sm:$0xf] }
 0x2a8   :  { %v6251_v27 = vor.u32 %v7802_v47, %v6248_v31  ;;  %v8113_v47 = vld [vmem:[%s10930_s1 + $0x7b8] sm:$0xff] }
 0x2a9   :  { %v10003_v11 = vadd.f32 %v4784_v14, %v4742_v20  ;;  %v7859_v14 = vld [vmem:[%s10931_s0 + $0x6b8] sm:$0xf0]  ;;  %5195 = vmatpush.bf16.msra.mxu2 %v8113_v47 }
 0x2aa   :  { %v4786_v28 = vpop.f32.mrf.mxu0  ;;  %v6411_v20 = vor.u32 %v7859_v14, %v6410_v29  ;;  %v7656_v29 = vld [vmem:[%s10931_s0 + $0x64] sm:$0xf]  ;;  %v5672_v14 = vld [vmem:[%s10931_s0 + $0xf4] sm:$0xf0] }
 0x2ab   :  { %v5675_v25 = vor.u32 %v7656_v29, %v5672_v14 }
 0x2ac   :  { %v4700_v45 = vpop.f32.mrf.mxu2 }
 0x2ad   :  { %v4743_v39 = vpop.f32.mrf.mxu3  ;;  %v4701_v49 = vadd.f32 %v4700_v45, %v4658_v41  ;;  %v10081_v45 = vld [vmem:[%s10931_s0 + $0x750] sm:$0x11] }
 0x2ae   :  { %v4660_v50 = vpop.f32.mrf.mxu1 }
 0x2af   :  { %v4744_v18 = vadd.f32 %v4743_v39, %v4701_v49  ;;  %v4661_v55 = vadd.f32 %v4660_v50, %v9756_v16  ;;  %v283_v39 = vld [vmem:[%s10931_s0 + $0x748] sm:$0x11]  ;;  %v8105_v49 = vld [vmem:[%s10930_s1 + $0x778] sm:$0xff] }
 0x2b0   :  { %v1597_v61 = vunpack.c.h.b16 %v283_v39  ;;  %5152 = vmatpush.bf16.msra.mxu1 %v8105_v49 }
 0x2b1   :  { %4836 = vmatmul.bf16.gmra.mxu1 %v6251_v27  ;;  %4879 = vmatmul.bf16.gmra.mxu2 %v6255_v53  ;;  %v10024_v7 = vadd.f32 %v4786_v28, %v4744_v18  ;;  %v1595_v27 = vunpack.c.h.b16 %v9792_v38  ;;  %v1596_v53 = vunpack.c.l.b16 %v283_v39  ;;  %v8129_v18 = vld [vmem:[%s10930_s1 + $0x838] sm:$0xff] }
 0x2b2   :  { %4922 = vmatmul.bf16.gmra.mxu3 %v6259_v17  ;;  %v4789_v44 = vpop.f32.mrf.mxu0  ;;  %5281 = vmatpush.bf16.msra.mxu0 %v8129_v18  ;;  %v7694_v18 = vld [vmem:[%s10931_s0 + $0x194] sm:$0xf] }
 0x2b3   :  { %v1855_v6 = vpack.c.b16 %v1596_v53, %v1596_v53 }
 0x2b4   :  { %v4703_v56 = vpop.f32.mrf.mxu2 }
 0x2b5   :  { %v4746_v54 = vpop.f32.mrf.mxu3  ;;  %4965 = vmatmul.bf16.gmra.mxu0 %v6263_v2  ;;  %v4704_v16 = vadd.f32 %v4703_v56, %v4661_v55  ;;  %v1856_v55 = vpack.c.b16 %v1597_v61, %v1597_v61 }
 0x2b6   :  { %v4662_v58 = vpop.f32.mrf.mxu1 }
 0x2b7   :  { %v4747_v63 = vadd.f32 %v4746_v54, %v4704_v16  ;;  %v4663_v12 = vadd.f32 %v4662_v58, %v9777_v24  ;;  %v7839_v24 = vld [vmem:[%s10931_s0 + $0x61c] sm:$0xf]  ;;  %v1854_v54 = vpack.c.b16 %v1595_v27, %v1595_v27 }
 0x2b8   :  { %v6399_v36 = vor.u32 %v7839_v24, %v6396_v5 }
 0x2b9   :  { %v10045_v26 = vadd.f32 %v4789_v44, %v4747_v63 }
 0x2ba   :  { %v4791_v15 = vpop.f32.mrf.mxu0 }
 0x2bc   :  { %v4705_v57 = vpop.f32.mrf.mxu2 }
 0x2bd   :  { %v4748_v3 = vpop.f32.mrf.mxu3  ;;  %v4706_v43 = vadd.f32 %v4705_v57, %v4663_v12  ;;  %v8112_v12 = vld [vmem:[%s10930_s1 + $0x7b0] sm:$0xff] }
 0x2be   :  { %v4665_v21 = vpop.f32.mrf.mxu1  ;;  %5196 = vmatpush.bf16.msra.mxu2 %v8112_v12  ;;  %v7713_v12 = vld [vmem:[%s10931_s0 + $0x228] sm:$0xf0] }
 0x2bf   :  { %v4749_v41 = vadd.f32 %v4748_v3, %v4706_v43  ;;  %v4666_v28 = vadd.f32 %v4665_v21, %v9798_v40  ;;  %v8121_v40 = vld [vmem:[%s10930_s1 + $0x7f8] sm:$0xff]  ;;  %v5678_v43 = vld [vmem:[%s10931_s0 + $0x68] sm:$0xf] }
 0x2c0   :  { %5238 = vmatpush.bf16.msra.mxu3 %v8121_v40 }
 0x2c1   :  { %4841 = vmatmul.bf16.gmra.mxu1 %v6399_v36  ;;  %4884 = vmatmul.bf16.gmra.mxu2 %v6403_v30  ;;  %v10066_v33 = vadd.f32 %v4791_v15, %v4749_v41  ;;  %v7675_v36 = vld [vmem:[%s10931_s0 + $0xf8] sm:$0xf0]  ;;  %v8128_v30 = vld [vmem:[%s10930_s1 + $0x830] sm:$0xff]  ;;  %v7676_v41 = vld [vmem:[%s10931_s0 + $0x100] sm:$0xf0] }
 0x2c2   :  { %4927 = vmatmul.bf16.gmra.mxu3 %v6407_v37  ;;  %v4794_v35 = vpop.f32.mrf.mxu0  ;;  %v5680_v37 = vld [vmem:[%s10931_s0 + $0xfc] sm:$0xf0]  ;;  %5282 = vmatpush.bf16.msra.mxu0 %v8128_v30  ;;  %v7731_v30 = vld [vmem:[%s10931_s0 + $0x2bc] sm:$0xf] }
 0x2c3   :  { %v5683_v21 = vor.u32 %v7657_v59, %v5680_v37 }
 0x2c4   :  { %v4708_v31 = vpop.f32.mrf.mxu2  ;;  %5239 = vmatpush.bf16.msra.mxu3 %v8120_v1 }
 0x2c5   :  { %v4751_v8 = vpop.f32.mrf.mxu3  ;;  %4970 = vmatmul.bf16.gmra.mxu0 %v6411_v20  ;;  %v4709_v19 = vadd.f32 %v4708_v31, %v4666_v28  ;;  %v5686_v20 = vld [vmem:[%s10931_s0 + $0x70] sm:$0xf] }
 0x2c6   :  { %v4667_v51 = vpop.f32.mrf.mxu1  ;;  %v5687_v40 = vor.u32 %v7676_v41, %v5686_v20  ;;  %v7730_v20 = vld [vmem:[%s10931_s0 + $0x2b4] sm:$0xf]  ;;  %v5974_v41 = vld [vmem:[%s10931_s0 + $0x2b8] sm:$0xf] }
 0x2c7   :  { %v4752_v42 = vadd.f32 %v4751_v8, %v4709_v19  ;;  %v4668_v17 = vadd.f32 %v4667_v51, %v9808_v9  ;;  %v1598_v9 = vunpack.c.l.b16 %v10081_v45  ;;  %v5679_v8 = vor.u32 %v7675_v36, %v5678_v43  ;;  %v8111_v51 = vld [vmem:[%s10930_s1 + $0x7a8] sm:$0xff]  ;;  %v8126_v36 = vld [vmem:[%s10930_s1 + $0x820] sm:$0xff] }
 0x2c8   :  { %5197 = vmatpush.bf16.msra.mxu2 %v8111_v51 }
 0x2c9   :  { %v10087_v50 = vadd.f32 %v4794_v35, %v4752_v42  ;;  %v1857_v16 = vpack.c.b16 %v1598_v9, %v1598_v9  ;;  %v8119_v42 = vld [vmem:[%s10930_s1 + $0x7e8] sm:$0xff] }
 0x2ca   :  { %v4796_v46 = vpop.f32.mrf.mxu0  ;;  %5240 = vmatpush.bf16.msra.mxu3 %v8119_v42  ;;  %v8127_v9 = vld [vmem:[%s10930_s1 + $0x828] sm:$0xff] }
 0x2cb   :  { %5283 = vmatpush.bf16.msra.mxu0 %v8127_v9 }
 0x2cc   :  { %v4710_v44 = vpop.f32.mrf.mxu2 }
 0x2cd   :  { %v4753_v2 = vpop.f32.mrf.mxu3  ;;  %v4711_v62 = vadd.f32 %v4710_v44, %v4668_v17  ;;  %v7693_v44 = vld [vmem:[%s10931_s0 + $0x18c] sm:$0xf] }
 0x2ce   :  { %v4670_v56 = vpop.f32.mrf.mxu1 }
 0x2cf   :  { %v4754_v38 = vadd.f32 %v4753_v2, %v4711_v62  ;;  %v4671_v58 = vadd.f32 %v4670_v56, %v9829_v32  ;;  %v8104_v32 = vld [vmem:[%s10930_s1 + $0x770] sm:$0xff]  ;;  %v5820_v62 = vld [vmem:[%s10931_s0 + $0x21c] sm:$0xf0]  ;;  %5284 = vmatpush.bf16.msra.mxu0 %v8126_v36 }
 0x2d0   :  { %5153 = vmatpush.bf16.msra.mxu1 %v8104_v32  ;;  %v5826_v56 = vld [vmem:[%s10931_s0 + $0x190] sm:$0xf]  ;;  %v5823_v1 = vor.u32 %v7693_v44, %v5820_v62 }
 0x2d1   :  { %4846 = vmatmul.bf16.gmra.mxu1 %v1854_v54  ;;  %4889 = vmatmul.bf16.gmra.mxu2 %v1855_v6  ;;  %v10097_v15 = vadd.f32 %v4796_v46, %v4754_v38  ;;  %v8110_v38 = vld [vmem:[%s10930_s1 + $0x7a0] sm:$0xff] }
 0x2d2   :  { %4932 = vmatmul.bf16.gmra.mxu3 %v1856_v55  ;;  %v4799_v63 = vpop.f32.mrf.mxu0  ;;  %v5828_v55 = vld [vmem:[%s10931_s0 + $0x224] sm:$0xf0]  ;;  %5198 = vmatpush.bf16.msra.mxu2 %v8110_v38  ;;  %v8108_v38 = vld [vmem:[%s10930_s1 + $0x790] sm:$0xff] }
 0x2d4   :  { %v4713_v4 = vpop.f32.mrf.mxu2 }
 0x2d5   :  { %v4756_v52 = vpop.f32.mrf.mxu3  ;;  %4975 = vmatmul.bf16.gmra.mxu0 %v1857_v16  ;;  %v4714_v23 = vadd.f32 %v4713_v4, %v4671_v58  ;;  %v7712_v16 = vld [vmem:[%s10931_s0 + $0x220] sm:$0xf0]  ;;  %v5831_v58 = vor.u32 %v7694_v18, %v5828_v55  ;;  %v8125_v55 = vld [vmem:[%s10930_s1 + $0x818] sm:$0xff] }
 0x2d6   :  { %v4672_v24 = vpop.f32.mrf.mxu1  ;;  %v5827_v32 = vor.u32 %v7712_v16, %v5826_v56  ;;  %5285 = vmatpush.bf16.msra.mxu0 %v8125_v55 }
 0x2d7   :  { %v4757_v3 = vadd.f32 %v4756_v52, %v4714_v23  ;;  %v4673_v5 = vadd.f32 %v4672_v24, %v9853_v34 }
 0x2d9   :  { %v10118_v57 = vadd.f32 %v4799_v63, %v4757_v3  ;;  %v5834_v63 = vld [vmem:[%s10931_s0 + $0x198] sm:$0xf] }
 0x2da   :  { %v4801_v13 = vpop.f32.mrf.mxu0  ;;  %v5835_v23 = vor.u32 %v7713_v12, %v5834_v63  ;;  %v6124_v63 = vld [vmem:[%s10931_s0 + $0x474] sm:$0xf0]  ;;  %v7767_v12 = vld [vmem:[%s10931_s0 + $0x3dc] sm:$0xf] }
 0x2dc   :  { %v4715_v28 = vpop.f32.mrf.mxu2 }
 0x2dd   :  { %v4758_v34 = vpop.f32.mrf.mxu3  ;;  %v4716_v35 = vadd.f32 %v4715_v28, %v4673_v5  ;;  %v8118_v5 = vld [vmem:[%s10930_s1 + $0x7e0] sm:$0xff] }
 0x2de   :  { %v4675_v47 = vpop.f32.mrf.mxu1  ;;  %5241 = vmatpush.bf16.msra.mxu3 %v8118_v5  ;;  %v6130_v5 = vld [vmem:[%s10931_s0 + $0x3e8] sm:$0xf] }
 0x2df   :  { %v4759_v31 = vadd.f32 %v4758_v34, %v4716_v35  ;;  %v4676_v39 = vadd.f32 %v4675_v47, %v9873_v48  ;;  %v8103_v48 = vld [vmem:[%s10930_s1 + $0x768] sm:$0xff]  ;;  %v8117_v47 = vld [vmem:[%s10930_s1 + $0x7d8] sm:$0xff] }
 0x2e0   :  { %5154 = vmatpush.bf16.msra.mxu1 %v8103_v48 }
 0x2e1   :  { %4988 = vmatmul.bf16.vlgmr.msrb.gmra.mxu1 %v5675_v25  ;;  %5031 = vmatmul.bf16.vlgmr.msrb.gmra.mxu2 %v5679_v8  ;;  %v10142_v17 = vadd.f32 %v4801_v13, %v4759_v31  ;;  %v8102_v13 = vld [vmem:[%s10930_s1 + $0x760] sm:$0xff]  ;;  %v7749_v25 = vld [vmem:[%s10931_s0 + $0x348] sm:$0xf0]  ;;  %v8109_v8 = vld [vmem:[%s10930_s1 + $0x798] sm:$0xff] }
 0x2e2   :  { %5074 = vmatmul.bf16.vlgmr.msrb.gmra.mxu3 %v5683_v21  ;;  %v4804_v19 = vpop.f32.mrf.mxu0  ;;  %v5976_v21 = vld [vmem:[%s10931_s0 + $0x34c] sm:$0xf0]  ;;  %v5982_v31 = vld [vmem:[%s10931_s0 + $0x2c0] sm:$0xf]  ;;  %5199 = vmatpush.bf16.msra.mxu2 %v8109_v8 }
 0x2e3   :  { %5242 = vmatpush.bf16.msra.mxu3 %v8117_v47 }
 0x2e4   :  { %v4718_v61 = vpop.f32.mrf.mxu2  ;;  %5155 = vmatpush.bf16.msra.mxu1 %v8102_v13  ;;  %v7787_v13 = vld [vmem:[%s10931_s0 + $0x478] sm:$0xf0] }
 0x2e5   :  { %v4761_v46 = vpop.f32.mrf.mxu3  ;;  %5117 = vmatmul.bf16.vlgmr.msrb.gmra.mxu0 %v5687_v40  ;;  %v4719_v49 = vadd.f32 %v4718_v61, %v4676_v39  ;;  %v5979_v40 = vor.u32 %v7731_v30, %v5976_v21  ;;  %v7750_v39 = vld [vmem:[%s10931_s0 + $0x350] sm:$0xf0] }
 0x2e6   :  { %v4677_v27 = vpop.f32.mrf.mxu1  ;;  %v5983_v61 = vor.u32 %v7750_v39, %v5982_v31  ;;  %5200 = vmatpush.bf16.msra.mxu2 %v8108_v38  ;;  %v8115_v31 = vld [vmem:[%s10930_s1 + $0x7c8] sm:$0xff] }
 0x2e7   :  { %v4762_v53 = vadd.f32 %v4761_v46, %v4719_v49  ;;  %v5975_v46 = vor.u32 %v7749_v25, %v5974_v41  ;;  %v7805_v39 = vld [vmem:[%s10931_s0 + $0x50c] sm:$0xf] }
 0x2e9   :  { %v10162_v54 = vadd.f32 %v4804_v19, %v4762_v53 }
 0x2ea   :  { %v4806_v2 = vpop.f32.mrf.mxu0 }
 0x2eb   :  { %v8101_v2 = vld [vmem:[%s10930_s1 + $0x758] sm:$0xff] }
 0x2ec   :  { %v4720_v52 = vpop.f32.mrf.mxu2  ;;  %5156 = vmatpush.bf16.msra.mxu1 %v8101_v2  ;;  %v7824_v2 = vld [vmem:[%s10931_s0 + $0x5a0] sm:$0xf0] }
 0x2ed   :  { %v4763_v6 = vpop.f32.mrf.mxu3  ;;  %v6122_v52 = vld [vmem:[%s10931_s0 + $0x3e0] sm:$0xf] }
 0x2ee   :  { %v4817_v4 = vpop.f32.mrf.mxu1 }
 0x2ef   :  { %v4818_v24 = vadd.f32 %v4817_v4, %v9916_v22  ;;  %v7786_v4 = vld [vmem:[%s10931_s0 + $0x470] sm:$0xf0] }
 0x2f1   :  { %4993 = vmatmul.bf16.gmra.mxu1 %v5823_v1  ;;  %5036 = vmatmul.bf16.gmra.mxu2 %v5827_v32 }
 0x2f2   :  { %5079 = vmatmul.bf16.gmra.mxu3 %v5831_v58  ;;  %v4946_v3 = vpop.f32.mrf.mxu0  ;;  %v7768_v58 = vld [vmem:[%s10931_s0 + $0x3e4] sm:$0xf] }
 0x2f4   :  { %v4860_v37 = vpop.f32.mrf.mxu2 }
 0x2f5   :  { %v4903_v59 = vpop.f32.mrf.mxu3  ;;  %5122 = vmatmul.bf16.gmra.mxu0 %v5835_v23  ;;  %v4861_v29 = vadd.f32 %v4860_v37, %v4818_v24  ;;  %v8116_v23 = vld [vmem:[%s10930_s1 + $0x7d0] sm:$0xff] }
 0x2f6   :  { %v4819_v14 = vpop.f32.mrf.mxu1  ;;  %v8100_v24 = vld [vmem:[%s10930_s1 + $0x750] sm:$0xff]  ;;  %5243 = vmatpush.bf16.msra.mxu3 %v8116_v23 }
 0x2f7   :  { %v4904_v22 = vadd.f32 %v4903_v59, %v4861_v29  ;;  %v4820_v34 = vadd.f32 %v4819_v14, %v9937_v0  ;;  %v5968_v0 = vld [vmem:[%s10931_s0 + $0x344] sm:$0xf0]  ;;  %5157 = vmatpush.bf16.msra.mxu1 %v8100_v24  ;;  %v6123_v14 = vor.u32 %v7786_v4, %v6122_v52 }
 0x2f8   :  { %v5971_v42 = vor.u32 %v7730_v20, %v5968_v0  ;;  %v8124_v0 = vld [vmem:[%s10930_s1 + $0x810] sm:$0xff] }
 0x2f9   :  { %v10205_v28 = vadd.f32 %v4946_v3, %v4904_v22  ;;  %v6127_v3 = vor.u32 %v7768_v58, %v6124_v63  ;;  %5286 = vmatpush.bf16.msra.mxu0 %v8124_v0  ;;  %v8123_v58 = vld [vmem:[%s10930_s1 + $0x808] sm:$0xff] }
 0x2fa   :  { %v4948_v43 = vpop.f32.mrf.mxu0  ;;  %5244 = vmatpush.bf16.msra.mxu3 %v8115_v31  ;;  %v8122_v31 = vld [vmem:[%s10930_s1 + $0x800] sm:$0xff] }
 0x2fc   :  { %v4862_v19 = vpop.f32.mrf.mxu2 }
 0x2fd   :  { %v4905_v35 = vpop.f32.mrf.mxu3  ;;  %v4863_v51 = vadd.f32 %v4862_v19, %v4820_v34  ;;  %v6131_v34 = vor.u32 %v7787_v13, %v6130_v5  ;;  %v6272_v19 = vld [vmem:[%s10931_s0 + $0x59c] sm:$0xf0]  ;;  %5287 = vmatpush.bf16.msra.mxu0 %v8123_v58  ;;  %v7842_v13 = vld [vmem:[%s10931_s0 + $0x634] sm:$0xf] }
 0x2fe   :  { %v4822_v48 = vpop.f32.mrf.mxu1  ;;  %v8098_v5 = vld [vmem:[%s10930_s1 + $0x740] sm:$0xff] }
 0x2ff   :  { %v4906_v49 = vadd.f32 %v4905_v35, %v4863_v51  ;;  %v4823_v27 = vadd.f32 %v4822_v48, %v9961_v60  ;;  %v6264_v51 = vld [vmem:[%s10931_s0 + $0x594] sm:$0xf0]  ;;  %v6270_v48 = vld [vmem:[%s10931_s0 + $0x508] sm:$0xf] }
 0x301   :  { %4998 = vmatmul.bf16.gmra.mxu1 %v5971_v42  ;;  %5041 = vmatmul.bf16.gmra.mxu2 %v5975_v46  ;;  %v10226_v9 = vadd.f32 %v4948_v43, %v4906_v49  ;;  %v8099_v49 = vld [vmem:[%s10930_s1 + $0x748] sm:$0xff] }
 0x302   :  { %5084 = vmatmul.bf16.gmra.mxu3 %v5979_v40  ;;  %v4951_v53 = vpop.f32.mrf.mxu0  ;;  %v8107_v40 = vld [vmem:[%s10930_s1 + $0x788] sm:$0xff]  ;;  %5158 = vmatpush.bf16.msra.mxu1 %v8099_v49 }
 0x303   :  { %5201 = vmatpush.bf16.msra.mxu2 %v8107_v40  ;;  %5288 = vmatpush.bf16.msra.mxu0 %v8122_v31 }
 0x304   :  { %v4865_v44 = vpop.f32.mrf.mxu2 }
 0x305   :  { %v4908_v18 = vpop.f32.mrf.mxu3  ;;  %5127 = vmatmul.bf16.gmra.mxu0 %v5983_v61  ;;  %v4866_v60 = vadd.f32 %v4865_v44, %v4823_v27  ;;  %v7823_v61 = vld [vmem:[%s10931_s0 + $0x598] sm:$0xf0]  ;;  %v6275_v27 = vor.u32 %v7805_v39, %v6272_v19 }
 0x306   :  { %v4824_v62 = vpop.f32.mrf.mxu1  ;;  %5159 = vmatpush.bf16.msra.mxu1 %v8098_v5  ;;  %v8152_v5 = vld [vmem:[%s10930_s1 + $0x8f0] sm:$0xff] }
 0x307   :  { %v4909_v6 = vadd.f32 %v4908_v18, %v4866_v60  ;;  %v4825_v56 = vadd.f32 %v4824_v62, %v9979_v10  ;;  %v6116_v10 = vld [vmem:[%s10931_s0 + $0x46c] sm:$0xf0]  ;;  %v6271_v60 = vor.u32 %v7823_v61, %v6270_v48 }
 0x308   :  { %v6119_v29 = vor.u32 %v7767_v12, %v6116_v10  ;;  %v8106_v10 = vld [vmem:[%s10930_s1 + $0x780] sm:$0xff] }
 0x309   :  { %v10250_v1 = vadd.f32 %v4951_v53, %v4909_v6  ;;  %v6278_v53 = vld [vmem:[%s10931_s0 + $0x510] sm:$0xf]  ;;  %5202 = vmatpush.bf16.msra.mxu2 %v8106_v10 }
 0x30a   :  { %v4953_v16 = vpop.f32.mrf.mxu0  ;;  %v6279_v6 = vor.u32 %v7824_v2, %v6278_v53 }
 0x30c   :  { %v4867_v59 = vpop.f32.mrf.mxu2 }
 0x30d   :  { %v4910_v32 = vpop.f32.mrf.mxu3  ;;  %v4868_v37 = vadd.f32 %v4867_v59, %v4825_v56  ;;  %v6420_v59 = vld [vmem:[%s10931_s0 + $0x6c4] sm:$0xf0] }
 0x30e   :  { %v4827_v22 = vpop.f32.mrf.mxu1 }
 0x30f   :  { %v4911_v43 = vadd.f32 %v4910_v32, %v4868_v37  ;;  %v4828_v36 = vadd.f32 %v4827_v22, %v10003_v11  ;;  %v6418_v22 = vld [vmem:[%s10931_s0 + $0x630] sm:$0xf] }
 0x311   :  { %5003 = vmatmul.bf16.gmra.mxu1 %v6119_v29  ;;  %5046 = vmatmul.bf16.gmra.mxu2 %v6123_v14  ;;  %v10268_v21 = vadd.f32 %v4953_v16, %v4911_v43  ;;  %v6412_v14 = vld [vmem:[%s10931_s0 + $0x6bc] sm:$0xf0]  ;;  %v6423_v43 = vor.u32 %v7842_v13, %v6420_v59 }
 0x312   :  { %5089 = vmatmul.bf16.gmra.mxu3 %v6127_v3  ;;  %v4956_v30 = vpop.f32.mrf.mxu0  ;;  %v8114_v3 = vld [vmem:[%s10930_s1 + $0x7c0] sm:$0xff] }
 0x313   :  { %5245 = vmatpush.bf16.msra.mxu3 %v8114_v3 }
 0x314   :  { %v4870_v41 = vpop.f32.mrf.mxu2 }
 0x315   :  { %v4913_v20 = vpop.f32.mrf.mxu3  ;;  %5132 = vmatmul.bf16.gmra.mxu0 %v6131_v34  ;;  %v4871_v35 = vadd.f32 %v4870_v41, %v4828_v36  ;;  %v7860_v34 = vld [vmem:[%s10931_s0 + $0x6c0] sm:$0xf0]  ;;  %v6426_v36 = vld [vmem:[%s10931_s0 + $0x638] sm:$0xf] }
 0x316   :  { %v4829_v25 = vpop.f32.mrf.mxu1 }
 0x317   :  { %v4914_v8 = vadd.f32 %v4913_v20, %v4871_v35  ;;  %v4830_v47 = vadd.f32 %v4829_v25, %v10024_v7  ;;  %v7804_v7 = vld [vmem:[%s10931_s0 + $0x504] sm:$0xf]  ;;  %v6419_v35 = vor.u32 %v7860_v34, %v6418_v22  ;;  %v7659_v34 = vld [vmem:[%s10931_s0 + $0x7c] sm:$0xf] }
 0x318   :  { %v6267_v44 = vor.u32 %v7804_v7, %v6264_v51  ;;  %v8145_v7 = vld [vmem:[%s10930_s1 + $0x8b8] sm:$0xff] }
 0x319   :  { %v10292_v42 = vadd.f32 %v4956_v30, %v4914_v8  ;;  %v7861_v30 = vld [vmem:[%s10931_s0 + $0x6c8] sm:$0xf0]  ;;  %5367 = vmatpush.bf16.msrb.mxu2 %v8145_v7 }
 0x31a   :  { %v4958_v11 = vpop.f32.mrf.mxu0  ;;  %v6427_v8 = vor.u32 %v7861_v30, %v6426_v36  ;;  %v7658_v36 = vld [vmem:[%s10931_s0 + $0x74] sm:$0xf]  ;;  %v5688_v30 = vld [vmem:[%s10931_s0 + $0x104] sm:$0xf0] }
 0x31b   :  { %v5691_v31 = vor.u32 %v7658_v36, %v5688_v30 }
 0x31c   :  { %v4872_v18 = vpop.f32.mrf.mxu2 }
 0x31d   :  { %v4915_v46 = vpop.f32.mrf.mxu3  ;;  %v4873_v55 = vadd.f32 %v4872_v18, %v4830_v47  ;;  %v10370_v18 = vld [vmem:[%s10931_s0 + $0x760] sm:$0x11] }
 0x31e   :  { %v4832_v62 = vpop.f32.mrf.mxu1 }
 0x31f   :  { %v4916_v56 = vadd.f32 %v4915_v46, %v4873_v55  ;;  %v4833_v16 = vadd.f32 %v4832_v62, %v10045_v26  ;;  %v285_v46 = vld [vmem:[%s10931_s0 + $0x758] sm:$0x11] }
 0x320   :  { %v1601_v2 = vunpack.c.h.b16 %v285_v46  ;;  %v8137_v55 = vld [vmem:[%s10930_s1 + $0x878] sm:$0xff] }
 0x321   :  { %5008 = vmatmul.bf16.gmra.mxu1 %v6267_v44  ;;  %5051 = vmatmul.bf16.gmra.mxu2 %v6271_v60  ;;  %v10313_v63 = vadd.f32 %v4958_v11, %v4916_v56  ;;  %v1599_v44 = vunpack.c.h.b16 %v10081_v45  ;;  %v1600_v60 = vunpack.c.l.b16 %v285_v46  ;;  %v8161_v56 = vld [vmem:[%s10930_s1 + $0x938] sm:$0xff] }
 0x322   :  { %5094 = vmatmul.bf16.gmra.mxu3 %v6275_v27  ;;  %v4961_v38 = vpop.f32.mrf.mxu0  ;;  %5324 = vmatpush.bf16.msrb.mxu1 %v8137_v55 }
 0x323   :  { %5453 = vmatpush.bf16.msrb.mxu0 %v8161_v56  ;;  %v1859_v10 = vpack.c.b16 %v1600_v60, %v1600_v60  ;;  %v7696_v56 = vld [vmem:[%s10931_s0 + $0x1a4] sm:$0xf] }
 0x324   :  { %v4875_v52 = vpop.f32.mrf.mxu2 }
 0x325   :  { %v4918_v12 = vpop.f32.mrf.mxu3  ;;  %5137 = vmatmul.bf16.gmra.mxu0 %v6279_v6  ;;  %v4876_v26 = vadd.f32 %v4875_v52, %v4833_v16  ;;  %v1860_v16 = vpack.c.b16 %v1601_v2, %v1601_v2 }
 0x326   :  { %v4834_v32 = vpop.f32.mrf.mxu1 }
 0x327   :  { %v4919_v4 = vadd.f32 %v4918_v12, %v4876_v26  ;;  %v4835_v23 = vadd.f32 %v4834_v32, %v10066_v33  ;;  %v7841_v33 = vld [vmem:[%s10931_s0 + $0x62c] sm:$0xf]  ;;  %v1858_v12 = vpack.c.b16 %v1599_v44, %v1599_v44 }
 0x328   :  { %v6415_v41 = vor.u32 %v7841_v33, %v6412_v14 }
 0x329   :  { %v10334_v37 = vadd.f32 %v4961_v38, %v4919_v4 }
 0x32a   :  { %v4963_v24 = vpop.f32.mrf.mxu0 }
 0x32c   :  { %v4877_v20 = vpop.f32.mrf.mxu2 }
 0x32d   :  { %v4920_v29 = vpop.f32.mrf.mxu3  ;;  %v4878_v0 = vadd.f32 %v4877_v20, %v4835_v23  ;;  %v8144_v23 = vld [vmem:[%s10930_s1 + $0x8b0] sm:$0xff] }
 0x32e   :  { %v4837_v25 = vpop.f32.mrf.mxu1  ;;  %5368 = vmatpush.bf16.msrb.mxu2 %v8144_v23  ;;  %v7715_v23 = vld [vmem:[%s10931_s0 + $0x238] sm:$0xf0] }
 0x32f   :  { %v4921_v47 = vadd.f32 %v4920_v29, %v4878_v0  ;;  %v4838_v11 = vadd.f32 %v4837_v25, %v10087_v50  ;;  %v8153_v50 = vld [vmem:[%s10930_s1 + $0x8f8] sm:$0xff] }
 0x330   :  { %5410 = vmatpush.bf16.msrb.mxu3 %v8153_v50  ;;  %v5694_v0 = vld [vmem:[%s10931_s0 + $0x78] sm:$0xf] }
 0x331   :  { %5013 = vmatmul.bf16.gmra.mxu1 %v6415_v41  ;;  %5056 = vmatmul.bf16.gmra.mxu2 %v6419_v35  ;;  %v10355_v39 = vadd.f32 %v4963_v24, %v4921_v47  ;;  %v7677_v41 = vld [vmem:[%s10931_s0 + $0x108] sm:$0xf0]  ;;  %v8160_v35 = vld [vmem:[%s10930_s1 + $0x930] sm:$0xff] }
 0x332   :  { %5099 = vmatmul.bf16.gmra.mxu3 %v6423_v43  ;;  %v4966_v40 = vpop.f32.mrf.mxu0  ;;  %v5696_v43 = vld [vmem:[%s10931_s0 + $0x10c] sm:$0xf0]  ;;  %v7678_v47 = vld [vmem:[%s10931_s0 + $0x110] sm:$0xf0]  ;;  %5454 = vmatpush.bf16.msrb.mxu0 %v8160_v35  ;;  %v7733_v35 = vld [vmem:[%s10931_s0 + $0x2cc] sm:$0xf] }
 0x333   :  { %v5699_v25 = vor.u32 %v7659_v34, %v5696_v43 }
 0x334   :  { %v4880_v51 = vpop.f32.mrf.mxu2  ;;  %5411 = vmatpush.bf16.msrb.mxu3 %v8152_v5 }
 0x335   :  { %v4923_v19 = vpop.f32.mrf.mxu3  ;;  %5142 = vmatmul.bf16.gmra.mxu0 %v6427_v8  ;;  %v4881_v48 = vadd.f32 %v4880_v51, %v4838_v11  ;;  %v5702_v8 = vld [vmem:[%s10931_s0 + $0x80] sm:$0xf] }
 0x336   :  { %v4839_v61 = vpop.f32.mrf.mxu1  ;;  %v5703_v50 = vor.u32 %v7678_v47, %v5702_v8  ;;  %v7732_v8 = vld [vmem:[%s10931_s0 + $0x2c4] sm:$0xf]  ;;  %v5990_v47 = vld [vmem:[%s10931_s0 + $0x2c8] sm:$0xf] }
 0x337   :  { %v4924_v49 = vadd.f32 %v4923_v19, %v4881_v48  ;;  %v4840_v27 = vadd.f32 %v4839_v61, %v10097_v15  ;;  %v1602_v15 = vunpack.c.l.b16 %v10370_v18  ;;  %v5695_v19 = vor.u32 %v7677_v41, %v5694_v0  ;;  %v8143_v61 = vld [vmem:[%s10930_s1 + $0x8a8] sm:$0xff]  ;;  %v8158_v41 = vld [vmem:[%s10930_s1 + $0x920] sm:$0xff] }
 0x338   :  { %5369 = vmatpush.bf16.msrb.mxu2 %v8143_v61 }
 0x339   :  { %v10376_v62 = vadd.f32 %v4966_v40, %v4924_v49  ;;  %v1861_v26 = vpack.c.b16 %v1602_v15, %v1602_v15  ;;  %v8151_v49 = vld [vmem:[%s10930_s1 + $0x8e8] sm:$0xff] }
 0x33a   :  { %v4968_v53 = vpop.f32.mrf.mxu0  ;;  %5412 = vmatpush.bf16.msrb.mxu3 %v8151_v49  ;;  %v8159_v15 = vld [vmem:[%s10930_s1 + $0x928] sm:$0xff] }
 0x33b   :  { %5455 = vmatpush.bf16.msrb.mxu0 %v8159_v15 }
 0x33c   :  { %v4882_v38 = vpop.f32.mrf.mxu2 }
 0x33d   :  { %v4925_v6 = vpop.f32.mrf.mxu3  ;;  %v4883_v58 = vadd.f32 %v4882_v38, %v4840_v27  ;;  %v7695_v38 = vld [vmem:[%s10931_s0 + $0x19c] sm:$0xf] }
 0x33e   :  { %v4842_v52 = vpop.f32.mrf.mxu1 }
 0x33f   :  { %v4926_v45 = vadd.f32 %v4925_v6, %v4883_v58  ;;  %v4843_v32 = vadd.f32 %v4842_v52, %v10118_v57  ;;  %v8136_v57 = vld [vmem:[%s10930_s1 + $0x870] sm:$0xff]  ;;  %v5842_v52 = vld [vmem:[%s10931_s0 + $0x1a0] sm:$0xf]  ;;  %5456 = vmatpush.bf16.msrb.mxu0 %v8158_v41 }
 0x340   :  { %5325 = vmatpush.bf16.msrb.mxu1 %v8136_v57  ;;  %v5836_v58 = vld [vmem:[%s10931_s0 + $0x22c] sm:$0xf0] }
 0x341   :  { %5018 = vmatmul.bf16.gmra.mxu1 %v1858_v12  ;;  %5061 = vmatmul.bf16.gmra.mxu2 %v1859_v10  ;;  %v10386_v24 = vadd.f32 %v4968_v53, %v4926_v45  ;;  %v8142_v45 = vld [vmem:[%s10930_s1 + $0x8a0] sm:$0xff]  ;;  %v5839_v5 = vor.u32 %v7695_v38, %v5836_v58 }
 0x342   :  { %5104 = vmatmul.bf16.gmra.mxu3 %v1860_v16  ;;  %v4971_v4 = vpop.f32.mrf.mxu0  ;;  %v5844_v16 = vld [vmem:[%s10931_s0 + $0x234] sm:$0xf0]  ;;  %5370 = vmatpush.bf16.msrb.mxu2 %v8142_v45  ;;  %v8140_v45 = vld [vmem:[%s10930_s1 + $0x890] sm:$0xff] }
 0x344   :  { %v4885_v13 = vpop.f32.mrf.mxu2 }
 0x345   :  { %v4928_v3 = vpop.f32.mrf.mxu3  ;;  %5147 = vmatmul.bf16.gmra.mxu0 %v1861_v26  ;;  %v4886_v59 = vadd.f32 %v4885_v13, %v4843_v32  ;;  %v7714_v26 = vld [vmem:[%s10931_s0 + $0x230] sm:$0xf0]  ;;  %v5847_v32 = vor.u32 %v7696_v56, %v5844_v16  ;;  %v8157_v16 = vld [vmem:[%s10930_s1 + $0x918] sm:$0xff] }
 0x346   :  { %v4844_v33 = vpop.f32.mrf.mxu1  ;;  %v5843_v57 = vor.u32 %v7714_v26, %v5842_v52  ;;  %5457 = vmatpush.bf16.msrb.mxu0 %v8157_v16 }
 0x347   :  { %v4929_v29 = vadd.f32 %v4928_v3, %v4886_v59  ;;  %v4845_v14 = vadd.f32 %v4844_v33, %v10142_v17 }
 0x349   :  { %v10407_v20 = vadd.f32 %v4971_v4, %v4929_v29  ;;  %v5850_v4 = vld [vmem:[%s10931_s0 + $0x1a8] sm:$0xf] }
 0x34a   :  { %v4973_v22 = vpop.f32.mrf.mxu0  ;;  %v5851_v59 = vor.u32 %v7715_v23, %v5850_v4  ;;  %v6140_v4 = vld [vmem:[%s10931_s0 + $0x484] sm:$0xf0]  ;;  %v7769_v23 = vld [vmem:[%s10931_s0 + $0x3ec] sm:$0xf] }
 0x34c   :  { %v4887_v11 = vpop.f32.mrf.mxu2 }
 0x34d   :  { %v4930_v17 = vpop.f32.mrf.mxu3  ;;  %v4888_v40 = vadd.f32 %v4887_v11, %v4845_v14  ;;  %v8150_v14 = vld [vmem:[%s10930_s1 + $0x8e0] sm:$0xff] }
 0x34e   :  { %v4847_v7 = vpop.f32.mrf.mxu1  ;;  %5413 = vmatpush.bf16.msrb.mxu3 %v8150_v14  ;;  %v6146_v14 = vld [vmem:[%s10931_s0 + $0x3f8] sm:$0xf] }
 0x34f   :  { %v4931_v51 = vadd.f32 %v4930_v17, %v4888_v40  ;;  %v4848_v46 = vadd.f32 %v4847_v7, %v10162_v54  ;;  %v8135_v54 = vld [vmem:[%s10930_s1 + $0x868] sm:$0xff]  ;;  %v8149_v7 = vld [vmem:[%s10930_s1 + $0x8d8] sm:$0xff] }
 0x350   :  { %5326 = vmatpush.bf16.msrb.mxu1 %v8135_v54 }
 0x351   :  { %5160 = vmatmul.bf16.vlgmr.msra.gmra.mxu1 %v5691_v31  ;;  %5203 = vmatmul.bf16.vlgmr.msra.gmra.mxu2 %v5695_v19  ;;  %v10431_v27 = vadd.f32 %v4973_v22, %v4931_v51  ;;  %v8134_v22 = vld [vmem:[%s10930_s1 + $0x860] sm:$0xff]  ;;  %v7751_v31 = vld [vmem:[%s10931_s0 + $0x358] sm:$0xf0]  ;;  %v5998_v51 = vld [vmem:[%s10931_s0 + $0x2d0] sm:$0xf] }
 0x352   :  { %5246 = vmatmul.bf16.vlgmr.msra.gmra.mxu3 %v5699_v25  ;;  %v4976_v48 = vpop.f32.mrf.mxu0  ;;  %v5992_v25 = vld [vmem:[%s10931_s0 + $0x35c] sm:$0xf0]  ;;  %v8141_v19 = vld [vmem:[%s10930_s1 + $0x898] sm:$0xff] }
 0x353   :  { %5371 = vmatpush.bf16.msrb.mxu2 %v8141_v19  ;;  %5414 = vmatpush.bf16.msrb.mxu3 %v8149_v7 }
 0x354   :  { %v4890_v2 = vpop.f32.mrf.mxu2  ;;  %5327 = vmatpush.bf16.msrb.mxu1 %v8134_v22  ;;  %v7789_v22 = vld [vmem:[%s10931_s0 + $0x488] sm:$0xf0] }
 0x355   :  { %v4933_v53 = vpop.f32.mrf.mxu3  ;;  %5289 = vmatmul.bf16.vlgmr.msra.gmra.mxu0 %v5703_v50  ;;  %v4891_v55 = vadd.f32 %v4890_v2, %v4848_v46  ;;  %v5995_v50 = vor.u32 %v7733_v35, %v5992_v25  ;;  %v7752_v46 = vld [vmem:[%s10931_s0 + $0x360] sm:$0xf0] }
 0x356   :  { %v4849_v44 = vpop.f32.mrf.mxu1  ;;  %v5999_v2 = vor.u32 %v7752_v46, %v5998_v51  ;;  %v8147_v51 = vld [vmem:[%s10930_s1 + $0x8c8] sm:$0xff]  ;;  %v7807_v46 = vld [vmem:[%s10931_s0 + $0x51c] sm:$0xf] }
 0x357   :  { %v4934_v60 = vadd.f32 %v4933_v53, %v4891_v55  ;;  %v5991_v53 = vor.u32 %v7751_v31, %v5990_v47  ;;  %5372 = vmatpush.bf16.msrb.mxu2 %v8140_v45 }
 0x359   :  { %v10451_v12 = vadd.f32 %v4976_v48, %v4934_v60 }
 0x35a   :  { %v4978_v6 = vpop.f32.mrf.mxu0 }
 0x35b   :  { %v8133_v6 = vld [vmem:[%s10930_s1 + $0x858] sm:$0xff] }
 0x35c   :  { %v4892_v3 = vpop.f32.mrf.mxu2  ;;  %5328 = vmatpush.bf16.msrb.mxu1 %v8133_v6  ;;  %v7826_v6 = vld [vmem:[%s10931_s0 + $0x5b0] sm:$0xf0] }
 0x35d   :  { %v4935_v10 = vpop.f32.mrf.mxu3  ;;  %v6138_v3 = vld [vmem:[%s10931_s0 + $0x3f0] sm:$0xf] }
 0x35e   :  { %v4989_v13 = vpop.f32.mrf.mxu1 }
 0x35f   :  { %v4990_v33 = vadd.f32 %v4989_v13, %v10205_v28  ;;  %v7788_v13 = vld [vmem:[%s10931_s0 + $0x480] sm:$0xf0] }
 0x361   :  { %5165 = vmatmul.bf16.gmra.mxu1 %v5839_v5  ;;  %5208 = vmatmul.bf16.gmra.mxu2 %v5843_v57 }
 0x362   :  { %5251 = vmatmul.bf16.gmra.mxu3 %v5847_v32  ;;  %v5118_v29 = vpop.f32.mrf.mxu0  ;;  %v7770_v32 = vld [vmem:[%s10931_s0 + $0x3f4] sm:$0xf] }
 0x364   :  { %v5032_v43 = vpop.f32.mrf.mxu2 }
 0x365   :  { %v5075_v34 = vpop.f32.mrf.mxu3  ;;  %5294 = vmatmul.bf16.gmra.mxu0 %v5851_v59  ;;  %v5033_v36 = vadd.f32 %v5032_v43, %v4990_v33  ;;  %v8148_v59 = vld [vmem:[%s10930_s1 + $0x8d0] sm:$0xff] }
 0x366   :  { %v4991_v30 = vpop.f32.mrf.mxu1  ;;  %v8132_v33 = vld [vmem:[%s10930_s1 + $0x850] sm:$0xff]  ;;  %5415 = vmatpush.bf16.msrb.mxu3 %v8148_v59 }
 0x367   :  { %v5076_v28 = vadd.f32 %v5075_v34, %v5033_v36  ;;  %v4992_v17 = vadd.f32 %v4991_v30, %v10226_v9  ;;  %v5984_v9 = vld [vmem:[%s10931_s0 + $0x354] sm:$0xf0]  ;;  %5329 = vmatpush.bf16.msrb.mxu1 %v8132_v33  ;;  %v6139_v30 = vor.u32 %v7788_v13, %v6138_v3 }
 0x368   :  { %v5987_v49 = vor.u32 %v7732_v8, %v5984_v9  ;;  %v8156_v9 = vld [vmem:[%s10930_s1 + $0x910] sm:$0xff] }
 0x369   :  { %v10494_v11 = vadd.f32 %v5118_v29, %v5076_v28  ;;  %v6143_v29 = vor.u32 %v7770_v32, %v6140_v4  ;;  %5458 = vmatpush.bf16.msrb.mxu0 %v8156_v9  ;;  %v8155_v32 = vld [vmem:[%s10930_s1 + $0x908] sm:$0xff] }
 0x36a   :  { %v5120_v0 = vpop.f32.mrf.mxu0  ;;  %5416 = vmatpush.bf16.msrb.mxu3 %v8147_v51  ;;  %v8154_v51 = vld [vmem:[%s10930_s1 + $0x900] sm:$0xff] }
 0x36c   :  { %v5034_v48 = vpop.f32.mrf.mxu2 }
 0x36d   :  { %v5077_v40 = vpop.f32.mrf.mxu3  ;;  %v5035_v61 = vadd.f32 %v5034_v48, %v4992_v17  ;;  %v6147_v17 = vor.u32 %v7789_v22, %v6146_v14  ;;  %v6288_v48 = vld [vmem:[%s10931_s0 + $0x5ac] sm:$0xf0]  ;;  %5459 = vmatpush.bf16.msrb.mxu0 %v8155_v32  ;;  %v8130_v14 = vld [vmem:[%s10930_s1 + $0x840] sm:$0xff] }
 0x36e   :  { %v4994_v54 = vpop.f32.mrf.mxu1  ;;  %v7844_v22 = vld [vmem:[%s10931_s0 + $0x644] sm:$0xf] }
 0x36f   :  { %v5078_v55 = vadd.f32 %v5077_v40, %v5035_v61  ;;  %v4995_v44 = vadd.f32 %v4994_v54, %v10250_v1  ;;  %v6280_v61 = vld [vmem:[%s10931_s0 + $0x5a4] sm:$0xf0]  ;;  %v6286_v54 = vld [vmem:[%s10931_s0 + $0x518] sm:$0xf] }
 0x371   :  { %5170 = vmatmul.bf16.gmra.mxu1 %v5987_v49  ;;  %5213 = vmatmul.bf16.gmra.mxu2 %v5991_v53  ;;  %v10515_v15 = vadd.f32 %v5120_v0, %v5078_v55  ;;  %v8131_v55 = vld [vmem:[%s10930_s1 + $0x848] sm:$0xff] }
 0x372   :  { %5256 = vmatmul.bf16.gmra.mxu3 %v5995_v50  ;;  %v5123_v60 = vpop.f32.mrf.mxu0  ;;  %v8139_v50 = vld [vmem:[%s10930_s1 + $0x888] sm:$0xff]  ;;  %5330 = vmatpush.bf16.msrb.mxu1 %v8131_v55 }
 0x373   :  { %5373 = vmatpush.bf16.msrb.mxu2 %v8139_v50  ;;  %5460 = vmatpush.bf16.msrb.mxu0 %v8154_v51 }
 0x374   :  { %v5037_v38 = vpop.f32.mrf.mxu2 }
 0x375   :  { %v5080_v56 = vpop.f32.mrf.mxu3  ;;  %5299 = vmatmul.bf16.gmra.mxu0 %v5999_v2  ;;  %v5038_v1 = vadd.f32 %v5037_v38, %v4995_v44  ;;  %v7825_v2 = vld [vmem:[%s10931_s0 + $0x5a8] sm:$0xf0]  ;;  %v6291_v44 = vor.u32 %v7807_v46, %v6288_v48 }
 0x376   :  { %v4996_v58 = vpop.f32.mrf.mxu1  ;;  %5331 = vmatpush.bf16.msrb.mxu1 %v8130_v14 }
 0x377   :  { %v5081_v10 = vadd.f32 %v5080_v56, %v5038_v1  ;;  %v4997_v52 = vadd.f32 %v4996_v58, %v10268_v21  ;;  %v6132_v21 = vld [vmem:[%s10931_s0 + $0x47c] sm:$0xf0]  ;;  %v6287_v1 = vor.u32 %v7825_v2, %v6286_v54 }
 0x378   :  { %v6135_v36 = vor.u32 %v7769_v23, %v6132_v21  ;;  %v8138_v21 = vld [vmem:[%s10930_s1 + $0x880] sm:$0xff] }
 0x379   :  { %v10539_v5 = vadd.f32 %v5123_v60, %v5081_v10  ;;  %v6294_v60 = vld [vmem:[%s10931_s0 + $0x520] sm:$0xf]  ;;  %5374 = vmatpush.bf16.msrb.mxu2 %v8138_v21 }
 0x37a   :  { %v5125_v26 = vpop.f32.mrf.mxu0  ;;  %v6295_v10 = vor.u32 %v7826_v6, %v6294_v60  ;;  %v10653_v60 = vld [vmem:[%s10931_s0 + $0x770] sm:$0x11]  ;;  %v1603_v6 = vunpack.c.h.b16 %v10370_v18 }
 0x37c   :  { %v5039_v34 = vpop.f32.mrf.mxu2 }
 0x37d   :  { %v5082_v57 = vpop.f32.mrf.mxu3  ;;  %v5040_v43 = vadd.f32 %v5039_v34, %v4997_v52  ;;  %v6436_v34 = vld [vmem:[%s10931_s0 + $0x6d4] sm:$0xf0] }
 0x37e   :  { %v4999_v28 = vpop.f32.mrf.mxu1 }
 0x37f   :  { %v5083_v0 = vadd.f32 %v5082_v57, %v5040_v43  ;;  %v5000_v41 = vadd.f32 %v4999_v28, %v10292_v42  ;;  %v6434_v28 = vld [vmem:[%s10931_s0 + $0x640] sm:$0xf] }
 0x381   :  { %5175 = vmatmul.bf16.gmra.mxu1 %v6135_v36  ;;  %5218 = vmatmul.bf16.gmra.mxu2 %v6139_v30  ;;  %v10557_v25 = vadd.f32 %v5125_v26, %v5083_v0  ;;  %v6428_v30 = vld [vmem:[%s10931_s0 + $0x6cc] sm:$0xf0]  ;;  %v6439_v0 = vor.u32 %v7844_v22, %v6436_v34  ;;  %v7661_v22 = vld [vmem:[%s10931_s0 + $0x8c] sm:$0xf]  ;;  %v7660_v34 = vld [vmem:[%s10931_s0 + $0x84] sm:$0xf] }
 0x382   :  { %5261 = vmatmul.bf16.gmra.mxu3 %v6143_v29  ;;  %v5128_v35 = vpop.f32.mrf.mxu0  ;;  %v8146_v29 = vld [vmem:[%s10930_s1 + $0x8c0] sm:$0xff] }
 0x383   :  { %5417 = vmatpush.bf16.msrb.mxu3 %v8146_v29 }
 0x384   :  { %v5042_v47 = vpop.f32.mrf.mxu2 }
 0x385   :  { %v5085_v8 = vpop.f32.mrf.mxu3  ;;  %5304 = vmatmul.bf16.gmra.mxu0 %v6147_v17  ;;  %v5043_v40 = vadd.f32 %v5042_v47, %v5000_v41  ;;  %v7862_v17 = vld [vmem:[%s10931_s0 + $0x6d0] sm:$0xf0]  ;;  %v6442_v41 = vld [vmem:[%s10931_s0 + $0x648] sm:$0xf] }
 0x386   :  { %v5001_v31 = vpop.f32.mrf.mxu1 }
 0x387   :  { %v5086_v19 = vadd.f32 %v5085_v8, %v5043_v40  ;;  %v5002_v7 = vadd.f32 %v5001_v31, %v10313_v63  ;;  %v7806_v63 = vld [vmem:[%s10931_s0 + $0x514] sm:$0xf]  ;;  %v6435_v40 = vor.u32 %v7862_v17, %v6434_v28  ;;  %v7679_v28 = vld [vmem:[%s10931_s0 + $0x118] sm:$0xf0] }
 0x388   :  { %v6283_v38 = vor.u32 %v7806_v63, %v6280_v61  ;;  %v287_v61 = vld [vmem:[%s10931_s0 + $0x768] sm:$0x11] }
 0x389   :  { %v10581_v49 = vadd.f32 %v5128_v35, %v5086_v19  ;;  %v7863_v35 = vld [vmem:[%s10931_s0 + $0x6d8] sm:$0xf0] }
 0x38a   :  { %v5130_v42 = vpop.f32.mrf.mxu0  ;;  %v6443_v19 = vor.u32 %v7863_v35, %v6442_v41  ;;  %v7680_v41 = vld [vmem:[%s10931_s0 + $0x120] sm:$0xf0] }
 0x38c   :  { %v5044_v56 = vpop.f32.mrf.mxu2 }
 0x38d   :  { %v5087_v53 = vpop.f32.mrf.mxu3  ;;  %v5045_v16 = vadd.f32 %v5044_v56, %v5002_v7  ;;  %v1604_v56 = vunpack.c.l.b16 %v287_v61 }
 0x38e   :  { %v5004_v58 = vpop.f32.mrf.mxu1 }
 0x38f   :  { %v5088_v52 = vadd.f32 %v5087_v53, %v5045_v16  ;;  %v5005_v26 = vadd.f32 %v5004_v58, %v10334_v37 }
 0x391   :  { %5180 = vmatmul.bf16.gmra.mxu1 %v6283_v38  ;;  %5223 = vmatmul.bf16.gmra.mxu2 %v6287_v1  ;;  %v10602_v4 = vadd.f32 %v5130_v42, %v5088_v52  ;;  %v1606_v1 = vunpack.c.l.b16 %v10653_v60 }
 0x392   :  { %5266 = vmatmul.bf16.gmra.mxu3 %v6291_v44  ;;  %v5133_v45 = vpop.f32.mrf.mxu0  ;;  %v1605_v44 = vunpack.c.h.b16 %v287_v61 }
 0x393   :  { %v1865_v32 = vpack.c.b16 %v1606_v1, %v1606_v1 }
 0x394   :  { %v5047_v3 = vpop.f32.mrf.mxu2  ;;  %v1864_v58 = vpack.c.b16 %v1605_v44, %v1605_v44 }
 0x395   :  { %v5090_v23 = vpop.f32.mrf.mxu3  ;;  %5309 = vmatmul.bf16.gmra.mxu0 %v6295_v10  ;;  %v5048_v37 = vadd.f32 %v5047_v3, %v5005_v26  ;;  %v1862_v26 = vpack.c.b16 %v1603_v6, %v1603_v6  ;;  %v5852_v6 = vld [vmem:[%s10931_s0 + $0x23c] sm:$0xf0] }
 0x396   :  { %v5006_v57 = vpop.f32.mrf.mxu1 }
 0x397   :  { %v5091_v13 = vadd.f32 %v5090_v23, %v5048_v37  ;;  %v5007_v59 = vadd.f32 %v5006_v57, %v10355_v39  ;;  %v7843_v39 = vld [vmem:[%s10931_s0 + $0x63c] sm:$0xf] }
 0x398   :  { %v6431_v47 = vor.u32 %v7843_v39, %v6428_v30  ;;  %v5710_v30 = vld [vmem:[%s10931_s0 + $0x88] sm:$0xf] }
 0x399   :  { %v10623_v43 = vadd.f32 %v5133_v45, %v5091_v13 }
 0x39a   :  { %v5135_v33 = vpop.f32.mrf.mxu0 }
 0x39c   :  { %v5049_v8 = vpop.f32.mrf.mxu2 }
 0x39d   :  { %v5092_v36 = vpop.f32.mrf.mxu3  ;;  %v5050_v9 = vadd.f32 %v5049_v8, %v5007_v59 }
 0x39e   :  { %v5009_v31 = vpop.f32.mrf.mxu1 }
 0x39f   :  { %v5093_v7 = vadd.f32 %v5092_v36, %v5050_v9  ;;  %v5010_v42 = vadd.f32 %v5009_v31, %v10376_v62 }
 0x3a1   :  { %5185 = vmatmul.bf16.gmra.mxu1 %v6431_v47  ;;  %5228 = vmatmul.bf16.gmra.mxu2 %v6435_v40  ;;  %v10644_v46 = vadd.f32 %v5135_v33, %v5093_v7  ;;  %v5711_v47 = vor.u32 %v7679_v28, %v5710_v30  ;;  %v6014_v28 = vld [vmem:[%s10931_s0 + $0x2e0] sm:$0xf] }
 0x3a2   :  { %5271 = vmatmul.bf16.gmra.mxu3 %v6439_v0  ;;  %v5138_v50 = vpop.f32.mrf.mxu0  ;;  %v5718_v0 = vld [vmem:[%s10931_s0 + $0x90] sm:$0xf] }
 0x3a3   :  { %v5719_v31 = vor.u32 %v7680_v41, %v5718_v0 }
 0x3a4   :  { %v5052_v63 = vpop.f32.mrf.mxu2 }
 0x3a5   :  { %v5095_v48 = vpop.f32.mrf.mxu3  ;;  %5314 = vmatmul.bf16.gmra.mxu0 %v6443_v19  ;;  %v5053_v53 = vadd.f32 %v5052_v63, %v5010_v42 }
 0x3a6   :  { %v5011_v62 = vpop.f32.mrf.mxu1 }
 0x3a7   :  { %v5096_v54 = vadd.f32 %v5095_v48, %v5053_v53  ;;  %v5012_v2 = vadd.f32 %v5011_v62, %v10386_v24  ;;  %v1863_v24 = vpack.c.b16 %v1604_v56, %v1604_v56  ;;  %v5858_v56 = vld [vmem:[%s10931_s0 + $0x1b0] sm:$0xf] }
 0x3a9   :  { %v10656_v16 = vadd.f32 %v5138_v50, %v5096_v54  ;;  %v7698_v54 = vld [vmem:[%s10931_s0 + $0x1b4] sm:$0xf] }
 0x3aa   :  { %v5140_v55 = vpop.f32.mrf.mxu0 }
 0x3ac   :  { %v5054_v10 = vpop.f32.mrf.mxu2 }
 0x3ad   :  { %v5097_v38 = vpop.f32.mrf.mxu3  ;;  %v5055_v52 = vadd.f32 %v5054_v10, %v5012_v2  ;;  %v7697_v2 = vld [vmem:[%s10931_s0 + $0x1ac] sm:$0xf] }
 0x3ae   :  { %v5014_v45 = vpop.f32.mrf.mxu1  ;;  %v7717_v10 = vld [vmem:[%s10931_s0 + $0x248] sm:$0xf0] }
 0x3af   :  { %v5098_v23 = vadd.f32 %v5097_v38, %v5055_v52  ;;  %v5015_v21 = vadd.f32 %v5014_v45, %v10407_v20  ;;  %v5712_v20 = vld [vmem:[%s10931_s0 + $0x11c] sm:$0xf0]  ;;  %v7716_v38 = vld [vmem:[%s10931_s0 + $0x240] sm:$0xf0] }
 0x3b0   :  { %v5715_v17 = vor.u32 %v7661_v22, %v5712_v20  ;;  %v7734_v22 = vld [vmem:[%s10931_s0 + $0x2d4] sm:$0xf] }
 0x3b1   :  { %5190 = vmatmul.bf16.gmra.mxu1 %v1862_v26  ;;  %5233 = vmatmul.bf16.gmra.mxu2 %v1863_v24  ;;  %v10660_v18 = vadd.f32 %v5140_v55, %v5098_v23  ;;  %v5855_v26 = vor.u32 %v7697_v2, %v5852_v6  ;;  %v5859_v24 = vor.u32 %v7716_v38, %v5858_v56  ;;  %v6154_v6 = vld [vmem:[%s10931_s0 + $0x400] sm:$0xf]  ;;  %v7790_v56 = vld [vmem:[%s10931_s0 + $0x490] sm:$0xf0] }
 0x3b2   :  { %5276 = vmatmul.bf16.gmra.mxu3 %v1864_v58  ;;  %v5143_v3 = vpop.f32.mrf.mxu0  ;;  %v5866_v58 = vld [vmem:[%s10931_s0 + $0x1b8] sm:$0xf] }
 0x3b4   :  { %v5057_v57 = vpop.f32.mrf.mxu2 }
 0x3b5   :  { %v5100_v37 = vpop.f32.mrf.mxu3  ;;  %5319 = vmatmul.bf16.gmra.mxu0 %v1865_v32  ;;  %v5058_v13 = vadd.f32 %v5057_v57, %v5015_v21  ;;  %v5867_v32 = vor.u32 %v7717_v10, %v5866_v58  ;;  %v7791_v58 = vld [vmem:[%s10931_s0 + $0x498] sm:$0xf0] }
 0x3b6   :  { %v5016_v59 = vpop.f32.mrf.mxu1 }
 0x3b7   :  { %v5101_v33 = vadd.f32 %v5100_v37, %v5058_v13  ;;  %v5017_v29 = vadd.f32 %v5016_v59, %v10431_v27  ;;  %v5704_v27 = vld [vmem:[%s10931_s0 + $0x114] sm:$0xf0] }
 0x3b8   :  { %v5707_v9 = vor.u32 %v7660_v34, %v5704_v27  ;;  %v7753_v27 = vld [vmem:[%s10931_s0 + $0x368] sm:$0xf0] }
 0x3b9   :  { %v10672_v39 = vadd.f32 %v5143_v3, %v5101_v33 }
 0x3ba   :  { %v5145_v14 = vpop.f32.mrf.mxu0 }
 0x3bc   :  { %v5059_v35 = vpop.f32.mrf.mxu2 }
 0x3bd   :  { %v5102_v36 = vpop.f32.mrf.mxu3  ;;  %v5060_v8 = vadd.f32 %v5059_v35, %v5017_v29 }
 0x3be   :  { %v5019_v40 = vpop.f32.mrf.mxu1 }
 0x3bf   :  { %v5103_v19 = vadd.f32 %v5102_v36, %v5060_v8  ;;  %v5020_v7 = vadd.f32 %v5019_v40, %v10451_v12  ;;  %v5860_v12 = vld [vmem:[%s10931_s0 + $0x244] sm:$0xf0]  ;;  %v6006_v36 = vld [vmem:[%s10931_s0 + $0x2d8] sm:$0xf] }
 0x3c0   :  { %v5863_v1 = vor.u32 %v7698_v54, %v5860_v12  ;;  %v6007_v8 = vor.u32 %v7753_v27, %v6006_v36  ;;  %v7772_v54 = vld [vmem:[%s10931_s0 + $0x404] sm:$0xf]  ;;  %v7771_v12 = vld [vmem:[%s10931_s0 + $0x3fc] sm:$0xf]  ;;  %v6302_v27 = vld [vmem:[%s10931_s0 + $0x528] sm:$0xf] }
 0x3c1   :  { %5332 = vmatmul.bf16.vlgmr.msrb.gmra.mxu1 %v5707_v9  ;;  %5375 = vmatmul.bf16.vlgmr.msrb.gmra.mxu2 %v5711_v47  ;;  %v10690_v50 = vadd.f32 %v5145_v14, %v5103_v19  ;;  %v7735_v14 = vld [vmem:[%s10931_s0 + $0x2dc] sm:$0xf] }
 0x3c2   :  { %5418 = vmatmul.bf16.vlgmr.msrb.gmra.mxu3 %v5715_v17  ;;  %v5148_v42 = vpop.f32.mrf.mxu0  ;;  %v7754_v17 = vld [vmem:[%s10931_s0 + $0x370] sm:$0xf0] }
 0x3c3   :  { %v6015_v47 = vor.u32 %v7754_v17, %v6014_v28  ;;  %v6310_v17 = vld [vmem:[%s10931_s0 + $0x530] sm:$0xf] }
 0x3c4   :  { %v5062_v48 = vpop.f32.mrf.mxu2 }
 0x3c5   :  { %v5105_v51 = vpop.f32.mrf.mxu3  ;;  %5461 = vmatmul.bf16.vlgmr.msrb.gmra.mxu0 %v5719_v31  ;;  %v5063_v63 = vadd.f32 %v5062_v48, %v5020_v7 }
 0x3c6   :  { %v5021_v61 = vpop.f32.mrf.mxu1 }
 0x3c7   :  { %v5106_v53 = vadd.f32 %v5105_v51, %v5063_v63 }
 0x3c9   :  { %v10701_v55 = vadd.f32 %v5148_v42, %v5106_v53 }
 0x3ca   :  { %v5150_v62 = vpop.f32.mrf.mxu0 }
 0x3cc   :  { %v5064_v52 = vpop.f32.mrf.mxu2 }
 0x3cd   :  { %v5107_v44 = vpop.f32.mrf.mxu3 }
 0x3ce   :  { %v5161_v45 = vpop.f32.mrf.mxu1 }
 0x3cf   :  { %v5162_v23 = vadd.f32 %v5161_v45, %v10494_v11  ;;  %v6008_v11 = vld [vmem:[%s10931_s0 + $0x36c] sm:$0xf0] }
 0x3d0   :  { %v6011_v30 = vor.u32 %v7735_v14, %v6008_v11 }
 0x3d1   :  { %5337 = vmatmul.bf16.gmra.mxu1 %v5855_v26  ;;  %5380 = vmatmul.bf16.gmra.mxu2 %v5859_v24  ;;  %v6155_v24 = vor.u32 %v7790_v56, %v6154_v6  ;;  %v6450_v56 = vld [vmem:[%s10931_s0 + $0x650] sm:$0xf] }
 0x3d2   :  { %5423 = vmatmul.bf16.gmra.mxu3 %v5863_v1  ;;  %v5290_v21 = vpop.f32.mrf.mxu0  ;;  %v6162_v1 = vld [vmem:[%s10931_s0 + $0x408] sm:$0xf] }
 0x3d4   :  { %v5204_v37 = vpop.f32.mrf.mxu2 }
 0x3d5   :  { %v5247_v3 = vpop.f32.mrf.mxu3  ;;  %5466 = vmatmul.bf16.gmra.mxu0 %v5867_v32  ;;  %v5205_v57 = vadd.f32 %v5204_v37, %v5162_v23  ;;  %v6163_v32 = vor.u32 %v7791_v58, %v6162_v1  ;;  %v6458_v58 = vld [vmem:[%s10931_s0 + $0x658] sm:$0xf] }
 0x3d6   :  { %v5163_v13 = vpop.f32.mrf.mxu1 }
 0x3d7   :  { %v5248_v59 = vadd.f32 %v5247_v3, %v5205_v57  ;;  %v5164_v33 = vadd.f32 %v5163_v13, %v10515_v15  ;;  %v6000_v15 = vld [vmem:[%s10931_s0 + $0x364] sm:$0xf0] }
 0x3d8   :  { %v6003_v35 = vor.u32 %v7734_v22, %v6000_v15  ;;  %v7809_v22 = vld [vmem:[%s10931_s0 + $0x52c] sm:$0xf] }
 0x3d9   :  { %v10729_v20 = vadd.f32 %v5290_v21, %v5248_v59 }
 0x3da   :  { %v5292_v29 = vpop.f32.mrf.mxu0 }
 0x3dc   :  { %v5206_v0 = vpop.f32.mrf.mxu2 }
 0x3dd   :  { %v5249_v34 = vpop.f32.mrf.mxu3  ;;  %v5207_v41 = vadd.f32 %v5206_v0, %v5164_v33  ;;  %v7828_v0 = vld [vmem:[%s10931_s0 + $0x5c0] sm:$0xf0] }
 0x3de   :  { %v5166_v9 = vpop.f32.mrf.mxu1 }
 0x3df   :  { %v5250_v40 = vadd.f32 %v5249_v34, %v5207_v41  ;;  %v5167_v31 = vadd.f32 %v5166_v9, %v10539_v5  ;;  %v6156_v5 = vld [vmem:[%s10931_s0 + $0x494] sm:$0xf0]  ;;  %v7808_v34 = vld [vmem:[%s10931_s0 + $0x524] sm:$0xf] }
 0x3e0   :  { %v6159_v38 = vor.u32 %v7772_v54, %v6156_v5 }
 0x3e1   :  { %5342 = vmatmul.bf16.gmra.mxu1 %v6003_v35  ;;  %5385 = vmatmul.bf16.gmra.mxu2 %v6007_v8  ;;  %v10747_v7 = vadd.f32 %v5292_v29, %v5250_v40  ;;  %v6311_v40 = vor.u32 %v7828_v0, %v6310_v17 }
 0x3e2   :  { %5428 = vmatmul.bf16.gmra.mxu3 %v6011_v30  ;;  %v5295_v19 = vpop.f32.mrf.mxu0  ;;  %v7827_v30 = vld [vmem:[%s10931_s0 + $0x5b8] sm:$0xf0] }
 0x3e3   :  { %v6303_v9 = vor.u32 %v7827_v30, %v6302_v27 }
 0x3e4   :  { %v5209_v51 = vpop.f32.mrf.mxu2 }
 0x3e5   :  { %v5252_v42 = vpop.f32.mrf.mxu3  ;;  %5471 = vmatmul.bf16.gmra.mxu0 %v6015_v47  ;;  %v5210_v48 = vadd.f32 %v5209_v51, %v5167_v31 }
 0x3e6   :  { %v5168_v63 = vpop.f32.mrf.mxu1 }
 0x3e7   :  { %v5253_v61 = vadd.f32 %v5252_v42, %v5210_v48  ;;  %v5169_v53 = vadd.f32 %v5168_v63, %v10557_v25  ;;  %v6148_v25 = vld [vmem:[%s10931_s0 + $0x48c] sm:$0xf0] }
 0x3e8   :  { %v6151_v26 = vor.u32 %v7771_v12, %v6148_v25  ;;  %v7846_v12 = vld [vmem:[%s10931_s0 + $0x654] sm:$0xf] }
 0x3e9   :  { %v10759_v2 = vadd.f32 %v5295_v19, %v5253_v61 }
 0x3ea   :  { %v5297_v62 = vpop.f32.mrf.mxu0 }
 0x3ec   :  { %v5211_v10 = vpop.f32.mrf.mxu2 }
 0x3ed   :  { %v5254_v44 = vpop.f32.mrf.mxu3  ;;  %v5212_v52 = vadd.f32 %v5211_v10, %v5169_v53  ;;  %v7865_v10 = vld [vmem:[%s10931_s0 + $0x6e8] sm:$0xf0] }
 0x3ee   :  { %v5171_v45 = vpop.f32.mrf.mxu1 }
 0x3ef   :  { %v5255_v23 = vadd.f32 %v5254_v44, %v5212_v52  ;;  %v5172_v21 = vadd.f32 %v5171_v45, %v10581_v49  ;;  %v6304_v49 = vld [vmem:[%s10931_s0 + $0x5bc] sm:$0xf0]  ;;  %v7845_v44 = vld [vmem:[%s10931_s0 + $0x64c] sm:$0xf] }
 0x3f0   :  { %v6307_v28 = vor.u32 %v7809_v22, %v6304_v49 }
 0x3f1   :  { %5347 = vmatmul.bf16.gmra.mxu1 %v6151_v26  ;;  %5390 = vmatmul.bf16.gmra.mxu2 %v6155_v24  ;;  %v10777_v37 = vadd.f32 %v5297_v62, %v5255_v23  ;;  %v6459_v23 = vor.u32 %v7865_v10, %v6458_v58 }
 0x3f2   :  { %5433 = vmatmul.bf16.gmra.mxu3 %v6159_v38  ;;  %v5300_v3 = vpop.f32.mrf.mxu0  ;;  %v7864_v38 = vld [vmem:[%s10931_s0 + $0x6e0] sm:$0xf0] }
 0x3f3   :  { %v6451_v45 = vor.u32 %v7864_v38, %v6450_v56 }
 0x3f4   :  { %v5214_v13 = vpop.f32.mrf.mxu2 }
 0x3f5   :  { %v5257_v57 = vpop.f32.mrf.mxu3  ;;  %5476 = vmatmul.bf16.gmra.mxu0 %v6163_v32  ;;  %v5215_v59 = vadd.f32 %v5214_v13, %v5172_v21 }
 0x3f6   :  { %v5173_v33 = vpop.f32.mrf.mxu1 }
 0x3f7   :  { %v5258_v29 = vadd.f32 %v5257_v57, %v5215_v59  ;;  %v5174_v14 = vadd.f32 %v5173_v33, %v10602_v4  ;;  %v6296_v4 = vld [vmem:[%s10931_s0 + $0x5b4] sm:$0xf0] }
 0x3f8   :  { %v6299_v8 = vor.u32 %v7808_v34, %v6296_v4  ;;  %v1607_v4 = vunpack.c.h.b16 %v10653_v60 }
 0x3f9   :  { %v10789_v15 = vadd.f32 %v5300_v3, %v5258_v29  ;;  %v289_v29 = vld [vmem:[%s10931_s0 + $0x778] sm:$0x11] }
 0x3fa   :  { %v5302_v11 = vpop.f32.mrf.mxu0  ;;  %v1608_v27 = vunpack.c.l.b16 %v289_v29 }
 0x3fc   :  { %v5216_v41 = vpop.f32.mrf.mxu2 }
 0x3fd   :  { %v5259_v36 = vpop.f32.mrf.mxu3  ;;  %v5217_v35 = vadd.f32 %v5216_v41, %v5174_v14 }
 0x3fe   :  { %v5176_v47 = vpop.f32.mrf.mxu1 }
 0x3ff   :  { %v5260_v31 = vadd.f32 %v5259_v36, %v5217_v35  ;;  %v5177_v19 = vadd.f32 %v5176_v47, %v10623_v43  ;;  %v6452_v43 = vld [vmem:[%s10931_s0 + $0x6e4] sm:$0xf0]  ;;  %v290_v36 = vld [vmem:[%s10931_s0 + $0x780] sm:$0x1] }
 0x400   :  { %v6455_v1 = vor.u32 %v7846_v12, %v6452_v43  ;;  %v1610_v17 = vunpack.c.l.b16 %v290_v36 }
 0x401   :  { %5352 = vmatmul.bf16.gmra.mxu1 %v6299_v8  ;;  %5395 = vmatmul.bf16.gmra.mxu2 %v6303_v9  ;;  %v10807_v51 = vadd.f32 %v5302_v11, %v5260_v31  ;;  %v1866_v8 = vpack.c.b16 %v1607_v4, %v1607_v4  ;;  %v1867_v9 = vpack.c.b16 %v1608_v27, %v1608_v27 }
 0x402   :  { %5438 = vmatmul.bf16.gmra.mxu3 %v6307_v28  ;;  %v5305_v42 = vpop.f32.mrf.mxu0 }
 0x404   :  { %v5219_v63 = vpop.f32.mrf.mxu2 }
 0x405   :  { %v5262_v48 = vpop.f32.mrf.mxu3  ;;  %5481 = vmatmul.bf16.gmra.mxu0 %v6311_v40  ;;  %v5220_v61 = vadd.f32 %v5219_v63, %v5177_v19 }
 0x406   :  { %v5178_v53 = vpop.f32.mrf.mxu1 }
 0x407   :  { %v5263_v62 = vadd.f32 %v5262_v48, %v5220_v61  ;;  %v5179_v54 = vadd.f32 %v5178_v53, %v10644_v46  ;;  %v6444_v46 = vld [vmem:[%s10931_s0 + $0x6dc] sm:$0xf0]  ;;  %v8188_v48 = vmov 0.0  }
 0x408   :  { %v6447_v24 = vor.u32 %v7845_v44, %v6444_v46  ;;  %30 = vst [vmem:[#allocation2 + $0x40] sm:$0x3] %v8188_v48 }
 0x409   :  { %v10819_v25 = vadd.f32 %v5305_v42, %v5263_v62 }
 0x40a   :  { %v5307_v5 = vpop.f32.mrf.mxu0 }
 0x40c   :  { %v5221_v52 = vpop.f32.mrf.mxu2 }
 0x40d   :  { %v5264_v6 = vpop.f32.mrf.mxu3  ;;  %v5222_v26 = vadd.f32 %v5221_v52, %v5179_v54 }
 0x40e   :  { %v5181_v32 = vpop.f32.mrf.mxu1 }
 0x40f   :  { %v5265_v21 = vadd.f32 %v5264_v6, %v5222_v26  ;;  %v5182_v3 = vadd.f32 %v5181_v32, %v10656_v16  ;;  %v1609_v16 = vunpack.c.h.b16 %v289_v29 }
 0x411   :  { %5357 = vmatmul.bf16.gmra.mxu1 %v6447_v24  ;;  %5400 = vmatmul.bf16.gmra.mxu2 %v6451_v45  ;;  %v10837_v13 = vadd.f32 %v5307_v5, %v5265_v21  ;;  %v1868_v0 = vpack.c.b16 %v1609_v16, %v1609_v16 }
 0x412   :  { %5443 = vmatmul.bf16.gmra.mxu3 %v6455_v1  ;;  %v5310_v57 = vpop.f32.mrf.mxu0 }
 0x414   :  { %v5224_v33 = vpop.f32.mrf.mxu2 }
 0x415   :  { %v5267_v59 = vpop.f32.mrf.mxu3  ;;  %5486 = vmatmul.bf16.gmra.mxu0 %v6459_v23  ;;  %v5225_v14 = vadd.f32 %v5224_v33, %v5182_v3 }
 0x416   :  { %v5183_v11 = vpop.f32.mrf.mxu1 }
 0x417   :  { %v5268_v22 = vadd.f32 %v5267_v59, %v5225_v14  ;;  %v5184_v49 = vadd.f32 %v5183_v11, %v10660_v18  ;;  %v1869_v18 = vpack.c.b16 %v1610_v17, %v1610_v17 }
 0x419   :  { %v10847_v30 = vadd.f32 %v5310_v57, %v5268_v22 }
 0x41a   :  { %v5312_v34 = vpop.f32.mrf.mxu0 }
 0x41c   :  { %v5226_v41 = vpop.f32.mrf.mxu2 }
 0x41d   :  { %v5269_v28 = vpop.f32.mrf.mxu3  ;;  %v5227_v35 = vadd.f32 %v5226_v41, %v5184_v49  ;;  %v10864_v49 = vld [vmem:[%s10932_s2] ss:$0 sm:$0xff] }
 0x41e   :  { %v5186_v47 = vpop.f32.mrf.mxu1 }
 0x41f   :  { %v5270_v40 = vadd.f32 %v5269_v28, %v5227_v35  ;;  %v5187_v31 = vadd.f32 %v5186_v47, %v10672_v39 }
 0x421   :  { %5362 = vmatmul.bf16.gmra.mxu1 %v1866_v8  ;;  %5405 = vmatmul.bf16.gmra.mxu2 %v1867_v9  ;;  %v10850_v60 = vadd.f32 %v5312_v34, %v5270_v40 }
 0x422   :  { %5448 = vmatmul.bf16.gmra.mxu3 %v1868_v0  ;;  %v5315_v19 = vpop.f32.mrf.mxu0 }
 0x424   :  { %v5229_v63 = vpop.f32.mrf.mxu2 }
 0x425   :  { %v5272_v42 = vpop.f32.mrf.mxu3  ;;  %5491 = vmatmul.bf16.gmra.mxu0 %v1869_v18  ;;  %v5230_v61 = vadd.f32 %v5229_v63, %v5187_v31 }
 0x426   :  { %v5188_v53 = vpop.f32.mrf.mxu1 }
 0x427   :  { %v5273_v62 = vadd.f32 %v5272_v42, %v5230_v61  ;;  %v5189_v54 = vadd.f32 %v5188_v53, %v10690_v50 }
 0x429   :  { %v10853_v12 = vadd.f32 %v5315_v19, %v5273_v62 }
 0x42a   :  { %v5317_v5 = vpop.f32.mrf.mxu0 }
 0x42c   :  { %v5231_v43 = vpop.f32.mrf.mxu2 }
 0x42d   :  { %v5274_v39 = vpop.f32.mrf.mxu3  ;;  %v5232_v44 = vadd.f32 %v5231_v43, %v5189_v54 }
 0x42e   :  { %v5191_v6 = vpop.f32.mrf.mxu1 }
 0x42f   :  { %v5275_v46 = vadd.f32 %v5274_v39, %v5232_v44  ;;  %v5192_v56 = vadd.f32 %v5191_v6, %v10701_v55 }
 0x431   :  { %v10856_v1 = vadd.f32 %v5317_v5, %v5275_v46 }
 0x432   :  { %v5320_v38 = vpop.f32.mrf.mxu0 }
 0x434   :  { %v5234_v10 = vpop.f32.mrf.mxu2 }
 0x435   :  { %v5277_v58 = vpop.f32.mrf.mxu3  ;;  %v5235_v52 = vadd.f32 %v5234_v10, %v5192_v56 }
 0x436   :  { %v5193_v26 = vpop.f32.mrf.mxu1 }
 0x437   :  { %v5278_v24 = vadd.f32 %v5277_v58, %v5235_v52 }
 0x439   :  { %v10858_v50 = vadd.f32 %v5320_v38, %v5278_v24 }
 0x43a   :  { %v5322_v45 = vpop.f32.mrf.mxu0 }
 0x43c   :  { %v5236_v23 = vpop.f32.mrf.mxu2 }
 0x43d   :  { %v5279_v32 = vpop.f32.mrf.mxu3 }
 0x43e   :  { %v5333_v21 = vpop.f32.mrf.mxu1 }
 0x43f   :  { %v5334_v59 = vadd.f32 %v5333_v21, %v10729_v20 }
 0x442   :  { %v5462_v3 = vpop.f32.mrf.mxu0 }
 0x444   :  { %v5376_v33 = vpop.f32.mrf.mxu2 }
 0x445   :  { %v5419_v57 = vpop.f32.mrf.mxu3  ;;  %v5377_v55 = vadd.f32 %v5376_v33, %v5334_v59 }
 0x446   :  { %v5335_v29 = vpop.f32.mrf.mxu1 }
 0x447   :  { %v5420_v14 = vadd.f32 %v5419_v57, %v5377_v55  ;;  %v5336_v16 = vadd.f32 %v5335_v29, %v10747_v7 }
 0x449   :  { %v5463_v22 = vadd.f32 %v5462_v3, %v5420_v14 }
 0x44a   :  { %v5464_v11 = vpop.f32.mrf.mxu0 }
 0x44b   :  { %v5542_v4 = vadd.f32 %v10864_v49, %v5463_v22 }
 0x44c   :  { %v5378_v36 = vpop.f32.mrf.mxu2 }
 0x44d   :  { %v5421_v34 = vpop.f32.mrf.mxu3  ;;  %v5379_v27 = vadd.f32 %v5378_v36, %v5336_v16  ;;  %5555 = vst [vmem:[%s10933_s3] sm:$0xff] %v5542_v4 }
 0x44e   :  { %v5338_v28 = vpop.f32.mrf.mxu1 }
 0x44f   :  { %v5422_v20 = vadd.f32 %v5421_v34, %v5379_v27  ;;  %v5339_v35 = vadd.f32 %v5338_v28, %v10759_v2 }
 0x451   :  { %v5465_v0 = vadd.f32 %v5464_v11, %v5422_v20 }
 0x452   :  { %v5467_v17 = vpop.f32.mrf.mxu0 }
 0x453   :  { %v5543_v9 = vadd.f32 %v10864_v49, %v5465_v0 }
 0x454   :  { %v5381_v8 = vpop.f32.mrf.mxu2 }
 0x455   :  { %v5424_v41 = vpop.f32.mrf.mxu3  ;;  %v5382_v47 = vadd.f32 %v5381_v8, %v5339_v35  ;;  %5556 = vst [vmem:[%s10933_s3 + $0x8] sm:$0xff] %v5543_v9 }
 0x456   :  { %v5340_v7 = vpop.f32.mrf.mxu1 }
 0x457   :  { %v5425_v18 = vadd.f32 %v5424_v41, %v5382_v47  ;;  %v5341_v42 = vadd.f32 %v5340_v7, %v10777_v37 }
 0x459   :  { %v5468_v31 = vadd.f32 %v5467_v17, %v5425_v18 }
 0x45a   :  { %v5469_v40 = vpop.f32.mrf.mxu0 }
 0x45b   :  { %v5544_v63 = vadd.f32 %v10864_v49, %v5468_v31 }
 0x45c   :  { %v5383_v48 = vpop.f32.mrf.mxu2 }
 0x45d   :  { %v5426_v19 = vpop.f32.mrf.mxu3  ;;  %v5384_v61 = vadd.f32 %v5383_v48, %v5341_v42  ;;  %5557 = vst [vmem:[%s10933_s3 + $0x10] sm:$0xff] %v5544_v63 }
 0x45e   :  { %v5343_v2 = vpop.f32.mrf.mxu1 }
 0x45f   :  { %v5427_v53 = vadd.f32 %v5426_v19, %v5384_v61  ;;  %v5344_v39 = vadd.f32 %v5343_v2, %v10789_v15 }
 0x461   :  { %v5470_v54 = vadd.f32 %v5469_v40, %v5427_v53 }
 0x462   :  { %v5472_v62 = vpop.f32.mrf.mxu0 }
 0x463   :  { %v5545_v44 = vadd.f32 %v10864_v49, %v5470_v54 }
 0x464   :  { %v5386_v43 = vpop.f32.mrf.mxu2 }
 0x465   :  { %v5429_v5 = vpop.f32.mrf.mxu3  ;;  %v5387_v6 = vadd.f32 %v5386_v43, %v5344_v39  ;;  %5558 = vst [vmem:[%s10933_s3 + $0x18] sm:$0xff] %v5545_v44 }
 0x466   :  { %v5345_v37 = vpop.f32.mrf.mxu1 }
 0x467   :  { %v5430_v46 = vadd.f32 %v5429_v5, %v5387_v6  ;;  %v5346_v10 = vadd.f32 %v5345_v37, %v10807_v51 }
 0x469   :  { %v5473_v38 = vadd.f32 %v5472_v62, %v5430_v46 }
 0x46a   :  { %v5474_v56 = vpop.f32.mrf.mxu0 }
 0x46b   :  { %v5546_v26 = vadd.f32 %v10864_v49, %v5473_v38 }
 0x46c   :  { %v5388_v52 = vpop.f32.mrf.mxu2 }
 0x46d   :  { %v5431_v58 = vpop.f32.mrf.mxu3  ;;  %v5389_v24 = vadd.f32 %v5388_v52, %v5346_v10  ;;  %5559 = vst [vmem:[%s10933_s3 + $0x20] sm:$0xff] %v5546_v26 }
 0x46e   :  { %v5348_v15 = vpop.f32.mrf.mxu1 }
 0x46f   :  { %v5432_v45 = vadd.f32 %v5431_v58, %v5389_v24  ;;  %v5349_v3 = vadd.f32 %v5348_v15, %v10819_v25 }
 0x471   :  { %v5475_v23 = vadd.f32 %v5474_v56, %v5432_v45 }
 0x472   :  { %v5477_v32 = vpop.f32.mrf.mxu0 }
 0x473   :  { %v5547_v59 = vadd.f32 %v10864_v49, %v5475_v23 }
 0x474   :  { %v5391_v57 = vpop.f32.mrf.mxu2 }
 0x475   :  { %v5434_v21 = vpop.f32.mrf.mxu3  ;;  %v5392_v33 = vadd.f32 %v5391_v57, %v5349_v3  ;;  %5560 = vst [vmem:[%s10933_s3 + $0x28] sm:$0xff] %v5547_v59 }
 0x476   :  { %v5350_v51 = vpop.f32.mrf.mxu1 }
 0x477   :  { %v5435_v55 = vadd.f32 %v5434_v21, %v5392_v33  ;;  %v5351_v22 = vadd.f32 %v5350_v51, %v10837_v13  ;;  %v43_v21 = vld [vmem:[#allocation2 + $0x40] sm:$0x3] }
 0x479   :  { %v5478_v14 = vadd.f32 %v5477_v32, %v5435_v55 }
 0x47a   :  { %v5479_v29 = vpop.f32.mrf.mxu0 }
 0x47b   :  { %v5548_v16 = vadd.f32 %v10864_v49, %v5478_v14 }
 0x47c   :  { %v5393_v34 = vpop.f32.mrf.mxu2 }
 0x47d   :  { %v5436_v11 = vpop.f32.mrf.mxu3  ;;  %v5394_v36 = vadd.f32 %v5393_v34, %v5351_v22  ;;  %5561 = vst [vmem:[%s10933_s3 + $0x30] sm:$0xff] %v5548_v16 }
 0x47e   :  { %v5353_v25 = vpop.f32.mrf.mxu1 }
 0x47f   :  { %v5437_v4 = vadd.f32 %v5436_v11, %v5394_v36  ;;  %v5354_v17 = vadd.f32 %v5353_v25, %v10847_v30 }
 0x481   :  { %v5480_v28 = vadd.f32 %v5479_v29, %v5437_v4 }
 0x482   :  { %v5482_v27 = vpop.f32.mrf.mxu0 }
 0x483   :  { %v5549_v41 = vadd.f32 %v10864_v49, %v5480_v28 }
 0x484   :  { %v5396_v0 = vpop.f32.mrf.mxu2 }
 0x485   :  { %v5439_v20 = vpop.f32.mrf.mxu3  ;;  %v5397_v35 = vadd.f32 %v5396_v0, %v5354_v17  ;;  %5562 = vst [vmem:[%s10933_s3 + $0x38] sm:$0xff] %v5549_v41 }
 0x486   :  { %v5355_v13 = vpop.f32.mrf.mxu1 }
 0x487   :  { %v5440_v8 = vadd.f32 %v5439_v20, %v5397_v35  ;;  %v5356_v18 = vadd.f32 %v5355_v13, %v10850_v60 }
 0x489   :  { %v5483_v47 = vadd.f32 %v5482_v27, %v5440_v8 }
 0x48a   :  { %v5484_v9 = vpop.f32.mrf.mxu0 }
 0x48b   :  { %v5550_v31 = vadd.f32 %v10864_v49, %v5483_v47 }
 0x48c   :  { %v5398_v40 = vpop.f32.mrf.mxu2 }
 0x48d   :  { %v5441_v7 = vpop.f32.mrf.mxu3  ;;  %v5399_v19 = vadd.f32 %v5398_v40, %v5356_v18  ;;  %5563 = vst [vmem:[%s10933_s3 + $0x40] sm:$0xff] %v5550_v31 }
 0x48e   :  { %v5358_v30 = vpop.f32.mrf.mxu1 }
 0x48f   :  { %v5442_v42 = vadd.f32 %v5441_v7, %v5399_v19  ;;  %v5359_v2 = vadd.f32 %v5358_v30, %v10853_v12 }
 0x491   :  { %v5485_v63 = vadd.f32 %v5484_v9, %v5442_v42 }
 0x492   :  { %v5487_v48 = vpop.f32.mrf.mxu0 }
 0x493   :  { %v5551_v62 = vadd.f32 %v10864_v49, %v5485_v63 }
 0x494   :  { %v5401_v53 = vpop.f32.mrf.mxu2 }
 0x495   :  { %v5444_v61 = vpop.f32.mrf.mxu3  ;;  %v5402_v54 = vadd.f32 %v5401_v53, %v5359_v2  ;;  %5564 = vst [vmem:[%s10933_s3 + $0x48] sm:$0xff] %v5551_v62 }
 0x496   :  { %v5360_v60 = vpop.f32.mrf.mxu1 }
 0x497   :  { %v5445_v5 = vadd.f32 %v5444_v61, %v5402_v54  ;;  %v5361_v6 = vadd.f32 %v5360_v60, %v10856_v1 }
 0x499   :  { %v5488_v43 = vadd.f32 %v5487_v48, %v5445_v5 }
 0x49a   :  { %v5489_v39 = vpop.f32.mrf.mxu0 }
 0x49b   :  { %v5552_v46 = vadd.f32 %v10864_v49, %v5488_v43 }
 0x49c   :  { %v5403_v37 = vpop.f32.mrf.mxu2 }
 0x49d   :  { %v5446_v44 = vpop.f32.mrf.mxu3  ;;  %v5404_v56 = vadd.f32 %v5403_v37, %v5361_v6  ;;  %5565 = vst [vmem:[%s10933_s3 + $0x50] sm:$0xff] %v5552_v46 }
 0x49e   :  { %v5363_v12 = vpop.f32.mrf.mxu1 }
 0x49f   :  { %v5447_v38 = vadd.f32 %v5446_v44, %v5404_v56  ;;  %v5364_v26 = vadd.f32 %v5363_v12, %v10858_v50 }
 0x4a1   :  { %v5490_v10 = vadd.f32 %v5489_v39, %v5447_v38 }
 0x4a2   :  { %v5492_v58 = vpop.f32.mrf.mxu0 }
 0x4a3   :  { %v5553_v15 = vadd.f32 %v10864_v49, %v5490_v10 }
 0x4a4   :  { %v5406_v24 = vpop.f32.mrf.mxu2 }
 0x4a5   :  { %v5449_v52 = vpop.f32.mrf.mxu3  ;;  %v5407_v45 = vadd.f32 %v5406_v24, %v5364_v26  ;;  %5566 = vst [vmem:[%s10933_s3 + $0x58] sm:$0xff] %v5553_v15 }
 0x4a6   :  { %v5365_v1 = vpop.f32.mrf.mxu1 }
 0x4a7   :  { %v5450_v32 = vadd.f32 %v5449_v52, %v5407_v45 }
 0x4a9   :  { %v5493_v3 = vadd.f32 %v5492_v58, %v5450_v32 }
 0x4aa   :  { %v5494_v23 = vpop.f32.mrf.mxu0 }
 0x4ab   :  { %v5508_v59 = vadd.f32 %v5493_v3, %v43_v21 }
 0x4ac   :  { %v5408_v33 = vpop.f32.mrf.mxu2 }
 0x4ad   :  { %v5451_v57 = vpop.f32.mrf.mxu3  ;;  %5521 = vst [vmem:[#allocation2 + $0x40] sm:$0x3] %v5508_v59 }
 0x4b4   :  { %v5537_v51 = vld [vmem:[#allocation2 + $0x40] sm:$0x3] }
 0x4b5   :  { %v5554_v50 = vadd.f32 %v10864_v49, %v5537_v51 }
 0x4b7   :  { %5567 = vst [vmem:[%s10933_s3 + $0x60] sm:$0x3] %v5554_v50 }

// kernel: dcc_igtd_generator_forward.7
= control target key start
LH: loop header
LB: loop body
LE: loop exit
PB: predicated region body
PF: predicated region fallthrough
CT: control target
= control target key end

     0   :  { %s2212_s12 = smov 0   ;;  %s2214_s13 = smov 0   ;;  %s2671_s0 = inlined_call_operand.vmem [shape: bf16[8,1152], index: 0, kind: input, shape index: {}]   ;;  %s2672_s1 = inlined_call_operand.vmem [shape: bf16[1152,384], index: 1, kind: input, shape index: {}]   ;;  %s2673_s2 = inlined_call_operand.vmem [shape: f32[1,384], index: 2, kind: input, shape index: {}]   ;;  %s2674_s3 = inlined_call_operand.vmem [shape: f32[8,384], index: 3, kind: output, shape index: {}]  }
   0x1   :  { %s2216_s14 = smov 0   ;;  %s2218_s15 = smov 0  }
   0x2   :  { %s2220_s16 = smov 0  }
   0x3 LB: > { %s28_s17 = sadd.s32 1, %s2186_s15  ;;  %p76_p1 = scmp.ne.s32.totalorder %s2178_s13, %s2174_s12  ;;  %s2190_s16 = sphi %s2220_s16, %s13_s16   ;;  %s2186_s15 = sphi %s2218_s15, %s2678_s15   ;;  %s2182_s14 = sphi %s2216_s14, %s2677_s14   ;;  %s2178_s13 = sphi %s2214_s13, %s2676_s13   ;;  %s2174_s12 = sphi %s2212_s12, %s2675_s12  }
   0x4   : > { %p30_p0 = scmp.ge.s32.totalorder %s28_s17, 3  ;;  %p77_p2 = scmp.eq.s32.totalorder %s2190_s16, 0 }
   0x5   : > { %s69_s19 = sadd.s32 1, %s2178_s13  ;;  %p1741_p5 = scmp.ge.s32.totalorder %s2190_s16, 3 }
   0x6   : > { %s2680_s17 = smov (%p30_p0, %s28_s17), 0  ;;  %p78_p3 = por %p77_p2, %p76_p1 }
   0x7   : > { %s65_s18 = ssub.s32 %s2186_s15, %s2680_s17  ;;  %169 = sbr.rel (%p1741_p5) target bundleno = 161 (0xa1), region = 20 }
   0x8   : > { %p67_p4 = scmp.eq.s32.totalorder %s65_s18, 0 }
   0xa   : > { %s2247_s20 = scalar_select %p67_p4, %s2178_s13, %s69_s19  }
   0xc   : > { %172 = sbr.rel (!%p78_p3) target bundleno = 161 (0xa1), region = 24  ;;  %s174_s21 = sand.u32 (%p78_p3), 1, %s2178_s13  }
   0xd   : > { %s1742_s22 = sshll.u32 (%p78_p3), %s2186_s15, 2  ;;  %s2107_s23 = smul.u32 (%p78_p3), 576, %s174_s21 }
   0xe   : > { %s2255_s26 = scalar_lea.vmem (%p78_p3), %s2672_s1, %s1742_s22 }
   0xf   : > { %v198_v0 = vld [vmem:[%s2255_s26] sm:$0xf] (%p78_p3)  ;;  %v200_v1 = vld [vmem:[%s2255_s26 + $0xc] sm:$0xf] (%p78_p3)  ;;  %v202_v2 = vld [vmem:[%s2255_s26 + $0x18] sm:$0xf] (%p78_p3) }
  0x10   : > { %s2260_s27 = scalar_lea.vmem (%p78_p3), [#allocation3], %s2107_s23  ;;  %v204_v3 = vld [vmem:[%s2255_s26 + $0x24] sm:$0xf] (%p78_p3)  ;;  %v206_v4 = vld [vmem:[%s2255_s26 + $0x30] sm:$0xf] (%p78_p3) }
  0x11   : > { %199 = vst [vmem:[%s2260_s27] sm:$0xf] %v198_v0  ;;  %v208_v5 = vld [vmem:[%s2255_s26 + $0x3c] sm:$0xf]  ;;  %v210_v6 = vld [vmem:[%s2255_s26 + $0x48] sm:$0xf] }
  0x12   : > { %201 = vst [vmem:[%s2260_s27 + $0x4] sm:$0xf] %v200_v1  ;;  %v212_v7 = vld [vmem:[%s2255_s26 + $0x54] sm:$0xf]  ;;  %v214_v8 = vld [vmem:[%s2255_s26 + $0x60] sm:$0xf] }
  0x13   : > { %203 = vst [vmem:[%s2260_s27 + $0x8] sm:$0xf] %v202_v2  ;;  %v216_v9 = vld [vmem:[%s2255_s26 + $0x6c] sm:$0xf]  ;;  %v218_v10 = vld [vmem:[%s2255_s26 + $0x78] sm:$0xf] }
  0x14   : > { %205 = vst [vmem:[%s2260_s27 + $0xc] sm:$0xf] %v204_v3  ;;  %v220_v11 = vld [vmem:[%s2255_s26 + $0x84] sm:$0xf]  ;;  %v222_v12 = vld [vmem:[%s2255_s26 + $0x90] sm:$0xf] }
  0x15   : > { %207 = vst [vmem:[%s2260_s27 + $0x10] sm:$0xf] %v206_v4  ;;  %v224_v13 = vld [vmem:[%s2255_s26 + $0x9c] sm:$0xf]  ;;  %v226_v14 = vld [vmem:[%s2255_s26 + $0xa8] sm:$0xf] }
  0x16   : > { %209 = vst [vmem:[%s2260_s27 + $0x14] sm:$0xf] %v208_v5  ;;  %v228_v15 = vld [vmem:[%s2255_s26 + $0xb4] sm:$0xf]  ;;  %v230_v16 = vld [vmem:[%s2255_s26 + $0xc0] sm:$0xf] }
  0x17   : > { %211 = vst [vmem:[%s2260_s27 + $0x18] sm:$0xf] %v210_v6  ;;  %v232_v17 = vld [vmem:[%s2255_s26 + $0xcc] sm:$0xf]  ;;  %v234_v18 = vld [vmem:[%s2255_s26 + $0xd8] sm:$0xf] }
  0x18   : > { %213 = vst [vmem:[%s2260_s27 + $0x1c] sm:$0xf] %v212_v7  ;;  %v236_v19 = vld [vmem:[%s2255_s26 + $0xe4] sm:$0xf]  ;;  %v238_v20 = vld [vmem:[%s2255_s26 + $0xf0] sm:$0xf] }
  0x19   : > { %215 = vst [vmem:[%s2260_s27 + $0x20] sm:$0xf] %v214_v8  ;;  %v240_v21 = vld [vmem:[%s2255_s26 + $0xfc] sm:$0xf]  ;;  %v242_v22 = vld [vmem:[%s2255_s26 + $0x108] sm:$0xf] }
  0x1a   : > { %217 = vst [vmem:[%s2260_s27 + $0x24] sm:$0xf] %v216_v9  ;;  %v244_v23 = vld [vmem:[%s2255_s26 + $0x114] sm:$0xf]  ;;  %v246_v24 = vld [vmem:[%s2255_s26 + $0x120] sm:$0xf] }
  0x1b   : > { %219 = vst [vmem:[%s2260_s27 + $0x28] sm:$0xf] %v218_v10  ;;  %v248_v25 = vld [vmem:[%s2255_s26 + $0x12c] sm:$0xf]  ;;  %v250_v26 = vld [vmem:[%s2255_s26 + $0x138] sm:$0xf] }
  0x1c   : > { %221 = vst [vmem:[%s2260_s27 + $0x2c] sm:$0xf] %v220_v11  ;;  %v252_v27 = vld [vmem:[%s2255_s26 + $0x144] sm:$0xf]  ;;  %v254_v28 = vld [vmem:[%s2255_s26 + $0x150] sm:$0xf] }
  0x1d   : > { %223 = vst [vmem:[%s2260_s27 + $0x30] sm:$0xf] %v222_v12  ;;  %v256_v29 = vld [vmem:[%s2255_s26 + $0x15c] sm:$0xf]  ;;  %v258_v30 = vld [vmem:[%s2255_s26 + $0x168] sm:$0xf] }
  0x1e   : > { %225 = vst [vmem:[%s2260_s27 + $0x34] sm:$0xf] %v224_v13  ;;  %v260_v31 = vld [vmem:[%s2255_s26 + $0x174] sm:$0xf]  ;;  %v262_v32 = vld [vmem:[%s2255_s26 + $0x180] sm:$0xf] }
  0x1f   : > { %227 = vst [vmem:[%s2260_s27 + $0x38] sm:$0xf] %v226_v14  ;;  %v264_v33 = vld [vmem:[%s2255_s26 + $0x18c] sm:$0xf]  ;;  %v266_v34 = vld [vmem:[%s2255_s26 + $0x198] sm:$0xf] }
  0x20   : > { %229 = vst [vmem:[%s2260_s27 + $0x3c] sm:$0xf] %v228_v15  ;;  %v268_v35 = vld [vmem:[%s2255_s26 + $0x1a4] sm:$0xf]  ;;  %v270_v36 = vld [vmem:[%s2255_s26 + $0x1b0] sm:$0xf] }
  0x21   : > { %231 = vst [vmem:[%s2260_s27 + $0x40] sm:$0xf] %v230_v16  ;;  %v272_v37 = vld [vmem:[%s2255_s26 + $0x1bc] sm:$0xf]  ;;  %v274_v38 = vld [vmem:[%s2255_s26 + $0x1c8] sm:$0xf] }
  0x22   : > { %233 = vst [vmem:[%s2260_s27 + $0x44] sm:$0xf] %v232_v17  ;;  %v276_v39 = vld [vmem:[%s2255_s26 + $0x1d4] sm:$0xf]  ;;  %v278_v40 = vld [vmem:[%s2255_s26 + $0x1e0] sm:$0xf] }
  0x23   : > { %235 = vst [vmem:[%s2260_s27 + $0x48] sm:$0xf] %v234_v18  ;;  %v280_v41 = vld [vmem:[%s2255_s26 + $0x1ec] sm:$0xf]  ;;  %v282_v42 = vld [vmem:[%s2255_s26 + $0x1f8] sm:$0xf] }
  0x24   : > { %237 = vst [vmem:[%s2260_s27 + $0x4c] sm:$0xf] %v236_v19  ;;  %v284_v43 = vld [vmem:[%s2255_s26 + $0x204] sm:$0xf]  ;;  %v286_v44 = vld [vmem:[%s2255_s26 + $0x210] sm:$0xf] }
  0x25   : > { %239 = vst [vmem:[%s2260_s27 + $0x50] sm:$0xf] %v238_v20  ;;  %v288_v45 = vld [vmem:[%s2255_s26 + $0x21c] sm:$0xf]  ;;  %v290_v46 = vld [vmem:[%s2255_s26 + $0x228] sm:$0xf] }
  0x26   : > { %241 = vst [vmem:[%s2260_s27 + $0x54] sm:$0xf] %v240_v21  ;;  %v292_v47 = vld [vmem:[%s2255_s26 + $0x234] sm:$0xf]  ;;  %v294_v48 = vld [vmem:[%s2255_s26 + $0x240] sm:$0xf] }
  0x27   : > { %243 = vst [vmem:[%s2260_s27 + $0x58] sm:$0xf] %v242_v22  ;;  %v296_v49 = vld [vmem:[%s2255_s26 + $0x24c] sm:$0xf]  ;;  %v298_v50 = vld [vmem:[%s2255_s26 + $0x258] sm:$0xf] }
  0x28   : > { %245 = vst [vmem:[%s2260_s27 + $0x5c] sm:$0xf] %v244_v23  ;;  %v300_v51 = vld [vmem:[%s2255_s26 + $0x264] sm:$0xf]  ;;  %v302_v52 = vld [vmem:[%s2255_s26 + $0x270] sm:$0xf] }
  0x29   : > { %247 = vst [vmem:[%s2260_s27 + $0x60] sm:$0xf] %v246_v24  ;;  %v304_v53 = vld [vmem:[%s2255_s26 + $0x27c] sm:$0xf]  ;;  %v306_v54 = vld [vmem:[%s2255_s26 + $0x288] sm:$0xf] }
  0x2a   : > { %249 = vst [vmem:[%s2260_s27 + $0x64] sm:$0xf] %v248_v25  ;;  %v308_v55 = vld [vmem:[%s2255_s26 + $0x294] sm:$0xf]  ;;  %v310_v56 = vld [vmem:[%s2255_s26 + $0x2a0] sm:$0xf] }
  0x2b   : > { %251 = vst [vmem:[%s2260_s27 + $0x68] sm:$0xf] %v250_v26  ;;  %v312_v57 = vld [vmem:[%s2255_s26 + $0x2ac] sm:$0xf]  ;;  %v314_v58 = vld [vmem:[%s2255_s26 + $0x2b8] sm:$0xf] }
  0x2c   : > { %253 = vst [vmem:[%s2260_s27 + $0x6c] sm:$0xf] %v252_v27  ;;  %v316_v59 = vld [vmem:[%s2255_s26 + $0x2c4] sm:$0xf]  ;;  %v318_v60 = vld [vmem:[%s2255_s26 + $0x2d0] sm:$0xf] }
  0x2d   : > { %255 = vst [vmem:[%s2260_s27 + $0x70] sm:$0xf] %v254_v28  ;;  %v320_v61 = vld [vmem:[%s2255_s26 + $0x2dc] sm:$0xf]  ;;  %v322_v62 = vld [vmem:[%s2255_s26 + $0x2e8] sm:$0xf] }
  0x2e   : > { %257 = vst [vmem:[%s2260_s27 + $0x74] sm:$0xf] %v256_v29  ;;  %v324_v63 = vld [vmem:[%s2255_s26 + $0x2f4] sm:$0xf]  ;;  %v326_v0 = vld [vmem:[%s2255_s26 + $0x300] sm:$0xf] }
  0x2f   : > { %259 = vst [vmem:[%s2260_s27 + $0x78] sm:$0xf] %v258_v30  ;;  %v328_v1 = vld [vmem:[%s2255_s26 + $0x30c] sm:$0xf]  ;;  %v330_v2 = vld [vmem:[%s2255_s26 + $0x318] sm:$0xf] }
  0x30   : > { %261 = vst [vmem:[%s2260_s27 + $0x7c] sm:$0xf] %v260_v31  ;;  %v332_v3 = vld [vmem:[%s2255_s26 + $0x324] sm:$0xf]  ;;  %v334_v4 = vld [vmem:[%s2255_s26 + $0x330] sm:$0xf] }
  0x31   : > { %263 = vst [vmem:[%s2260_s27 + $0x80] sm:$0xf] %v262_v32  ;;  %v336_v5 = vld [vmem:[%s2255_s26 + $0x33c] sm:$0xf]  ;;  %v338_v6 = vld [vmem:[%s2255_s26 + $0x348] sm:$0xf] }
  0x32   : > { %265 = vst [vmem:[%s2260_s27 + $0x84] sm:$0xf] %v264_v33  ;;  %v340_v7 = vld [vmem:[%s2255_s26 + $0x354] sm:$0xf]  ;;  %v342_v8 = vld [vmem:[%s2255_s26 + $0x360] sm:$0xf] }
  0x33   : > { %267 = vst [vmem:[%s2260_s27 + $0x88] sm:$0xf] %v266_v34  ;;  %v344_v9 = vld [vmem:[%s2255_s26 + $0x36c] sm:$0xf]  ;;  %v346_v10 = vld [vmem:[%s2255_s26 + $0x378] sm:$0xf] }
  0x34   : > { %269 = vst [vmem:[%s2260_s27 + $0x8c] sm:$0xf] %v268_v35  ;;  %v348_v11 = vld [vmem:[%s2255_s26 + $0x384] sm:$0xf]  ;;  %v350_v12 = vld [vmem:[%s2255_s26 + $0x390] sm:$0xf] }
  0x35   : > { %271 = vst [vmem:[%s2260_s27 + $0x90] sm:$0xf] %v270_v36  ;;  %v352_v13 = vld [vmem:[%s2255_s26 + $0x39c] sm:$0xf]  ;;  %v354_v14 = vld [vmem:[%s2255_s26 + $0x3a8] sm:$0xf] }
  0x36   : > { %273 = vst [vmem:[%s2260_s27 + $0x94] sm:$0xf] %v272_v37  ;;  %v356_v15 = vld [vmem:[%s2255_s26 + $0x3b4] sm:$0xf]  ;;  %v358_v16 = vld [vmem:[%s2255_s26 + $0x3c0] sm:$0xf] }
  0x37   : > { %275 = vst [vmem:[%s2260_s27 + $0x98] sm:$0xf] %v274_v38  ;;  %v360_v17 = vld [vmem:[%s2255_s26 + $0x3cc] sm:$0xf]  ;;  %v362_v18 = vld [vmem:[%s2255_s26 + $0x3d8] sm:$0xf] }
  0x38   : > { %277 = vst [vmem:[%s2260_s27 + $0x9c] sm:$0xf] %v276_v39  ;;  %v364_v19 = vld [vmem:[%s2255_s26 + $0x3e4] sm:$0xf]  ;;  %v366_v20 = vld [vmem:[%s2255_s26 + $0x3f0] sm:$0xf] }
  0x39   : > { %279 = vst [vmem:[%s2260_s27 + $0xa0] sm:$0xf] %v278_v40  ;;  %v368_v21 = vld [vmem:[%s2255_s26 + $0x3fc] sm:$0xf]  ;;  %v370_v22 = vld [vmem:[%s2255_s26 + $0x408] sm:$0xf] }
  0x3a   : > { %281 = vst [vmem:[%s2260_s27 + $0xa4] sm:$0xf] %v280_v41  ;;  %v372_v23 = vld [vmem:[%s2255_s26 + $0x414] sm:$0xf]  ;;  %v374_v24 = vld [vmem:[%s2255_s26 + $0x420] sm:$0xf] }
  0x3b   : > { %283 = vst [vmem:[%s2260_s27 + $0xa8] sm:$0xf] %v282_v42  ;;  %v376_v25 = vld [vmem:[%s2255_s26 + $0x42c] sm:$0xf]  ;;  %v378_v26 = vld [vmem:[%s2255_s26 + $0x438] sm:$0xf] }
  0x3c   : > { %285 = vst [vmem:[%s2260_s27 + $0xac] sm:$0xf] %v284_v43  ;;  %v380_v27 = vld [vmem:[%s2255_s26 + $0x444] sm:$0xf]  ;;  %v382_v28 = vld [vmem:[%s2255_s26 + $0x450] sm:$0xf] }
  0x3d   : > { %287 = vst [vmem:[%s2260_s27 + $0xb0] sm:$0xf] %v286_v44  ;;  %v384_v29 = vld [vmem:[%s2255_s26 + $0x45c] sm:$0xf]  ;;  %v386_v30 = vld [vmem:[%s2255_s26 + $0x468] sm:$0xf] }
  0x3e   : > { %289 = vst [vmem:[%s2260_s27 + $0xb4] sm:$0xf] %v288_v45  ;;  %v388_v31 = vld [vmem:[%s2255_s26 + $0x474] sm:$0xf]  ;;  %v390_v32 = vld [vmem:[%s2255_s26 + $0x480] sm:$0xf] }
  0x3f   : > { %291 = vst [vmem:[%s2260_s27 + $0xb8] sm:$0xf] %v290_v46  ;;  %v392_v33 = vld [vmem:[%s2255_s26 + $0x48c] sm:$0xf]  ;;  %v394_v34 = vld [vmem:[%s2255_s26 + $0x498] sm:$0xf] }
  0x40   : > { %293 = vst [vmem:[%s2260_s27 + $0xbc] sm:$0xf] %v292_v47  ;;  %v396_v35 = vld [vmem:[%s2255_s26 + $0x4a4] sm:$0xf]  ;;  %v398_v36 = vld [vmem:[%s2255_s26 + $0x4b0] sm:$0xf] }
  0x41   : > { %295 = vst [vmem:[%s2260_s27 + $0xc0] sm:$0xf] %v294_v48  ;;  %v400_v37 = vld [vmem:[%s2255_s26 + $0x4bc] sm:$0xf]  ;;  %v402_v38 = vld [vmem:[%s2255_s26 + $0x4c8] sm:$0xf] }
  0x42   : > { %297 = vst [vmem:[%s2260_s27 + $0xc4] sm:$0xf] %v296_v49  ;;  %v404_v39 = vld [vmem:[%s2255_s26 + $0x4d4] sm:$0xf]  ;;  %v406_v40 = vld [vmem:[%s2255_s26 + $0x4e0] sm:$0xf] }
  0x43   : > { %299 = vst [vmem:[%s2260_s27 + $0xc8] sm:$0xf] %v298_v50  ;;  %v408_v41 = vld [vmem:[%s2255_s26 + $0x4ec] sm:$0xf]  ;;  %v410_v42 = vld [vmem:[%s2255_s26 + $0x4f8] sm:$0xf] }
  0x44   : > { %301 = vst [vmem:[%s2260_s27 + $0xcc] sm:$0xf] %v300_v51  ;;  %v412_v43 = vld [vmem:[%s2255_s26 + $0x504] sm:$0xf]  ;;  %v414_v44 = vld [vmem:[%s2255_s26 + $0x510] sm:$0xf] }
  0x45   : > { %303 = vst [vmem:[%s2260_s27 + $0xd0] sm:$0xf] %v302_v52  ;;  %v416_v45 = vld [vmem:[%s2255_s26 + $0x51c] sm:$0xf]  ;;  %v418_v46 = vld [vmem:[%s2255_s26 + $0x528] sm:$0xf] }
  0x46   : > { %305 = vst [vmem:[%s2260_s27 + $0xd4] sm:$0xf] %v304_v53  ;;  %v420_v47 = vld [vmem:[%s2255_s26 + $0x534] sm:$0xf]  ;;  %v422_v48 = vld [vmem:[%s2255_s26 + $0x540] sm:$0xf] }
  0x47   : > { %307 = vst [vmem:[%s2260_s27 + $0xd8] sm:$0xf] %v306_v54  ;;  %v424_v49 = vld [vmem:[%s2255_s26 + $0x54c] sm:$0xf]  ;;  %v426_v50 = vld [vmem:[%s2255_s26 + $0x558] sm:$0xf] }
  0x48   : > { %309 = vst [vmem:[%s2260_s27 + $0xdc] sm:$0xf] %v308_v55  ;;  %v428_v51 = vld [vmem:[%s2255_s26 + $0x564] sm:$0xf]  ;;  %v430_v52 = vld [vmem:[%s2255_s26 + $0x570] sm:$0xf] }
  0x49   : > { %311 = vst [vmem:[%s2260_s27 + $0xe0] sm:$0xf] %v310_v56  ;;  %v432_v53 = vld [vmem:[%s2255_s26 + $0x57c] sm:$0xf]  ;;  %v434_v54 = vld [vmem:[%s2255_s26 + $0x588] sm:$0xf] }
  0x4a   : > { %313 = vst [vmem:[%s2260_s27 + $0xe4] sm:$0xf] %v312_v57  ;;  %v436_v55 = vld [vmem:[%s2255_s26 + $0x594] sm:$0xf]  ;;  %v438_v56 = vld [vmem:[%s2255_s26 + $0x5a0] sm:$0xf] }
  0x4b   : > { %315 = vst [vmem:[%s2260_s27 + $0xe8] sm:$0xf] %v314_v58  ;;  %v440_v57 = vld [vmem:[%s2255_s26 + $0x5ac] sm:$0xf]  ;;  %v442_v58 = vld [vmem:[%s2255_s26 + $0x5b8] sm:$0xf] }
  0x4c   : > { %317 = vst [vmem:[%s2260_s27 + $0xec] sm:$0xf] %v316_v59  ;;  %v444_v59 = vld [vmem:[%s2255_s26 + $0x5c4] sm:$0xf] }
  0x4d   : > { %319 = vst [vmem:[%s2260_s27 + $0xf0] sm:$0xf] %v318_v60  ;;  %v446_v60 = vld [vmem:[%s2255_s26 + $0x5d0] sm:$0xf] }
  0x4e   : > { %321 = vst [vmem:[%s2260_s27 + $0xf4] sm:$0xf] %v320_v61  ;;  %v448_v61 = vld [vmem:[%s2255_s26 + $0x5dc] sm:$0xf] }
  0x4f   : > { %323 = vst [vmem:[%s2260_s27 + $0xf8] sm:$0xf] %v322_v62  ;;  %v450_v62 = vld [vmem:[%s2255_s26 + $0x5e8] sm:$0xf] }
  0x50   : > { %325 = vst [vmem:[%s2260_s27 + $0xfc] sm:$0xf] %v324_v63  ;;  %v452_v63 = vld [vmem:[%s2255_s26 + $0x5f4] sm:$0xf] }
  0x51   : > { %327 = vst [vmem:[%s2260_s27 + $0x100] sm:$0xf] %v326_v0  ;;  %v454_v0 = vld [vmem:[%s2255_s26 + $0x600] sm:$0xf] }
  0x52   : > { %329 = vst [vmem:[%s2260_s27 + $0x104] sm:$0xf] %v328_v1  ;;  %v456_v1 = vld [vmem:[%s2255_s26 + $0x60c] sm:$0xf] }
  0x53   : > { %331 = vst [vmem:[%s2260_s27 + $0x108] sm:$0xf] %v330_v2  ;;  %v458_v2 = vld [vmem:[%s2255_s26 + $0x618] sm:$0xf] }
  0x54   : > { %333 = vst [vmem:[%s2260_s27 + $0x10c] sm:$0xf] %v332_v3  ;;  %v460_v3 = vld [vmem:[%s2255_s26 + $0x624] sm:$0xf] }
  0x55   : > { %335 = vst [vmem:[%s2260_s27 + $0x110] sm:$0xf] %v334_v4  ;;  %v462_v4 = vld [vmem:[%s2255_s26 + $0x630] sm:$0xf] }
  0x56   : > { %337 = vst [vmem:[%s2260_s27 + $0x114] sm:$0xf] %v336_v5  ;;  %v464_v5 = vld [vmem:[%s2255_s26 + $0x63c] sm:$0xf] }
  0x57   : > { %339 = vst [vmem:[%s2260_s27 + $0x118] sm:$0xf] %v338_v6  ;;  %v466_v6 = vld [vmem:[%s2255_s26 + $0x648] sm:$0xf] }
  0x58   : > { %341 = vst [vmem:[%s2260_s27 + $0x11c] sm:$0xf] %v340_v7  ;;  %v468_v7 = vld [vmem:[%s2255_s26 + $0x654] sm:$0xf] }
  0x59   : > { %343 = vst [vmem:[%s2260_s27 + $0x120] sm:$0xf] %v342_v8  ;;  %v470_v8 = vld [vmem:[%s2255_s26 + $0x660] sm:$0xf] }
  0x5a   : > { %345 = vst [vmem:[%s2260_s27 + $0x124] sm:$0xf] %v344_v9  ;;  %v472_v9 = vld [vmem:[%s2255_s26 + $0x66c] sm:$0xf] }
  0x5b   : > { %347 = vst [vmem:[%s2260_s27 + $0x128] sm:$0xf] %v346_v10  ;;  %v474_v10 = vld [vmem:[%s2255_s26 + $0x678] sm:$0xf] }
  0x5c   : > { %349 = vst [vmem:[%s2260_s27 + $0x12c] sm:$0xf] %v348_v11  ;;  %v476_v11 = vld [vmem:[%s2255_s26 + $0x684] sm:$0xf] }
  0x5d   : > { %351 = vst [vmem:[%s2260_s27 + $0x130] sm:$0xf] %v350_v12  ;;  %v478_v12 = vld [vmem:[%s2255_s26 + $0x690] sm:$0xf] }
  0x5e   : > { %353 = vst [vmem:[%s2260_s27 + $0x134] sm:$0xf] %v352_v13  ;;  %v480_v13 = vld [vmem:[%s2255_s26 + $0x69c] sm:$0xf] }
  0x5f   : > { %355 = vst [vmem:[%s2260_s27 + $0x138] sm:$0xf] %v354_v14  ;;  %v482_v14 = vld [vmem:[%s2255_s26 + $0x6a8] sm:$0xf] }
  0x60   : > { %357 = vst [vmem:[%s2260_s27 + $0x13c] sm:$0xf] %v356_v15  ;;  %v484_v15 = vld [vmem:[%s2255_s26 + $0x6b4] sm:$0xf] }
  0x61   : > { %359 = vst [vmem:[%s2260_s27 + $0x140] sm:$0xf] %v358_v16 }
  0x62   : > { %361 = vst [vmem:[%s2260_s27 + $0x144] sm:$0xf] %v360_v17 }
  0x63   : > { %363 = vst [vmem:[%s2260_s27 + $0x148] sm:$0xf] %v362_v18 }
  0x64   : > { %365 = vst [vmem:[%s2260_s27 + $0x14c] sm:$0xf] %v364_v19 }
  0x65   : > { %367 = vst [vmem:[%s2260_s27 + $0x150] sm:$0xf] %v366_v20 }
  0x66   : > { %369 = vst [vmem:[%s2260_s27 + $0x154] sm:$0xf] %v368_v21 }
  0x67   : > { %371 = vst [vmem:[%s2260_s27 + $0x158] sm:$0xf] %v370_v22 }
  0x68   : > { %373 = vst [vmem:[%s2260_s27 + $0x15c] sm:$0xf] %v372_v23 }
  0x69   : > { %375 = vst [vmem:[%s2260_s27 + $0x160] sm:$0xf] %v374_v24 }
  0x6a   : > { %377 = vst [vmem:[%s2260_s27 + $0x164] sm:$0xf] %v376_v25 }
  0x6b   : > { %379 = vst [vmem:[%s2260_s27 + $0x168] sm:$0xf] %v378_v26 }
  0x6c   : > { %381 = vst [vmem:[%s2260_s27 + $0x16c] sm:$0xf] %v380_v27 }
  0x6d   : > { %383 = vst [vmem:[%s2260_s27 + $0x170] sm:$0xf] %v382_v28 }
  0x6e   : > { %385 = vst [vmem:[%s2260_s27 + $0x174] sm:$0xf] %v384_v29 }
  0x6f   : > { %387 = vst [vmem:[%s2260_s27 + $0x178] sm:$0xf] %v386_v30 }
  0x70   : > { %389 = vst [vmem:[%s2260_s27 + $0x17c] sm:$0xf] %v388_v31 }
  0x71   : > { %391 = vst [vmem:[%s2260_s27 + $0x180] sm:$0xf] %v390_v32 }
  0x72   : > { %393 = vst [vmem:[%s2260_s27 + $0x184] sm:$0xf] %v392_v33 }
  0x73   : > { %395 = vst [vmem:[%s2260_s27 + $0x188] sm:$0xf] %v394_v34 }
  0x74   : > { %397 = vst [vmem:[%s2260_s27 + $0x18c] sm:$0xf] %v396_v35 }
  0x75   : > { %399 = vst [vmem:[%s2260_s27 + $0x190] sm:$0xf] %v398_v36 }
  0x76   : > { %401 = vst [vmem:[%s2260_s27 + $0x194] sm:$0xf] %v400_v37 }
  0x77   : > { %403 = vst [vmem:[%s2260_s27 + $0x198] sm:$0xf] %v402_v38 }
  0x78   : > { %405 = vst [vmem:[%s2260_s27 + $0x19c] sm:$0xf] %v404_v39 }
  0x79   : > { %407 = vst [vmem:[%s2260_s27 + $0x1a0] sm:$0xf] %v406_v40 }
  0x7a   : > { %409 = vst [vmem:[%s2260_s27 + $0x1a4] sm:$0xf] %v408_v41 }
  0x7b   : > { %411 = vst [vmem:[%s2260_s27 + $0x1a8] sm:$0xf] %v410_v42 }
  0x7c   : > { %413 = vst [vmem:[%s2260_s27 + $0x1ac] sm:$0xf] %v412_v43 }
  0x7d   : > { %415 = vst [vmem:[%s2260_s27 + $0x1b0] sm:$0xf] %v414_v44 }
  0x7e   : > { %417 = vst [vmem:[%s2260_s27 + $0x1b4] sm:$0xf] %v416_v45 }
  0x7f   : > { %419 = vst [vmem:[%s2260_s27 + $0x1b8] sm:$0xf] %v418_v46 }
  0x80   : > { %421 = vst [vmem:[%s2260_s27 + $0x1bc] sm:$0xf] %v420_v47 }
  0x81   : > { %423 = vst [vmem:[%s2260_s27 + $0x1c0] sm:$0xf] %v422_v48 }
  0x82   : > { %425 = vst [vmem:[%s2260_s27 + $0x1c4] sm:$0xf] %v424_v49 }
  0x83   : > { %427 = vst [vmem:[%s2260_s27 + $0x1c8] sm:$0xf] %v426_v50 }
  0x84   : > { %429 = vst [vmem:[%s2260_s27 + $0x1cc] sm:$0xf] %v428_v51 }
  0x85   : > { %431 = vst [vmem:[%s2260_s27 + $0x1d0] sm:$0xf] %v430_v52 }
  0x86   : > { %433 = vst [vmem:[%s2260_s27 + $0x1d4] sm:$0xf] %v432_v53 }
  0x87   : > { %435 = vst [vmem:[%s2260_s27 + $0x1d8] sm:$0xf] %v434_v54 }
  0x88   : > { %437 = vst [vmem:[%s2260_s27 + $0x1dc] sm:$0xf] %v436_v55 }
  0x89   : > { %439 = vst [vmem:[%s2260_s27 + $0x1e0] sm:$0xf] %v438_v56 }
  0x8a   : > { %441 = vst [vmem:[%s2260_s27 + $0x1e4] sm:$0xf] %v440_v57 }
  0x8b   : > { %443 = vst [vmem:[%s2260_s27 + $0x1e8] sm:$0xf] %v442_v58 }
  0x8c   : > { %445 = vst [vmem:[%s2260_s27 + $0x1ec] sm:$0xf] %v444_v59 }
  0x8d   : > { %447 = vst [vmem:[%s2260_s27 + $0x1f0] sm:$0xf] %v446_v60 }
  0x8e   : > { %449 = vst [vmem:[%s2260_s27 + $0x1f4] sm:$0xf] %v448_v61 }
  0x8f   : > { %451 = vst [vmem:[%s2260_s27 + $0x1f8] sm:$0xf] %v450_v62 }
  0x90   : > { %453 = vst [vmem:[%s2260_s27 + $0x1fc] sm:$0xf] %v452_v63 }
  0x91   : > { %455 = vst [vmem:[%s2260_s27 + $0x200] sm:$0xf] %v454_v0 }
  0x92   : > { %457 = vst [vmem:[%s2260_s27 + $0x204] sm:$0xf] %v456_v1 }
  0x93   : > { %459 = vst [vmem:[%s2260_s27 + $0x208] sm:$0xf] %v458_v2 }
  0x94   : > { %461 = vst [vmem:[%s2260_s27 + $0x20c] sm:$0xf] %v460_v3 }
  0x95   : > { %463 = vst [vmem:[%s2260_s27 + $0x210] sm:$0xf] %v462_v4 }
  0x96   : > { %465 = vst [vmem:[%s2260_s27 + $0x214] sm:$0xf] %v464_v5 }
  0x97   : > { %467 = vst [vmem:[%s2260_s27 + $0x218] sm:$0xf] %v466_v6 }
  0x98   : > { %469 = vst [vmem:[%s2260_s27 + $0x21c] sm:$0xf] %v468_v7 }
  0x99   : > { %471 = vst [vmem:[%s2260_s27 + $0x220] sm:$0xf] %v470_v8 }
  0x9a   : > { %473 = vst [vmem:[%s2260_s27 + $0x224] sm:$0xf] %v472_v9 }
  0x9b   : > { %475 = vst [vmem:[%s2260_s27 + $0x228] sm:$0xf] %v474_v10 }
  0x9c   : > { %477 = vst [vmem:[%s2260_s27 + $0x22c] sm:$0xf] %v476_v11 }
  0x9d   : > { %479 = vst [vmem:[%s2260_s27 + $0x230] sm:$0xf] %v478_v12 }
  0x9e   : > { %481 = vst [vmem:[%s2260_s27 + $0x234] sm:$0xf] %v480_v13 }
  0x9f   : > { %483 = vst [vmem:[%s2260_s27 + $0x238] sm:$0xf] %v482_v14 }
  0xa0   : > { %485 = vst [vmem:[%s2260_s27 + $0x23c] sm:$0xf] %v484_v15 }
  0xa1 PF: > { %p1743_p6 = scmp.ge.s32.totalorder %s2190_s16, 1  ;;  %p802_p7 = scmp.lt.s32.totalorder %s2190_s16, 4 }
  0xa3   : > { %p803_p8 = pnand %p1743_p6, %p802_p7 }
  0xa4   : > { %s809_s28 = sand.u32 (!%p803_p8), 1, %s2174_s12   ;;  %p858_p9 = scmp.lt.s32.totalorder (!%p803_p8), %s2182_s14, 2 }
  0xa5   : > { %806 = sbr.rel (%p803_p8) target bundleno = 404 (0x194), region = 69 }
  0xa6   : > { %s2108_s29 = smul.u32 (!%p803_p8), 576, %s809_s28 }
  0xa8   : > { %s2550_s30 = scalar_lea.vmem (!%p803_p8), [#allocation3], %s2108_s29 }
  0xaa   : > { %v2042_v16 = vld [vmem:[%s2550_s30 + $0x38] sm:$0xff]  ;;  %v2041_v20 = vld [vmem:[%s2550_s30 + $0x30] sm:$0xff]  ;;  %v2040_v24 = vld [vmem:[%s2550_s30 + $0x28] sm:$0xff]  ;;  %s2682_s14 = smov (!%p858_p9, %s2182_s14), 2 }
  0xab   : > { %v2058_v17 = vld [vmem:[%s2550_s30 + $0xb8] sm:$0xff]  ;;  %1488 = vmatpush.bf16.msra.mxu0 %v2042_v16  ;;  %v2057_v21 = vld [vmem:[%s2550_s30 + $0xb0] sm:$0xff]  ;;  %v2056_v25 = vld [vmem:[%s2550_s30 + $0xa8] sm:$0xff]  ;;  %s860_s19 = scalar_lea.vmem %s2673_s2, %s2682_s14  ;;  %s1744_s25 = sshll.u32 %s2682_s14, 3 }
  0xac   : > { %v2066_v18 = vld [vmem:[%s2550_s30 + $0xf8] sm:$0xff]  ;;  %1514 = vmatpush.bf16.msra.mxu2 %v2058_v17  ;;  %v2065_v22 = vld [vmem:[%s2550_s30 + $0xf0] sm:$0xff]  ;;  %v2064_v26 = vld [vmem:[%s2550_s30 + $0xe8] sm:$0xff]  ;;  %s868_s28 = scalar_lea.vmem %s2674_s3, %s1744_s25 }
  0xad   : > { %v2050_v19 = vld [vmem:[%s2550_s30 + $0x78] sm:$0xff]  ;;  %1527 = vmatpush.bf16.msra.mxu3 %v2066_v18  ;;  %v2049_v23 = vld [vmem:[%s2550_s30 + $0x70] sm:$0xff]  ;;  %v2048_v27 = vld [vmem:[%s2550_s30 + $0x68] sm:$0xff] }
  0xae   : > { %1501 = vmatpush.bf16.msra.mxu1 %v2050_v19  ;;  %v2039_v28 = vld [vmem:[%s2550_s30 + $0x20] sm:$0xff]  ;;  %v2038_v32 = vld [vmem:[%s2550_s30 + $0x18] sm:$0xff]  ;;  %v2037_v36 = vld [vmem:[%s2550_s30 + $0x10] sm:$0xff] }
  0xaf   : > { %1489 = vmatpush.bf16.msra.mxu0 %v2041_v20  ;;  %v2055_v29 = vld [vmem:[%s2550_s30 + $0xa0] sm:$0xff]  ;;  %v2054_v33 = vld [vmem:[%s2550_s30 + $0x98] sm:$0xff]  ;;  %v2053_v37 = vld [vmem:[%s2550_s30 + $0x90] sm:$0xff] }
  0xb0   : > { %1515 = vmatpush.bf16.msra.mxu2 %v2057_v21  ;;  %v2063_v30 = vld [vmem:[%s2550_s30 + $0xe0] sm:$0xff]  ;;  %v2062_v34 = vld [vmem:[%s2550_s30 + $0xd8] sm:$0xff]  ;;  %v2061_v38 = vld [vmem:[%s2550_s30 + $0xd0] sm:$0xff] }
  0xb1   : > { %1528 = vmatpush.bf16.msra.mxu3 %v2065_v22  ;;  %v2047_v31 = vld [vmem:[%s2550_s30 + $0x60] sm:$0xff]  ;;  %v2046_v35 = vld [vmem:[%s2550_s30 + $0x58] sm:$0xff]  ;;  %v2045_v39 = vld [vmem:[%s2550_s30 + $0x50] sm:$0xff] }
  0xb2   : > { %1502 = vmatpush.bf16.msra.mxu1 %v2049_v23  ;;  %v2036_v40 = vld [vmem:[%s2550_s30 + $0x8] sm:$0xff]  ;;  %v875_v45 = vld [vmem:[%s2671_s0] sm:$0xff]  ;;  %v2074_v50 = vld [vmem:[%s2550_s30 + $0x138] sm:$0xff] }
  0xb3   : > { %1490 = vmatpush.bf16.msra.mxu0 %v2040_v24  ;;  %v2052_v41 = vld [vmem:[%s2550_s30 + $0x88] sm:$0xff]  ;;  %v2035_v46 = vld [vmem:[%s2550_s30] sm:$0xff]  ;;  %v1029_v49 = vunpack.c.l.b16 %v875_v45  ;;  %v2090_v51 = vld [vmem:[%s2550_s30 + $0x1b8] sm:$0xff]  ;;  %v1030_v55 = vunpack.c.h.b16 %v875_v45 }
  0xb4   : > { %1516 = vmatpush.bf16.msra.mxu2 %v2056_v25  ;;  %v2060_v42 = vld [vmem:[%s2550_s30 + $0xc8] sm:$0xff]  ;;  %v2051_v47 = vld [vmem:[%s2550_s30 + $0x80] sm:$0xff]  ;;  %v2098_v56 = vld [vmem:[%s2550_s30 + $0x1f8] sm:$0xff] }
  0xb5   : > { %1529 = vmatpush.bf16.msra.mxu3 %v2064_v26  ;;  %v2044_v43 = vld [vmem:[%s2550_s30 + $0x48] sm:$0xff]  ;;  %v2059_v52 = vld [vmem:[%s2550_s30 + $0xc0] sm:$0xff]  ;;  %v2082_v57 = vld [vmem:[%s2550_s30 + $0x178] sm:$0xff]  ;;  %v1038_v59 = vpack.c.b16 %v1029_v49, %v1029_v49  ;;  %v1039_v63 = vpack.c.b16 %v1030_v55, %v1030_v55 }
  0xb6   : > { %1503 = vmatpush.bf16.msra.mxu1 %v2048_v27  ;;  %v876_v44 = vld [vmem:[%s2671_s0 + $0x8] sm:$0xff]  ;;  %v2043_v53 = vld [vmem:[%s2550_s30 + $0x40] sm:$0xff]  ;;  %v2073_v60 = vld [vmem:[%s2550_s30 + $0x130] sm:$0xff] }
  0xb7   : > { %1491 = vmatpush.bf16.msra.mxu0 %v2039_v28  ;;  %v1031_v48 = vunpack.c.l.b16 %v876_v44  ;;  %v1032_v54 = vunpack.c.h.b16 %v876_v44  ;;  %v2089_v61 = vld [vmem:[%s2550_s30 + $0x1b0] sm:$0xff]  ;;  %v2072_v2 = vld [vmem:[%s2550_s30 + $0x128] sm:$0xff]  ;;  %v2071_v6 = vld [vmem:[%s2550_s30 + $0x120] sm:$0xff] }
  0xb8   : > { %1517 = vmatpush.bf16.msra.mxu2 %v2055_v29  ;;  %v2097_v0 = vld [vmem:[%s2550_s30 + $0x1f0] sm:$0xff]  ;;  %v2088_v3 = vld [vmem:[%s2550_s30 + $0x1a8] sm:$0xff]  ;;  %v2087_v7 = vld [vmem:[%s2550_s30 + $0x1a0] sm:$0xff] }
  0xb9   : > { %1530 = vmatpush.bf16.msra.mxu3 %v2063_v30  ;;  %v1040_v58 = vpack.c.b16 %v1031_v48, %v1031_v48  ;;  %v1041_v62 = vpack.c.b16 %v1032_v54, %v1032_v54  ;;  %v2081_v1 = vld [vmem:[%s2550_s30 + $0x170] sm:$0xff]  ;;  %v2096_v4 = vld [vmem:[%s2550_s30 + $0x1e8] sm:$0xff]  ;;  %v2095_v8 = vld [vmem:[%s2550_s30 + $0x1e0] sm:$0xff] }
  0xba   : > { %1504 = vmatpush.bf16.msra.mxu1 %v2047_v31  ;;  %v2080_v5 = vld [vmem:[%s2550_s30 + $0x168] sm:$0xff]  ;;  %v2079_v9 = vld [vmem:[%s2550_s30 + $0x160] sm:$0xff]  ;;  %v2070_v10 = vld [vmem:[%s2550_s30 + $0x118] sm:$0xff] }
  0xbb   : > { %1492 = vmatpush.bf16.msra.mxu0 %v2038_v32  ;;  %v2086_v11 = vld [vmem:[%s2550_s30 + $0x198] sm:$0xff]  ;;  %v2069_v14 = vld [vmem:[%s2550_s30 + $0x110] sm:$0xff]  ;;  %v2068_v18 = vld [vmem:[%s2550_s30 + $0x108] sm:$0xff] }
  0xbc   : > { %1518 = vmatpush.bf16.msra.mxu2 %v2054_v33  ;;  %v2094_v12 = vld [vmem:[%s2550_s30 + $0x1d8] sm:$0xff]  ;;  %v2085_v15 = vld [vmem:[%s2550_s30 + $0x190] sm:$0xff]  ;;  %v2084_v19 = vld [vmem:[%s2550_s30 + $0x188] sm:$0xff] }
  0xbd   : > { %1531 = vmatpush.bf16.msra.mxu3 %v2062_v34  ;;  %v2078_v13 = vld [vmem:[%s2550_s30 + $0x158] sm:$0xff]  ;;  %v2093_v16 = vld [vmem:[%s2550_s30 + $0x1d0] sm:$0xff]  ;;  %v2092_v22 = vld [vmem:[%s2550_s30 + $0x1c8] sm:$0xff] }
  0xbe   : > { %1505 = vmatpush.bf16.msra.mxu1 %v2046_v35  ;;  %v2077_v17 = vld [vmem:[%s2550_s30 + $0x150] sm:$0xff]  ;;  %v878_v20 = vld [vmem:[%s2671_s0 + $0x18] sm:$0xff]  ;;  %v2076_v23 = vld [vmem:[%s2550_s30 + $0x148] sm:$0xff] }
  0xbf   : > { %1493 = vmatpush.bf16.msra.mxu0 %v2037_v36  ;;  %v877_v21 = vld [vmem:[%s2671_s0 + $0x10] sm:$0xff]  ;;  %v1035_v24 = vunpack.c.l.b16 %v878_v20  ;;  %v2067_v26 = vld [vmem:[%s2550_s30 + $0x100] sm:$0xff]  ;;  %v2106_v28 = vld [vmem:[%s2550_s30 + $0x238] sm:$0xff]  ;;  %v1036_v29 = vunpack.c.h.b16 %v878_v20 }
  0xc0   : > { %1519 = vmatpush.bf16.msra.mxu2 %v2053_v37  ;;  %v1033_v25 = vunpack.c.l.b16 %v877_v21  ;;  %v2083_v27 = vld [vmem:[%s2550_s30 + $0x180] sm:$0xff]  ;;  %v1034_v32 = vunpack.c.h.b16 %v877_v21  ;;  %v2105_v35 = vld [vmem:[%s2550_s30 + $0x230] sm:$0xff] }
  0xc1   : > { %1532 = vmatpush.bf16.msra.mxu3 %v2061_v38  ;;  %v2091_v30 = vld [vmem:[%s2550_s30 + $0x1c0] sm:$0xff]  ;;  %v1044_v33 = vpack.c.b16 %v1035_v24, %v1035_v24  ;;  %v1045_v36 = vpack.c.b16 %v1036_v29, %v1036_v29  ;;  %v2104_v38 = vld [vmem:[%s2550_s30 + $0x228] sm:$0xff] }
  0xc2   : > { %1506 = vmatpush.bf16.msra.mxu1 %v2045_v39  ;;  %v2075_v31 = vld [vmem:[%s2550_s30 + $0x140] sm:$0xff]  ;;  %v1042_v34 = vpack.c.b16 %v1033_v25, %v1033_v25  ;;  %v1043_v37 = vpack.c.b16 %v1034_v32, %v1034_v32 }
  0xc3   : > { %1494 = vmatpush.bf16.msra.mxu0 %v2036_v40  ;;  %v2103_v39 = vld [vmem:[%s2550_s30 + $0x220] sm:$0xff]  ;;  %v2102_v40 = vld [vmem:[%s2550_s30 + $0x218] sm:$0xff] }
  0xc4   : > { %1520 = vmatpush.bf16.msra.mxu2 %v2052_v41  ;;  %v2101_v41 = vld [vmem:[%s2550_s30 + $0x210] sm:$0xff]  ;;  %v2099_v45 = vld [vmem:[%s2550_s30 + $0x200] sm:$0xff] }
  0xc5   : > { %1533 = vmatpush.bf16.msra.mxu3 %v2060_v42  ;;  %v2100_v42 = vld [vmem:[%s2550_s30 + $0x208] sm:$0xff] }
  0xc6   : > { %1507 = vmatpush.bf16.msra.mxu1 %v2044_v43  ;;  %v879_v43 = vld [vmem:[%s2671_s0 + $0x20] sm:$0xf] }
  0xc7   : > { %1495 = vmatpush.bf16.msra.mxu0 %v2035_v46  ;;  %v1037_v44 = vunpack.c.l.b16 %v879_v43 }
  0xc8   : > { %1521 = vmatpush.bf16.msra.mxu2 %v2051_v47 }
  0xc9   : > { %1534 = vmatpush.bf16.msra.mxu3 %v2059_v52  ;;  %v1046_v46 = vpack.c.b16 %v1037_v44, %v1037_v44 }
  0xca   : > { %1508 = vmatpush.bf16.msra.mxu1 %v2043_v53  ;;  %1496 = vmatmul.bf16.vlgmr.msra.gmra.mxu0 %v1038_v59 }
  0xcb   : > { %1540 = vmatpush.bf16.msrb.mxu0 %v2074_v50  ;;  %1522 = vmatmul.bf16.vlgmr.msra.gmra.mxu2 %v1040_v58 }
  0xcc   : > { %1566 = vmatpush.bf16.msrb.mxu2 %v2090_v51  ;;  %1535 = vmatmul.bf16.vlgmr.msra.gmra.mxu3 %v1041_v62 }
  0xcd   : > { %1579 = vmatpush.bf16.msrb.mxu3 %v2098_v56  ;;  %1509 = vmatmul.bf16.vlgmr.msra.gmra.mxu1 %v1039_v63 }
  0xce   : > { %1553 = vmatpush.bf16.msrb.mxu1 %v2082_v57 }
  0xcf   : > { %1541 = vmatpush.bf16.msrb.mxu0 %v2073_v60 }
  0xd0   : > { %1567 = vmatpush.bf16.msrb.mxu2 %v2089_v61 }
  0xd1   : > { %1580 = vmatpush.bf16.msrb.mxu3 %v2097_v0 }
  0xd2   : > { %1554 = vmatpush.bf16.msrb.mxu1 %v2081_v1 }
  0xd3   : > { %1542 = vmatpush.bf16.msrb.mxu0 %v2072_v2 }
  0xd4   : > { %1568 = vmatpush.bf16.msrb.mxu2 %v2088_v3 }
  0xd5   : > { %1581 = vmatpush.bf16.msrb.mxu3 %v2096_v4 }
  0xd6   : > { %1555 = vmatpush.bf16.msrb.mxu1 %v2080_v5 }
  0xd7   : > { %1543 = vmatpush.bf16.msrb.mxu0 %v2071_v6  ;;  %v2149_v6 = vld [vmem:[%s860_s19] ss:$0 sm:$0xff] }
  0xd8   : > { %1569 = vmatpush.bf16.msrb.mxu2 %v2087_v7 }
  0xd9   : > { %1582 = vmatpush.bf16.msrb.mxu3 %v2095_v8 }
  0xda   : > { %1556 = vmatpush.bf16.msrb.mxu1 %v2079_v9 }
  0xdb   : > { %1544 = vmatpush.bf16.msrb.mxu0 %v2070_v10 }
  0xdc   : > { %1570 = vmatpush.bf16.msrb.mxu2 %v2086_v11 }
  0xdd   : > { %1583 = vmatpush.bf16.msrb.mxu3 %v2094_v12 }
  0xde   : > { %1557 = vmatpush.bf16.msrb.mxu1 %v2078_v13 }
  0xdf   : > { %1545 = vmatpush.bf16.msrb.mxu0 %v2069_v14 }
  0xe0   : > { %1571 = vmatpush.bf16.msrb.mxu2 %v2085_v15 }
  0xe1   : > { %1584 = vmatpush.bf16.msrb.mxu3 %v2093_v16 }
  0xe2   : > { %1558 = vmatpush.bf16.msrb.mxu1 %v2077_v17 }
  0xe3   : > { %1546 = vmatpush.bf16.msrb.mxu0 %v2068_v18 }
  0xe4   : > { %1572 = vmatpush.bf16.msrb.mxu2 %v2084_v19 }
  0xe5   : > { %1585 = vmatpush.bf16.msrb.mxu3 %v2092_v22 }
  0xe6   : > { %1559 = vmatpush.bf16.msrb.mxu1 %v2076_v23 }
  0xe7   : > { %1547 = vmatpush.bf16.msrb.mxu0 %v2067_v26 }
  0xe8   : > { %1573 = vmatpush.bf16.msrb.mxu2 %v2083_v27 }
  0xe9   : > { %1586 = vmatpush.bf16.msrb.mxu3 %v2091_v30 }
  0xea   : > { %1560 = vmatpush.bf16.msrb.mxu1 %v2075_v31  ;;  %1548 = vmatmul.bf16.vlgmr.msrb.gmra.mxu0 %v1042_v34 }
  0xeb   : > { %1592 = vmatpush.bf16.msra.mxu0 %v2106_v28  ;;  %1574 = vmatmul.bf16.vlgmr.msrb.gmra.mxu2 %v1044_v33 }
  0xec   : > { %1587 = vmatmul.bf16.vlgmr.msrb.gmra.mxu3 %v1045_v36 }
  0xed   : > { %1561 = vmatmul.bf16.vlgmr.msrb.gmra.mxu1 %v1043_v37 }
  0xef   : > { %1593 = vmatpush.bf16.msra.mxu0 %v2105_v35 }
  0xf3   : > { %1594 = vmatpush.bf16.msra.mxu0 %v2104_v38 }
  0xf7   : > { %1595 = vmatpush.bf16.msra.mxu0 %v2103_v39 }
  0xfb   : > { %1596 = vmatpush.bf16.msra.mxu0 %v2102_v40 }
  0xff   : > { %1597 = vmatpush.bf16.msra.mxu0 %v2101_v41 }
 0x103   : > { %1598 = vmatpush.bf16.msra.mxu0 %v2100_v42 }
 0x107   : > { %1599 = vmatpush.bf16.msra.mxu0 %v2099_v45 }
 0x10a   : > { %1600 = vmatmul.bf16.vlgmr.msra.gmra.mxu0 %v1046_v46 }
 0x147   : > { %v1497_v47 = vpop.f32.mrf.mxu0 }
 0x14a   : > { %v1510_v48 = vpop.f32.mrf.mxu1 }
 0x14b   : > { %v1511_v57 = vadd.f32 %v1510_v48, %v1497_v47 }
 0x14e   : > { %v1523_v49 = vpop.f32.mrf.mxu2 }
 0x14f   : > { %v1536_v50 = vpop.f32.mrf.mxu3  ;;  %v1499_v51 = vpop.f32.mrf.mxu0  ;;  %v1524_v59 = vadd.f32 %v1523_v49, %v1511_v57 }
 0x151   : > { %v1537_v63 = vadd.f32 %v1536_v50, %v1524_v59 }
 0x152   : > { %v1512_v52 = vpop.f32.mrf.mxu1 }
 0x156   : > { %v1525_v53 = vpop.f32.mrf.mxu2 }
 0x157   : > { %v1538_v54 = vpop.f32.mrf.mxu3 }
 0x167   : > { %v1549_v55 = vpop.f32.mrf.mxu0 }
 0x168   : > { %v1550_v1 = vadd.f32 %v1549_v55, %v1537_v63 }
 0x16a   : > { %v1562_v56 = vpop.f32.mrf.mxu1 }
 0x16b   : > { %v1563_v3 = vadd.f32 %v1562_v56, %v1550_v1 }
 0x16e   : > { %v1575_v58 = vpop.f32.mrf.mxu2 }
 0x16f   : > { %v1588_v60 = vpop.f32.mrf.mxu3  ;;  %v1551_v61 = vpop.f32.mrf.mxu0  ;;  %v1576_v4 = vadd.f32 %v1575_v58, %v1563_v3 }
 0x171   : > { %v1589_v5 = vadd.f32 %v1588_v60, %v1576_v4 }
 0x172   : > { %v1564_v62 = vpop.f32.mrf.mxu1 }
 0x176   : > { %v1577_v0 = vpop.f32.mrf.mxu2 }
 0x177   : > { %v1590_v2 = vpop.f32.mrf.mxu3 }
 0x187   : > { %v1601_v7 = vpop.f32.mrf.mxu0 }
 0x188   : > { %v1602_v8 = vadd.f32 %v1601_v7, %v1589_v5 }
 0x18a   : > { %v1615_v9 = vadd.f32 %v2149_v6, %v1602_v8 }
 0x18c   : > { %2150 = vtanh.f32 %v1615_v9 }
 0x18f   : > { %v1603_v10 = vpop.f32.mrf.mxu0 }
 0x192   : > { %v2151_v11 = vpop.eup %2150 }
 0x193   : > { %1617 = vst [vmem:[%s868_s28] sm:$0xff] %v2151_v11 }
 0x194 PF: > { %s13_s16 = sadd.s32 1, %s2190_s16   ;;  %s2675_s12 = smov %s2178_s13 }
 0x195   : > { %p10_p10 = scmp.ge.s32.totalorder %s13_s16, 5   ;;  %s2676_s13 = smov %s2247_s20 }
 0x196   : > { %s2677_s14 = smov %s2186_s15  ;;  %s2678_s15 = smov %s2680_s17 }
 0x197   :  { %12 = sbr.rel (!%p10_p10) target bundleno = 3 (0x3), region = 122 }

</bundles_post_ra>
